<compile_context>
chip_gen: v7x
topology: tpu7x:2x2x1
jax: 0.10.0
libtpu: 0.0.40
codegen_flags: <defaults>
</compile_context>

<pallas_src>
import functools

import jax
import jax.numpy as jnp
from jax.experimental import pallas as pl
from jax.experimental.pallas import tpu as pltpu


def _sdpa_kernel(*refs, scale, has_bias, return_attn, approx_recip):
    if has_bias:
        q_ref, k_ref, v_ref, bias_ref = refs[:4]
        out_refs = refs[4:]
    else:
        q_ref, k_ref, v_ref = refs[:3]
        out_refs = refs[3:]
    if return_attn:
        out_ref, attn_ref = out_refs
    else:
        (out_ref,) = out_refs

    # Fold 1/temperature into q in the *input* dtype (cheaper than scaling the
    # f32 score matrix whenever Lk > D, and matches PyTorch's q / temperature).
    q = q_ref[...] * jnp.asarray(scale, dtype=q_ref.dtype)   # (G, TQ, D)
    k = k_ref[...]                                           # (G, Lk, D)
    v = v_ref[...]                                           # (G, Lk, Dv)

    # Scores straight off the MXU with f32 accumulation.
    s = jnp.einsum("gqd,gkd->gqk", q, k,
                   preferred_element_type=jnp.float32)       # (G, TQ, Lk)

    if has_bias:
        # Additive {0, -1e9} bias; (1,TQ,Lk) broadcasts over the G heads.
        s = s + bias_ref[...]

    # Numerically-stable softmax along the key axis.
    m = jnp.max(s, axis=-1, keepdims=True)
    e = jnp.exp(s - m)
    denom = jnp.sum(e, axis=-1, keepdims=True)
    attn = e * pl.reciprocal(denom, approx=approx_recip)     # EUP slot

    # Single low-precision cast, reused for matmul feed and attn store.
    attn_lp = attn.astype(v.dtype)
    out = jnp.einsum("gqk,gkd->gqd", attn_lp, v,
                     preferred_element_type=jnp.float32)     # (G, TQ, Dv)

    out_ref[...] = out.astype(out_ref.dtype)
    if return_attn:
        attn_ref[...] = (attn_lp if attn_ref.dtype == v.dtype
                         else attn.astype(attn_ref.dtype))


def scaled_dot_product_attention(q, k, v, temperature, mask=None, *,
                                 return_attn=True,
                                 cast_to_bf16=False,
                                 approx_reciprocal=True,
                                 vmem_budget_bytes=8 * 1024 * 1024):
    """q: (B,H,Lq,D), k: (B,H,Lk,D), v: (B,H,Lk,Dv), mask broadcastable to
    (B,H,Lq,Lk) or None. Returns (out, attn) matching the PyTorch module
    (attn is None when return_attn=False)."""
    B, H, Lq, D = q.shape
    Lk = k.shape[2]
    Dv = v.shape[3]
    BH = B * H

    if cast_to_bf16:
        q, k, v = (x.astype(jnp.bfloat16) for x in (q, k, v))

    in_dtype = q.dtype
    attn_dtype = q.dtype                 # attn carries the input dtype
    in_bytes = jnp.dtype(in_dtype).itemsize
    attn_bytes = jnp.dtype(attn_dtype).itemsize

    qf = q.reshape(BH, Lq, D)
    kf = k.reshape(BH, Lk, D)
    vf = v.reshape(BH, Lk, Dv)

    # ---- mask -> additive bias --------------------------------------------
    bias_mode = None                     # None | "shared" | "batch" | "full"
    bias_arr = None
    bias_bytes = 0
    if mask is not None:
        mask4 = jnp.asarray(mask)
        while mask4.ndim < 4:
            mask4 = mask4[None]
        mb, mh = mask4.shape[0], mask4.shape[1]
        if mb == 1 and mh == 1:
            # One shared (Lq, Lk) bias: single f32 block, resident in VMEM.
            bias_mode = "shared"
            bias_arr = jnp.where(mask4.reshape(1, Lq, Lk) == 0,
                                 jnp.float32(-1e9), jnp.float32(0.0))
            bias_bytes = 4
        elif mh == 1:
            # Varies only over batch: keep it (B, Lq, Lk) — no H-fold broadcast.
            bias_mode = "batch"
            m3 = jnp.broadcast_to(mask4, (B, 1, Lq, Lk)).reshape(B, Lq, Lk)
            bias_arr = jnp.where(m3 == 0, jnp.float32(-1e9), jnp.float32(0.0))
            bias_bytes = 4
        else:
            # Genuinely per-(batch, head): bf16 bias to halve HBM traffic.
            bias_mode = "full"
            m3 = jnp.broadcast_to(mask4, (B, H, Lq, Lk)).reshape(BH, Lq, Lk)
            bias_arr = jnp.where(m3 == 0, jnp.float32(-1e9),
                                 jnp.float32(0.0)).astype(jnp.bfloat16)
            bias_bytes = 2

    # ---- tile selection (double-buffer-aware footprint) --------------------
    def step_bytes(g, tq):
        b = 2 * g * (tq * D + Lk * D + Lk * Dv) * in_bytes   # q/k/v tiles (x2 buf)
        b += 2 * g * tq * Dv * in_bytes                      # out tile
        if return_attn:
            b += 2 * g * tq * Lk * attn_bytes                # attn tile
        if bias_mode == "full":
            b += 2 * g * tq * Lk * bias_bytes
        elif bias_mode is not None:
            b += 2 * tq * Lk * bias_bytes
        b += 3 * g * tq * Lk * 4                             # live f32 s/e/attn
        return b

    # Lq blocking: bound the f32 temporaries even at G=1 (long sequences);
    # prefer blocks up to 512 so the M dim can fill the 256x256 MXU.
    if Lq % 8 == 0:
        tq_cands = [d for d in range(min(Lq, 512), 7, -1)
                    if Lq % d == 0 and d % 8 == 0]
    else:
        tq_cands = [Lq]
    TQ = tq_cands[-1]
    for cand in tq_cands:
        if step_bytes(1, cand) <= vmem_budget_bytes:
            TQ = cand
            break

    # Group size: largest divisor of BH (of H for batch-varying masks so a
    # group never straddles a batch) fitting the budget while keeping the
    # group axis >= 2 steps so v7x's two TensorCores both get work.
    g_base = H if bias_mode == "batch" else BH
    G = 1
    for cand in range(g_base, 0, -1):
        if g_base % cand:
            continue
        if step_bytes(cand, TQ) > vmem_budget_bytes:
            continue
        if BH >= 2 and BH // cand < 2:
            continue
        G = cand
        break

    NQ = Lq // TQ
    grid = (BH // G, NQ)

    # ---- specs --------------------------------------------------------------
    in_specs = [
        pl.BlockSpec((G, TQ, D), lambda i, j: (i, j, 0)),
        pl.BlockSpec((G, Lk, D), lambda i, j: (i, 0, 0)),    # resident over j
        pl.BlockSpec((G, Lk, Dv), lambda i, j: (i, 0, 0)),   # resident over j
    ]
    args = [qf, kf, vf]

    has_bias = bias_mode is not None
    if has_bias:
        if bias_mode == "shared":
            in_specs.append(pl.BlockSpec((1, TQ, Lk), lambda i, j: (0, j, 0)))
        elif bias_mode == "batch":
            gph = H // G                                      # groups per batch
            in_specs.append(
                pl.BlockSpec((1, TQ, Lk), lambda i, j: (i // gph, j, 0)))
        else:
            in_specs.append(pl.BlockSpec((G, TQ, Lk), lambda i, j: (i, j, 0)))
        args.append(bias_arr)

    out_shapes = [jax.ShapeDtypeStruct((BH, Lq, Dv), in_dtype)]
    out_specs = [pl.BlockSpec((G, TQ, Dv), lambda i, j: (i, j, 0))]
    if return_attn:
        out_shapes.append(jax.ShapeDtypeStruct((BH, Lq, Lk), attn_dtype))
        out_specs.append(pl.BlockSpec((G, TQ, Lk), lambda i, j: (i, j, 0)))

    kernel = functools.partial(_sdpa_kernel,
                               scale=1.0 / float(temperature),
                               has_bias=has_bias,
                               return_attn=return_attn,
                               approx_recip=approx_reciprocal)

    vmem_limit = int(min(48 * 1024 * 1024,
                         max(16 * 1024 * 1024,
                             step_bytes(G, TQ) + 4 * 1024 * 1024)))

    results = pl.pallas_call(
        kernel,
        out_shape=tuple(out_shapes),
        grid_spec=pltpu.PrefetchScalarGridSpec(
            num_scalar_prefetch=0,
            grid=grid,
            in_specs=in_specs,
            out_specs=tuple(out_specs),
        ),
        compiler_params=pltpu.CompilerParams(
            # Group axis parallel (megacore / v7x 2-TC split); the Lq axis is
            # kept sequential so resident k/v blocks are not re-fetched.
            dimension_semantics=("parallel", "arbitrary"),
            vmem_limit_bytes=vmem_limit,
        ),
    )(*args)

    if return_attn:
        out_f, attn_f = results
        return out_f.reshape(B, H, Lq, Dv), attn_f.reshape(B, H, Lq, Lk)
    out_f = results[0] if isinstance(results, (tuple, list)) else results
    return out_f.reshape(B, H, Lq, Dv), None


def _reference(q, k, v, temperature, mask=None):
    scores = jnp.einsum("bhqd,bhkd->bhqk", q / temperature, k,
                        precision=jax.lax.Precision.HIGHEST)
    if mask is not None:
        scores = jnp.where(mask == 0, -1e9, scores)
    attn = jax.nn.softmax(scores, axis=-1)
    out = jnp.einsum("bhqk,bhkd->bhqd", attn, v,
                     precision=jax.lax.Precision.HIGHEST)
    return out, attn


if __name__ == "__main__":
    B, H, L, D = 2, 8, 128, 128
    temperature = float(D) ** 0.5

    key = jax.random.PRNGKey(0)
    kq, kk, kv, km = jax.random.split(key, 4)
    q = jax.random.normal(kq, (B, H, L, D), dtype=jnp.float32)
    k = jax.random.normal(kk, (B, H, L, D), dtype=jnp.float32)
    v = jax.random.normal(kv, (B, H, L, D), dtype=jnp.float32)

    # 1) float32, no mask
    out, attn = scaled_dot_product_attention(q, k, v, temperature)
    jax.block_until_ready((out, attn))
    out_r, attn_r = _reference(q, k, v, temperature)
    assert jnp.allclose(out, out_r, atol=5e-3, rtol=5e-3)
    assert jnp.allclose(attn, attn_r, atol=5e-3, rtol=5e-3)

    # 2) float32, shared (1,1,L,L) mask (single resident bias block)
    mask = (jax.random.uniform(km, (1, 1, L, L)) > 0.2).astype(jnp.int32)
    out_m, attn_m = scaled_dot_product_attention(q, k, v, temperature, mask=mask)
    jax.block_until_ready((out_m, attn_m))
    out_mr, attn_mr = _reference(q, k, v, temperature, mask=mask)
    assert jnp.allclose(out_m, out_mr, atol=5e-3, rtol=5e-3)
    assert jnp.allclose(attn_m, attn_mr, atol=5e-3, rtol=5e-3)

    # 3) float32, batch-varying (B,1,L,L) mask (no H-fold broadcast in HBM)
    mask_b = (jax.random.uniform(km, (B, 1, L, L)) > 0.2).astype(jnp.int32)
    out_bm, attn_bm = scaled_dot_product_attention(q, k, v, temperature,
                                                   mask=mask_b)
    jax.block_until_ready((out_bm, attn_bm))
    out_bmr, attn_bmr = _reference(q, k, v, temperature, mask=mask_b)
    assert jnp.allclose(out_bm, out_bmr, atol=5e-3, rtol=5e-3)
    assert jnp.allclose(attn_bm, attn_bmr, atol=5e-3, rtol=5e-3)

    # 4) bfloat16, no mask (MXU-native dtype path)
    qb, kb, vb = (x.astype(jnp.bfloat16) for x in (q, k, v))
    out_b, attn_b = scaled_dot_product_attention(qb, kb, vb, temperature)
    jax.block_until_ready((out_b, attn_b))
    out_br, attn_br = _reference(qb.astype(jnp.float32), kb.astype(jnp.float32),
                                 vb.astype(jnp.float32), temperature)
    assert jnp.allclose(out_b.astype(jnp.float32), out_br, atol=4e-2, rtol=4e-2)
    assert jnp.allclose(attn_b.astype(jnp.float32), attn_br, atol=3e-2, rtol=3e-2)

    # 5) attn output skipped (halves HBM writes when the caller ignores attn)
    out_only, attn_none = scaled_dot_product_attention(q, k, v, temperature,
                                                       return_attn=False)
    jax.block_until_ready(out_only)
    assert attn_none is None
    assert jnp.allclose(out_only, out_r, atol=5e-3, rtol=5e-3)

    print("KERNEL_OK")
</pallas_src>

<mosaic_0001>
module attributes {stable_mosaic.version = 11 : i64} {
  func.func @_sdpa_kernel(%arg0: i32, %arg1: i32, %arg2: memref<8x128x128xf32, #tpu.memory_space<vmem>>, %arg3: memref<8x128x128xf32, #tpu.memory_space<vmem>>, %arg4: memref<8x128x128xf32, #tpu.memory_space<vmem>>, %arg5: memref<8x128x128xf32, #tpu.memory_space<vmem>>, %arg6: memref<8x128x128xf32, #tpu.memory_space<vmem>>) attributes {dimension_semantics = [#tpu.dimension_semantics<parallel>, #tpu.dimension_semantics<arbitrary>], iteration_bounds = array<i64: 2, 1>, scalar_prefetch = 0 : i64, scratch_operands = 0 : i64, tpu.core_type = #tpu.core_type<tc>, window_params = [{transform_indices = @transform_0, window_bounds = array<i64: 8, 128, 128>}, {transform_indices = @transform_1, window_bounds = array<i64: 8, 128, 128>}, {transform_indices = @transform_2, window_bounds = array<i64: 8, 128, 128>}, {transform_indices = @transform_3, window_bounds = array<i64: 8, 128, 128>}, {transform_indices = @transform_4, window_bounds = array<i64: 8, 128, 128>}]} {
    %c0 = arith.constant 0 : index
    %c0_0 = arith.constant 0 : index
    %c0_1 = arith.constant 0 : index
    %0 = vector.load %arg2[%c0, %c0_0, %c0_1] : memref<8x128x128xf32, #tpu.memory_space<vmem>>, vector<8x128x128xf32>
    %cst = arith.constant 0.0883883461 : f32
    %1 = vector.broadcast %cst : f32 to vector<8x128x128xf32>
    %2 = arith.mulf %0, %1 : vector<8x128x128xf32>
    %c0_2 = arith.constant 0 : index
    %c0_3 = arith.constant 0 : index
    %c0_4 = arith.constant 0 : index
    %3 = vector.load %arg3[%c0_2, %c0_3, %c0_4] : memref<8x128x128xf32, #tpu.memory_space<vmem>>, vector<8x128x128xf32>
    %c0_5 = arith.constant 0 : index
    %c0_6 = arith.constant 0 : index
    %c0_7 = arith.constant 0 : index
    %4 = vector.load %arg4[%c0_5, %c0_6, %c0_7] : memref<8x128x128xf32, #tpu.memory_space<vmem>>, vector<8x128x128xf32>
    "tpu.trace_start"() <{level = 10 : i32, message = "gqd,gkd->gqk"}> : () -> ()
    %cst_8 = arith.constant dense<0.000000e+00> : vector<8x128x128xf32>
    %5 = tpu.matmul %2, %3, %cst_8 {dimension_numbers = #tpu.dot_dimension_numbers<[2], [2], [1], [1], [0, 0, 0, 1, 1, 1], [0], [0]>} : vector<8x128x128xf32>, vector<8x128x128xf32>, vector<8x128x128xf32> -> vector<8x128x128xf32>
    "tpu.trace_stop"() : () -> ()
    %cst_9 = arith.constant dense<0xFF800000> : vector<8x128xf32>
    %6 = vector.multi_reduction <maximumf>, %5, %cst_9 [2] : vector<8x128x128xf32> to vector<8x128xf32>
    %7 = vector.shape_cast %6 : vector<8x128xf32> to vector<8x128x1xf32>
    %8 = vector.broadcast %7 : vector<8x128x1xf32> to vector<8x128x128xf32>
    %9 = arith.subf %5, %8 : vector<8x128x128xf32>
    %10 = math.exp %9 : vector<8x128x128xf32>
    %cst_10 = arith.constant dense<0.000000e+00> : vector<8x128xf32>
    %11 = vector.multi_reduction <add>, %10, %cst_10 [2] : vector<8x128x128xf32> to vector<8x128xf32>
    %12 = vector.shape_cast %11 : vector<8x128xf32> to vector<8x128x1xf32>
    %13 = tpu.reciprocal %12 {approx = true} : vector<8x128x1xf32> -> vector<8x128x1xf32>
    %14 = vector.broadcast %13 : vector<8x128x1xf32> to vector<8x128x128xf32>
    %15 = arith.mulf %10, %14 : vector<8x128x128xf32>
    "tpu.trace_start"() <{level = 10 : i32, message = "gqk,gkd->gqd"}> : () -> ()
    %cst_11 = arith.constant dense<0.000000e+00> : vector<8x128x128xf32>
    %16 = tpu.matmul %15, %4, %cst_11 {dimension_numbers = #tpu.dot_dimension_numbers<[2], [1], [1], [2], [0, 0, 0, 1, 1, 2], [0], [0]>} : vector<8x128x128xf32>, vector<8x128x128xf32>, vector<8x128x128xf32> -> vector<8x128x128xf32>
    "tpu.trace_stop"() : () -> ()
    %c0_12 = arith.constant 0 : index
    %c0_13 = arith.constant 0 : index
    %c0_14 = arith.constant 0 : index
    %17 = vector.load %arg5[%c0_12, %c0_13, %c0_14] : memref<8x128x128xf32, #tpu.memory_space<vmem>>, vector<8x128x128xf32>
    tpu.vector_store %arg5[%c0_12, %c0_13, %c0_14], %16 {strides = array<i32>} : memref<8x128x128xf32, #tpu.memory_space<vmem>>, vector<8x128x128xf32>,
    %c0_15 = arith.constant 0 : index
    %c0_16 = arith.constant 0 : index
    %c0_17 = arith.constant 0 : index
    %18 = vector.load %arg6[%c0_15, %c0_16, %c0_17] : memref<8x128x128xf32, #tpu.memory_space<vmem>>, vector<8x128x128xf32>
    tpu.vector_store %arg6[%c0_15, %c0_16, %c0_17], %15 {strides = array<i32>} : memref<8x128x128xf32, #tpu.memory_space<vmem>>, vector<8x128x128xf32>,
    return
  }
  func.func @transform_0(%arg0: i32, %arg1: i32) -> (i32, i32, i32) {
    %c0_i32 = arith.constant 0 : i32
    %c0_i32_0 = arith.constant 0 : i32
    return %arg0, %arg1, %c0_i32 : i32, i32, i32
  }
  func.func @transform_1(%arg0: i32, %arg1: i32) -> (i32, i32, i32) {
    %c0_i32 = arith.constant 0 : i32
    %c0_i32_0 = arith.constant 0 : i32
    %c0_i32_1 = arith.constant 0 : i32
    return %arg0, %c0_i32, %c0_i32_0 : i32, i32, i32
  }
  func.func @transform_2(%arg0: i32, %arg1: i32) -> (i32, i32, i32) {
    %c0_i32 = arith.constant 0 : i32
    %c0_i32_0 = arith.constant 0 : i32
    %c0_i32_1 = arith.constant 0 : i32
    return %arg0, %c0_i32, %c0_i32_0 : i32, i32, i32
  }
  func.func @transform_3(%arg0: i32, %arg1: i32) -> (i32, i32, i32) {
    %c0_i32 = arith.constant 0 : i32
    %c0_i32_0 = arith.constant 0 : i32
    return %arg0, %arg1, %c0_i32 : i32, i32, i32
  }
  func.func @transform_4(%arg0: i32, %arg1: i32) -> (i32, i32, i32) {
    %c0_i32 = arith.constant 0 : i32
    %c0_i32_0 = arith.constant 0 : i32
    return %arg0, %arg1, %c0_i32 : i32, i32, i32
  }
}

</mosaic_0001>

<bundles_post_ra>
// kernel: tpu_custom_call.1
= control target key start
LH: loop header
LB: loop body
LE: loop exit
PB: predicated region body
PF: predicated region fallthrough
CT: control target
= control target key end

     0   :  { %s10169_s0 = inlined_call_operand.hbm [shape: f32[16,128,128], index: 0, kind: input, shape index: {}]   ;;  %s10170_s1 = inlined_call_operand.hbm [shape: f32[16,128,128], index: 1, kind: input, shape index: {}]   ;;  %s10171_s2 = inlined_call_operand.hbm [shape: f32[16,128,128], index: 2, kind: input, shape index: {}]   ;;  %s10172_s3 = inlined_call_operand.hbm [shape: f32[16,128,128], index: 3, kind: output, shape index: {0}]   ;;  %s10173_s4 = inlined_call_operand.hbm [shape: f32[16,128,128], index: 4, kind: output, shape index: {1}]  }
   0x1   :  { %10467 = sst [smem:[#allocation152_spill]] %s10170_s1 }
   0x2   :  { %10 = vsyncpa [#allocation3], 0 }
   0x3   :  { %12 = vsyncpa [#allocation3 + $0x1], 0 }
   0x4   :  { %13 = vsyncpa [#allocation6], 0 }
   0x5   :  { %15 = vsyncpa [#allocation6 + $0x1], 0 }
   0x6   :  { %16 = vsyncpa [#allocation4], 0 }
   0x7   :  { %18 = vsyncpa [#allocation4 + $0x1], 0 }
   0x8   :  { %19 = vsyncpa [#allocation10], 0 }
   0x9   :  { %21 = vsyncpa [#allocation10 + $0x1], 0  ;;  %s7580_s15 = smov 0   ;;  %s7582_s16 = smov 0  }
   0xa   :  { %s7584_s17 = smov 0   ;;  %s7586_s18 = smov 0  }
   0xb   :  { %s7588_s19 = smov 0   ;;  %s7590_s20 = smov 0  }
   0xc LB: > { %10468 = sst [smem:[#allocation15_spill]] %s7540_s19  ;;  %s7611_s21 = sadd.s32 4294967295, %s7544_s20   ;;  %s7544_s20 = sphi %s7590_s20, %s27_s20   ;;  %s7540_s19 = sphi %s7588_s19, %s11031_s19   ;;  %s7536_s18 = sphi %s7586_s18, %s11030_s18   ;;  %s7532_s17 = sphi %s7584_s17, %s11034_s17   ;;  %s7528_s16 = sphi %s7582_s16, %s11033_s16   ;;  %s7524_s15 = sphi %s7580_s15, %s11032_s15  }
   0xd   : > { %10469 = sst [smem:[#allocation16_spill]] %s7544_s20  ;;  %s4782_s22 = sadd.s32 4294967294, %s7544_s20  }
   0xe   : > { %s39_s23 = sadd.s32 1, %s7540_s19  ;;  %s48_s24 = sadd.s32 1, %s7532_s17 }
   0xf   : > { %p41_p0 = scmp.ge.s32.totalorder %s39_s23, 2  ;;  %p55_p1 = scmp.ne.s32.totalorder %s7532_s17, %s7528_s16 }
  0x10   : > { %p56_p2 = scmp.eq.s32.totalorder %s7544_s20, 0  ;;  %p61_p3 = scmp.ne.s32.totalorder %s7528_s16, %s7524_s15 }
  0x11   : > { %s11036_s23 = smov (%p41_p0, %s39_s23), 0  ;;  %p62_p5 = scmp.eq.s32.totalorder %s7611_s21, 0 }
  0x12   : > { %10470 = sst [smem:[#allocation17_spill]] %s11036_s23  ;;  %p7623_p4 = por %p56_p2, %p55_p1 }
  0x13   : > { %s43_s26 = ssub.s32 %s7540_s19, %s11036_s23  ;;  %p139_p6 = scmp.eq.s32.totalorder %s7611_s21, 1 }
  0x14   : > { %p46_p7 = scmp.eq.s32.totalorder %s43_s26, 0  ;;  %p7631_p8 = por %p62_p5, %p61_p3 }
  0x15   : > { %p7635_p9 = por %p139_p6, %p55_p1  ;;  %p145_p10 = scmp.eq.s32.totalorder %s4782_s22, 1 }
  0x16   : > { %s10472_s27 = scalar_select %p7631_p8, 1, 0 }
  0x17   : > { %s10473_s28 = scalar_select %p7635_p9, 1, 0 }
  0x18   : > { %s7640_s29 = scalar_select %p46_p7, %s7532_s17, %s48_s24  }
  0x19   : > { %p7642_p11 = por %p145_p10, %p61_p3  ;;  %p6770_p13 = scmp.lt.s32.totalorder %s7544_s20, 2 }
  0x1a   : > { %10474 = sst [smem:[#allocation18_spill]] %s7640_s29  ;;  %s10174_s5 = sand.u32 1, %s7532_s17  }
  0x1b   : > { %s10475_s30 = scalar_select %p7642_p11, 1, 0 }
  0x1c   : > { %s7651_s6 = sshll.u32 %s10174_s5, 10  ;;  %s7654_s7 = sshll.u32 %s7540_s19, 14 }
  0x1d   : > { %p7658_p0 = pnand %p6770_p13, %p7623_p4  ;;  %s217_s9 = sand.u32 1, %s7544_s20  }
  0x1e   : > { %s10477_s1 = sld [smem:[#allocation152_spill]]  ;;  %s221_s13 = scalar_lea.vmem [#allocation5], %s7651_s6 }
  0x1f   : > { %s229_s14 = sshll.u32 %s221_s13, 4  ;;  %s7674_s22 = scalar_lea.sflag [#allocation6], %s217_s9  ;;  %s7671_s14 = int_to_ptr.vmem [resolvable:$true] %s229_s14 }
  0x20   : > { %p7680_p4 = pneg %p7658_p0 }
  0x24   : > { %s7667_s12 = scalar_lea.hbm %s10477_s1, %s7654_s7  ;;  %s7341_s11 = scalar_lea.hbm %s10477_s1, 32768 }
  0x25   : > { %s7336_s24 = scalar_lea.hbm %s7667_s12, 16384  ;;  %p7342_p7 = scmp.lt.u32.totalorder %s7667_s12, %s10477_s1 }
  0x26   : > { %p7337_p3 = scmp.ne.s32.totalorder %s7667_s12, %s7336_s24  ;;  %p7343_p10 = scmp.lt.u32.totalorder %s7341_s11, %s7336_s24 }
  0x27   : > { %p7345_p12 = scmp.lt.u32.totalorder %s7336_s24, %s7667_s12 }
  0x28   : > { %p7339_p5 = pnand %p7680_p4, %p7337_p3  ;;  %p7344_p13 = por %p7343_p10, %p7342_p7 }
  0x2a   : > { %p7340_p6 = pneg %p7339_p5  ;;  %p7346_p1 = por %p7345_p12, %p7344_p13 }
  0x2c   : > { %p7347_p2 = pnand %p7346_p1, %p7340_p6 }
  0x2e   : > { %7350 = shalt.err (!%p7347_p2)
}
  0x2f   : > { %s7351_s9 = scalar_lea.vmem %s7671_s14, 16384  ;;  %s7546_s26 = smov [#allocation5]  }
  0x30   : > { %p7352_p3 = scmp.ne.s32.totalorder %s7671_s14, %s7351_s9  ;;  %s7356_s10 = sshll.u32 %s7546_s26, 4  ;;  %s7357_s10 = int_to_ptr.vmem [resolvable:$false] %s7356_s10 }
  0x31   : > { %s7358_s5 = scalar_lea.vmem %s7357_s10, 32768  ;;  %p7359_p9 = scmp.lt.s32.totalorder %s7671_s14, %s7357_s10 }
  0x32   : > { %p7354_p5 = pnand %p7352_p3, %p7680_p4  ;;  %p7360_p8 = scmp.lt.s32.totalorder %s7358_s5, %s7351_s9 }
  0x34   : > { %p7355_p11 = pneg %p7354_p5  ;;  %p7361_p7 = por %p7360_p8, %p7359_p9 }
  0x36   : > { %p7362_p10 = pnand %p7361_p7, %p7355_p11 }
  0x38   : > { %7365 = shalt.err (!%p7362_p10)
}
  0x39   : > { %s10177_s24 = smov 128   ;;  %s10179_s11 = smov 8  }
  0x3a   : > { %6759 = dma.hbm_to_vmem [thread:$0]  (!%p7658_p0), %s7667_s12, 16384, %s7671_s14, %s7674_s22, %s10177_s24, %s10177_s24, %s10179_s11  }
  0x3b   : > { %p10479_p8 = scmp.lt.s32.totalorder %s7544_s20, 3  ;;  %p10480_p9 = scmp.ge.s32.totalorder %s7544_s20, 1 }
  0x3c   : > { %s7719_s10 = scalar_lea.hbm %s10169_s0, %s7654_s7  ;;  %s197_s5 = scalar_lea.vmem [#allocation2], %s7651_s6 }
  0x3d   : > { %p7711_p11 = pnand %p10480_p9, %p10479_p8  ;;  %s207_s1 = sshll.u32 %s197_s5, 4  ;;  %s7722_s1 = int_to_ptr.vmem [resolvable:$true] %s207_s1 }
  0x3e   : > { %s7728_s24 = scalar_lea.hbm %s10171_s2, %s7654_s7  ;;  %s10482_s11 = sand.u32 1, %s7532_s17  }
  0x3f   : > { %s10481_s13 = scalar_select %p7711_p11, 1, 0 }
  0x40   : > { %s7732_s23 = scalar_lea.sflag [#allocation3], %s10482_s11  ;;  %s7366_s19 = scalar_lea.hbm %s7719_s10, 16384 }
  0x41   : > { %p7367_p12 = scmp.ne.s32.totalorder %s7719_s10, %s7366_s19  ;;  %s7371_s29 = scalar_lea.hbm %s10169_s0, 32768 }
  0x42   : > { %p7372_p6 = scmp.lt.u32.totalorder %s7719_s10, %s10169_s0  ;;  %p7373_p13 = scmp.lt.u32.totalorder %s7371_s29, %s7366_s19 }
  0x43   : > { %p7369_p1 = pnand %p7367_p12, %p7680_p4  ;;  %p7375_p5 = scmp.lt.u32.totalorder %s7366_s19, %s7719_s10 }
  0x44   : > { %p7374_p3 = por %p7373_p13, %p7372_p6 }
  0x45   : > { %p7370_p2 = pneg %p7369_p1 }
  0x46   : > { %p7376_p7 = por %p7375_p5, %p7374_p3 }
  0x48   : > { %p7377_p10 = pnand %p7376_p7, %p7370_p2 }
  0x4a   : > { %7380 = shalt.err (!%p7377_p10)
}
  0x4b   : > { %s7381_s7 = scalar_lea.vmem %s7722_s1, 16384  ;;  %s7549_s11 = smov [#allocation2]  }
  0x4c   : > { %p7382_p8 = scmp.ne.s32.totalorder %s7722_s1, %s7381_s7  ;;  %s7386_s12 = sshll.u32 %s7549_s11, 4  ;;  %s7387_s12 = int_to_ptr.vmem [resolvable:$false] %s7386_s12 }
  0x4d   : > { %s7388_s20 = scalar_lea.vmem %s7387_s12, 32768  ;;  %p7389_p1 = scmp.lt.s32.totalorder %s7722_s1, %s7387_s12 }
  0x4e   : > { %p7384_p9 = pnand %p7382_p8, %p7680_p4  ;;  %p7390_p11 = scmp.lt.s32.totalorder %s7388_s20, %s7381_s7 }
  0x50   : > { %p7385_p12 = pneg %p7384_p9  ;;  %p7391_p6 = por %p7390_p11, %p7389_p1 }
  0x52   : > { %p7392_p13 = pnand %p7391_p6, %p7385_p12 }
  0x54   : > { %7395 = shalt.err (!%p7392_p13)
}
  0x55   : > { %s10483_s19 = smov 8   ;;  %s10484_s29 = smov 128  }
  0x56   : > { %6756 = dma.hbm_to_vmem [thread:$0]  (!%p7658_p0), %s7719_s10, 16384, %s7722_s1, %s7732_s23, %s10484_s29, %s10484_s29, %s10483_s19  }
  0x57   : > { %s243_s14 = scalar_lea.vmem [#allocation7], %s7651_s6  ;;  %s7396_s26 = scalar_lea.hbm %s7728_s24, 16384 }
  0x58   : > { %s251_s9 = sshll.u32 %s243_s14, 4  ;;  %p7397_p11 = scmp.ne.s32.totalorder %s7728_s24, %s7396_s26  ;;  %s7760_s9 = int_to_ptr.vmem [resolvable:$true] %s251_s9 }
  0x59   : > { %s7401_s11 = scalar_lea.hbm %s10171_s2, 32768  ;;  %p7402_p5 = scmp.lt.u32.totalorder %s7728_s24, %s10171_s2 }
  0x5a   : > { %p7399_p2 = pnand %p7397_p11, %p7680_p4  ;;  %p7403_p7 = scmp.lt.u32.totalorder %s7401_s11, %s7396_s26 }
  0x5b   : > { %p7405_p8 = scmp.lt.u32.totalorder %s7396_s26, %s7728_s24 }
  0x5c   : > { %p7400_p3 = pneg %p7399_p2  ;;  %p7404_p10 = por %p7403_p7, %p7402_p5 }
  0x5e   : > { %p7406_p9 = por %p7405_p8, %p7404_p10 }
  0x60   : > { %p7407_p12 = pnand %p7406_p9, %p7400_p3 }
  0x62   : > { %7410 = shalt.err (!%p7407_p12)
}
  0x63   : > { %s7411_s1 = scalar_lea.vmem %s7760_s9, 16384  ;;  %s7550_s23 = smov [#allocation7]  }
  0x64   : > { %p7412_p1 = scmp.ne.s32.totalorder %s7760_s9, %s7411_s1  ;;  %s7416_s6 = sshll.u32 %s7550_s23, 4  ;;  %s7417_s6 = int_to_ptr.vmem [resolvable:$false] %s7416_s6 }
  0x65   : > { %s7418_s10 = scalar_lea.vmem %s7417_s6, 32768  ;;  %p7419_p11 = scmp.lt.s32.totalorder %s7760_s9, %s7417_s6 }
  0x66   : > { %p7414_p6 = pnand %p7412_p1, %p7680_p4  ;;  %p7420_p2 = scmp.lt.s32.totalorder %s7418_s10, %s7411_s1 }
  0x68   : > { %p7415_p13 = pneg %p7414_p6  ;;  %p7421_p5 = por %p7420_p2, %p7419_p11 }
  0x6a   : > { %p7422_p7 = pnand %p7421_p5, %p7415_p13 }
  0x6c   : > { %7425 = shalt.err (!%p7422_p7)
}
  0x6d   : > { %6762 = dma.hbm_to_vmem [thread:$0]  (!%p7658_p0), %s7728_s24, 16384, %s7760_s9, %s7674_s22, %s10484_s29, %s10484_s29, %s10483_s19  }
  0x6e   : > { %p10485_p4 = scmp.ne.s32.totalorder %s10481_s13, 0 }
  0x70   : > { %263 = sbr.rel (%p10485_p4) target bundleno = 1299 (0x513), region = 32 }
  0x77   : > { %s7790_s25 = sand.u32 1, %s7528_s16   ;;  %p10486_p3 = scmp.ne.s32.totalorder %s10472_s27, 0 }
  0x78   : > { %s7793_s14 = sshll.u32 %s7790_s25, 10  ;;  %s266_s8 = scalar_lea.sflag [#allocation3], %s7790_s25 }
  0x79   : > { %s7797_s26 = scalar_lea.vmem [#allocation2], %s7793_s14 }
  0x7a   : > { %7507 = dma.done.wait (%p10486_p3), %s266_s8, 16384  }
  0x7b   : > { %7509 = vsyncadd (%p10486_p3), %s266_s8, 4294950912  ;;  %s274_s22 = sand.u32 1, %s7611_s21   ;;  %s7805_s13 = scalar_lea.vmem [#allocation5], %s7793_s14 }
  0x7c   : > { %s275_s24 = scalar_lea.sflag [#allocation6], %s274_s22 }
  0x7d   : > { %7511 = dma.done.wait (%p10486_p3), %s275_s24, 32768  }
  0x7e   : > { %7513 = vsyncadd (%p10486_p3), %s275_s24, 4294934528  ;;  %v591_v0 = vld [vmem:[%s7805_s13] sm:$0xff]  ;;  %v592_v1 = vld [vmem:[%s7805_s13 + $0x8] sm:$0xff]  ;;  %s8411_s21 = scalar_lea.vmem [#allocation7], %s7793_s14  ;;  %s9071_s27 = scalar_lea.vmem [#allocation9], %s7793_s14 }
  0x7f   : > { %v607_v2 = vld [vmem:[%s7805_s13 + $0x80] sm:$0xff]  ;;  %v6231_v3 = vpack.c.bf16 %v592_v1, %v591_v0  ;;  %v608_v4 = vld [vmem:[%s7805_s13 + $0x88] sm:$0xff]  ;;  %v593_v5 = vld [vmem:[%s7805_s13 + $0x10] sm:$0xff]  ;;  %s9842_s19 = scalar_lea.vmem [#allocation8], %s7793_s14  ;;  %s4820_s29 = sshll.u32 %s7536_s18, 14 }
  0x80   : > { %v594_v6 = vld [vmem:[%s7805_s13 + $0x18] sm:$0xff]  ;;  %v6263_v7 = vpack.c.bf16 %v608_v4, %v607_v2  ;;  %v609_v9 = vld [vmem:[%s7805_s13 + $0x90] sm:$0xff]  ;;  %v595_v12 = vld [vmem:[%s7805_s13 + $0x20] sm:$0xff]  ;;  %s10013_s7 = scalar_lea.hbm %s10173_s4, %s4820_s29  ;;  %s4616_s11 = sshll.u32 %s9071_s27, 4  ;;  %s10016_s11 = int_to_ptr.vmem [resolvable:$true] %s4616_s11 }
  0x81   : > { %v6235_v8 = vpack.c.bf16 %v594_v6, %v593_v5  ;;  %v610_v10 = vld [vmem:[%s7805_s13 + $0x98] sm:$0xff]  ;;  %6232 = vmatprep.subr.bf16.mxu0 %v6231_v3  ;;  %v596_v13 = vld [vmem:[%s7805_s13 + $0x28] sm:$0xff]  ;;  %v611_v14 = vld [vmem:[%s7805_s13 + $0xa0] sm:$0xff]  ;;  %s4581_s12 = scalar_lea.sflag [#allocation10], %s7790_s25  ;;  %s7426_s20 = scalar_lea.vmem %s10016_s11, 16384 }
  0x82   : > { %v6267_v11 = vpack.c.bf16 %v610_v10, %v609_v9  ;;  %6264 = vmatprep.subr.bf16.mxu1 %v6263_v7  ;;  %6234 = vmatpush3.bf16.xpose.msra.mxu0 %v6231_v3  ;;  %v612_v15 = vld [vmem:[%s7805_s13 + $0xa8] sm:$0xff]  ;;  %v6239_v16 = vpack.c.bf16 %v596_v13, %v595_v12  ;;  %v335_v18 = vld [vmem:[%s7797_s26] sm:$0xff]  ;;  %v597_v22 = vld [vmem:[%s7805_s13 + $0x30] sm:$0xff]  ;;  %p7427_p0 = scmp.ne.s32.totalorder %s10016_s11, %s7426_s20  ;;  %p11025_p10 = scmp.ne.s32.totalorder %s10473_s28, 0 }
  0x83   : > { %6266 = vmatpush3.bf16.xpose.msra.mxu1 %v6263_v7  ;;  %6236 = vmatprep.subr.bf16.mxu0 %v6235_v8  ;;  %v6271_v17 = vpack.c.bf16 %v612_v15, %v611_v14  ;;  %v463_v19 = vmul.f32 0.088388346, %v335_v18  ;;  %v351_v20 = vld [vmem:[%s7797_s26 + $0x80] sm:$0xff]  ;;  %v598_v23 = vld [vmem:[%s7805_s13 + $0x38] sm:$0xff]  ;;  %v613_v24 = vld [vmem:[%s7805_s13 + $0xb0] sm:$0xff]  ;;  %s7551_s1 = smov [#allocation9]  }
  0x84   : > { %6268 = vmatprep.subr.bf16.mxu1 %v6267_v11  ;;  %v479_v21 = vmul.f32 0.088388346, %v351_v20  ;;  %v614_v25 = vld [vmem:[%s7805_s13 + $0xb8] sm:$0xff]  ;;  %v6243_v26 = vpack.c.bf16 %v598_v23, %v597_v22  ;;  %v599_v28 = vld [vmem:[%s7805_s13 + $0x40] sm:$0xff]  ;;  %v600_v29 = vld [vmem:[%s7805_s13 + $0x48] sm:$0xff]  ;;  %p7428_p8 = pnand %p7427_p0, %p11025_p10  ;;  %s7430_s23 = sshll.u32 %s7551_s1, 4  ;;  %s7431_s23 = int_to_ptr.vmem [resolvable:$false] %s7430_s23 }
  0x85   : > { %5367 = vmatprep.mubr.f32.mxu0 %v463_v19  ;;  %v6275_v27 = vpack.c.bf16 %v614_v25, %v613_v24  ;;  %v615_v30 = vld [vmem:[%s7805_s13 + $0xc0] sm:$0xff]  ;;  %v616_v31 = vld [vmem:[%s7805_s13 + $0xc8] sm:$0xff]  ;;  %v6247_v32 = vpack.c.bf16 %v600_v29, %v599_v28  ;;  %v601_v34 = vld [vmem:[%s7805_s13 + $0x50] sm:$0xff]  ;;  %s7432_s6 = scalar_lea.vmem %s7431_s23, 32768  ;;  %p7433_p12 = scmp.lt.s32.totalorder %s10016_s11, %s7431_s23 }
  0x86   : > { %5423 = vmatprep.mubr.f32.mxu1 %v479_v21  ;;  %v6279_v33 = vpack.c.bf16 %v616_v31, %v615_v30  ;;  %v602_v35 = vld [vmem:[%s7805_s13 + $0x58] sm:$0xff]  ;;  %v617_v36 = vld [vmem:[%s7805_s13 + $0xd0] sm:$0xff]  ;;  %v603_v40 = vld [vmem:[%s7805_s13 + $0x60] sm:$0xff]  ;;  %p7429_p9 = pneg %p7428_p8  ;;  %p7434_p1 = scmp.lt.s32.totalorder %s7432_s6, %s7426_s20 }
  0x87   : > { %v618_v37 = vld [vmem:[%s7805_s13 + $0xd8] sm:$0xff]  ;;  %v6251_v38 = vpack.c.bf16 %v602_v35, %v601_v34  ;;  %v604_v41 = vld [vmem:[%s7805_s13 + $0x68] sm:$0xff]  ;;  %v619_v42 = vld [vmem:[%s7805_s13 + $0xe0] sm:$0xff] }
  0x88   : > { %v6283_v39 = vpack.c.bf16 %v618_v37, %v617_v36  ;;  %v620_v43 = vld [vmem:[%s7805_s13 + $0xe8] sm:$0xff]  ;;  %v6255_v44 = vpack.c.bf16 %v604_v41, %v603_v40  ;;  %v605_v46 = vld [vmem:[%s7805_s13 + $0x70] sm:$0xff]  ;;  %v606_v47 = vld [vmem:[%s7805_s13 + $0x78] sm:$0xff]  ;;  %p7435_p6 = por %p7434_p1, %p7433_p12 }
  0x89   : > { %v6287_v45 = vpack.c.bf16 %v620_v43, %v619_v42  ;;  %v621_v48 = vld [vmem:[%s7805_s13 + $0xf0] sm:$0xff]  ;;  %v622_v49 = vld [vmem:[%s7805_s13 + $0xf8] sm:$0xff]  ;;  %v6259_v50 = vpack.c.bf16 %v606_v47, %v605_v46  ;;  %v623_v52 = vld [vmem:[%s7805_s13 + $0x100] sm:$0xff] }
  0x8a   : > { %6238 = vmatpush3.bf16.xpose.msra.mxu0 %v6235_v8  ;;  %v6291_v51 = vpack.c.bf16 %v622_v49, %v621_v48  ;;  %v624_v53 = vld [vmem:[%s7805_s13 + $0x108] sm:$0xff]  ;;  %v639_v54 = vld [vmem:[%s7805_s13 + $0x180] sm:$0xff]  ;;  %v337_v60 = vld [vmem:[%s7797_s26 + $0x10] sm:$0xff]  ;;  %p7436_p13 = pnand %p7435_p6, %p7429_p9 }
  0x8b   : > { %6270 = vmatpush3.bf16.xpose.msra.mxu1 %v6267_v11  ;;  %6240 = vmatprep.subr.bf16.mxu0 %v6239_v16  ;;  %v640_v55 = vld [vmem:[%s7805_s13 + $0x188] sm:$0xff]  ;;  %v6295_v56 = vpack.c.bf16 %v624_v53, %v623_v52  ;;  %v353_v62 = vld [vmem:[%s7797_s26 + $0x90] sm:$0xff]  ;;  %v626_v0 = vld [vmem:[%s7805_s13 + $0x118] sm:$0xff]  ;;  %v465_v5 = vmul.f32 0.088388346, %v337_v60 }
  0x8c   : > { %6272 = vmatprep.subr.bf16.mxu1 %v6271_v17  ;;  %v6327_v57 = vpack.c.bf16 %v640_v55, %v639_v54  ;;  %v336_v58 = vld [vmem:[%s7797_s26 + $0x8] sm:$0xff]  ;;  %v625_v63 = vld [vmem:[%s7805_s13 + $0x110] sm:$0xff]  ;;  %v338_v2 = vld [vmem:[%s7797_s26 + $0x18] sm:$0xff]  ;;  %v481_v8 = vmul.f32 0.088388346, %v353_v62 }
  0x8d   : > { %v352_v59 = vld [vmem:[%s7797_s26 + $0x88] sm:$0xff]  ;;  %v464_v61 = vmul.f32 0.088388346, %v336_v58  ;;  %v641_v3 = vld [vmem:[%s7805_s13 + $0x190] sm:$0xff]  ;;  %v642_v4 = vld [vmem:[%s7805_s13 + $0x198] sm:$0xff]  ;;  %v6299_v9 = vpack.c.bf16 %v626_v0, %v625_v63 }
  0x8e   : > { %v480_v1 = vmul.f32 0.088388346, %v352_v59  ;;  %v354_v6 = vld [vmem:[%s7797_s26 + $0x98] sm:$0xff]  ;;  %v339_v7 = vld [vmem:[%s7797_s26 + $0x20] sm:$0xff]  ;;  %v466_v11 = vmul.f32 0.088388346, %v338_v2  ;;  %v6331_v12 = vpack.c.bf16 %v642_v4, %v641_v3 }
  0x8f   : > { %v355_v10 = vld [vmem:[%s7797_s26 + $0xa0] sm:$0xff]  ;;  %v482_v13 = vmul.f32 0.088388346, %v354_v6  ;;  %v467_v14 = vmul.f32 0.088388346, %v339_v7  ;;  %v340_v15 = vld [vmem:[%s7797_s26 + $0x28] sm:$0xff] }
  0x90   : > { %v627_v18 = vld [vmem:[%s7805_s13 + $0x120] sm:$0xff]  ;;  %v628_v19 = vld [vmem:[%s7805_s13 + $0x128] sm:$0xff]  ;;  %v468_v20 = vmul.f32 0.088388346, %v340_v15  ;;  %v341_v23 = vld [vmem:[%s7797_s26 + $0x30] sm:$0xff] }
  0x91   : > { %v643_v21 = vld [vmem:[%s7805_s13 + $0x1a0] sm:$0xff]  ;;  %v644_v22 = vld [vmem:[%s7805_s13 + $0x1a8] sm:$0xff]  ;;  %v357_v25 = vld [vmem:[%s7797_s26 + $0xb0] sm:$0xff]  ;;  %v469_v31 = vmul.f32 0.088388346, %v341_v23 }
  0x92   : > { %6242 = vmatpush3.bf16.xpose.msra.mxu0 %v6239_v16  ;;  %v483_v16 = vmul.f32 0.088388346, %v355_v10  ;;  %v358_v28 = vld [vmem:[%s7797_s26 + $0xb8] sm:$0xff]  ;;  %v343_v29 = vld [vmem:[%s7797_s26 + $0x40] sm:$0xff]  ;;  %v6335_v30 = vpack.c.bf16 %v644_v22, %v643_v21  ;;  %v344_v37 = vld [vmem:[%s7797_s26 + $0x48] sm:$0xff] }
  0x93   : > { %6274 = vmatpush3.bf16.xpose.msra.mxu1 %v6271_v17  ;;  %6244 = vmatprep.subr.bf16.mxu0 %v6243_v26  ;;  %v356_v17 = vld [vmem:[%s7797_s26 + $0xa8] sm:$0xff]  ;;  %v486_v35 = vmul.f32 0.088388346, %v358_v28  ;;  %v471_v36 = vmul.f32 0.088388346, %v343_v29  ;;  %v629_v40 = vld [vmem:[%s7805_s13 + $0x130] sm:$0xff] }
  0x94   : > { %6276 = vmatprep.subr.bf16.mxu1 %v6275_v27  ;;  %v484_v24 = vmul.f32 0.088388346, %v356_v17  ;;  %v630_v41 = vld [vmem:[%s7805_s13 + $0x138] sm:$0xff]  ;;  %v645_v42 = vld [vmem:[%s7805_s13 + $0x1b0] sm:$0xff]  ;;  %v363_v54 = vld [vmem:[%s7797_s26 + $0xe0] sm:$0xff] }
  0x95   : > { %v646_v43 = vld [vmem:[%s7805_s13 + $0x1b8] sm:$0xff]  ;;  %v361_v47 = vld [vmem:[%s7797_s26 + $0xd0] sm:$0xff]  ;;  %v6307_v49 = vpack.c.bf16 %v630_v41, %v629_v40  ;;  %v348_v59 = vld [vmem:[%s7797_s26 + $0x68] sm:$0xff]  ;;  %v491_v60 = vmul.f32 0.088388346, %v363_v54 }
  0x96   : > { %v346_v48 = vld [vmem:[%s7797_s26 + $0x58] sm:$0xff]  ;;  %v6339_v52 = vpack.c.bf16 %v646_v43, %v645_v42  ;;  %v489_v55 = vmul.f32 0.088388346, %v361_v47  ;;  %v631_v62 = vld [vmem:[%s7805_s13 + $0x140] sm:$0xff]  ;;  %v632_v63 = vld [vmem:[%s7805_s13 + $0x148] sm:$0xff] }
  0x97   : > { %v647_v0 = vld [vmem:[%s7805_s13 + $0x1c0] sm:$0xff]  ;;  %v476_v2 = vmul.f32 0.088388346, %v348_v59  ;;  %v349_v3 = vld [vmem:[%s7797_s26 + $0x70] sm:$0xff]  ;;  %v350_v6 = vld [vmem:[%s7797_s26 + $0x78] sm:$0xff]  ;;  %v6311_v7 = vpack.c.bf16 %v632_v63, %v631_v62 }
  0x98   : > { %v650_v21 = vld [vmem:[%s7805_s13 + $0x1d8] sm:$0xff]  ;;  %v368_v42 = vld [vmem:[%s7797_s26 + $0x108] sm:$0xff]  ;;  %v657_v47 = vld [vmem:[%s7805_s13 + $0x210] sm:$0xff] }
  0x99   : > { %v384_v43 = vld [vmem:[%s7797_s26 + $0x188] sm:$0xff]  ;;  %v386_v54 = vld [vmem:[%s7797_s26 + $0x198] sm:$0xff] }
  0x9a   : > { %6246 = vmatpush3.bf16.xpose.msra.mxu0 %v6243_v26  ;;  %v342_v26 = vld [vmem:[%s7797_s26 + $0x38] sm:$0xff]  ;;  %v372_v63 = vld [vmem:[%s7797_s26 + $0x128] sm:$0xff] }
  0x9b   : > { %6278 = vmatpush3.bf16.xpose.msra.mxu1 %v6275_v27  ;;  %6248 = vmatprep.subr.bf16.mxu0 %v6247_v32  ;;  %v6303_v27 = vpack.c.bf16 %v628_v19, %v627_v18  ;;  %v470_v34 = vmul.f32 0.088388346, %v342_v26  ;;  %v633_v18 = vld [vmem:[%s7805_s13 + $0x150] sm:$0xff]  ;;  %v634_v19 = vld [vmem:[%s7805_s13 + $0x158] sm:$0xff]  ;;  %v651_v26 = vld [vmem:[%s7805_s13 + $0x1e0] sm:$0xff] }
  0x9c   : > { %6280 = vmatprep.subr.bf16.mxu1 %v6279_v33  ;;  %v6315_v22 = vpack.c.bf16 %v634_v19, %v633_v18 }
  0xa2   : > { %6250 = vmatpush3.bf16.xpose.msra.mxu0 %v6247_v32  ;;  %v359_v32 = vld [vmem:[%s7797_s26 + $0xc0] sm:$0xff] }
  0xa3   : > { %6282 = vmatpush3.bf16.xpose.msra.mxu1 %v6279_v33  ;;  %6252 = vmatprep.subr.bf16.mxu0 %v6251_v38  ;;  %v485_v33 = vmul.f32 0.088388346, %v357_v25  ;;  %v636_v25 = vld [vmem:[%s7805_s13 + $0x168] sm:$0xff] }
  0xa4   : > { %6284 = vmatprep.subr.bf16.mxu1 %v6283_v39 }
  0xaa   : > { %6254 = vmatpush3.bf16.xpose.msra.mxu0 %v6251_v38  ;;  %v487_v38 = vmul.f32 0.088388346, %v359_v32  ;;  %v653_v32 = vld [vmem:[%s7805_s13 + $0x1f0] sm:$0xff] }
  0xab   : > { %6286 = vmatpush3.bf16.xpose.msra.mxu1 %v6283_v39  ;;  %6256 = vmatprep.subr.bf16.mxu0 %v6255_v44  ;;  %v360_v39 = vld [vmem:[%s7797_s26 + $0xc8] sm:$0xff] }
  0xac   : > { %6288 = vmatprep.subr.bf16.mxu1 %v6287_v45  ;;  %v488_v46 = vmul.f32 0.088388346, %v360_v39  ;;  %v672_v39 = vld [vmem:[%s7805_s13 + $0x288] sm:$0xff] }
  0xb2   : > { %6258 = vmatpush3.bf16.xpose.msra.mxu0 %v6255_v44  ;;  %v472_v44 = vmul.f32 0.088388346, %v344_v37  ;;  %v656_v37 = vld [vmem:[%s7805_s13 + $0x208] sm:$0xff] }
  0xb3   : > { %6290 = vmatpush3.bf16.xpose.msra.mxu1 %v6287_v45  ;;  %6260 = vmatprep.subr.bf16.mxu0 %v6259_v50  ;;  %v345_v45 = vld [vmem:[%s7797_s26 + $0x50] sm:$0xff] }
  0xb4   : > { %6292 = vmatprep.subr.bf16.mxu1 %v6291_v51  ;;  %v473_v53 = vmul.f32 0.088388346, %v345_v45  ;;  %v496_v45 = vmul.f32 0.088388346, %v368_v42 }
  0xba   : > { %6262 = vmatpush3.bf16.xpose.msra.mxu0 %v6259_v50  ;;  %v362_v50 = vld [vmem:[%s7797_s26 + $0xd8] sm:$0xff] }
  0xbb   : > { %6294 = vmatpush3.bf16.xpose.msra.mxu1 %v6291_v51  ;;  %6296 = vmatprep.subr.bf16.mxu0 %v6295_v56  ;;  %v347_v51 = vld [vmem:[%s7797_s26 + $0x60] sm:$0xff] }
  0xbc   : > { %6328 = vmatprep.subr.bf16.mxu1 %v6327_v57  ;;  %v475_v58 = vmul.f32 0.088388346, %v347_v51  ;;  %v673_v51 = vld [vmem:[%s7805_s13 + $0x290] sm:$0xff] }
  0xc1   : > { %5368 = vmatmul.mubr.f32.vlgmr.msra.gmra.mrb[0].mxu0 %v464_v61  ;;  %v364_v61 = vld [vmem:[%s7797_s26 + $0xe8] sm:$0xff] }
  0xc2   : > { %5424 = vmatmul.mubr.f32.vlgmr.msra.gmra.mrb[0].mxu1 %v480_v1  ;;  %6298 = vmatpush3.bf16.xpose.msra.mxu0 %v6295_v56  ;;  %v474_v56 = vmul.f32 0.088388346, %v346_v48  ;;  %v648_v1 = vld [vmem:[%s7805_s13 + $0x1c8] sm:$0xff]  ;;  %v492_v4 = vmul.f32 0.088388346, %v364_v61  ;;  %v658_v48 = vld [vmem:[%s7805_s13 + $0x218] sm:$0xff] }
  0xc3   : > { %6330 = vmatpush3.bf16.xpose.msra.mxu1 %v6327_v57  ;;  %5370 = vmatprep.mubr.f32.mxu0 %v465_v5  ;;  %v490_v57 = vmul.f32 0.088388346, %v362_v50  ;;  %v365_v5 = vld [vmem:[%s7797_s26 + $0xf0] sm:$0xff]  ;;  %v6343_v10 = vpack.c.bf16 %v648_v1, %v647_v0  ;;  %v370_v50 = vld [vmem:[%s7797_s26 + $0x118] sm:$0xff]  ;;  %v514_v61 = vmul.f32 0.088388346, %v386_v54 }
  0xc4   : > { %5426 = vmatprep.mubr.f32.mxu1 %v481_v8  ;;  %6300 = vmatprep.subr.bf16.mxu0 %v6299_v9  ;;  %v366_v8 = vld [vmem:[%s7797_s26 + $0xf8] sm:$0xff]  ;;  %v498_v59 = vmul.f32 0.088388346, %v370_v50  ;;  %v388_v1 = vld [vmem:[%s7797_s26 + $0x1a8] sm:$0xff] }
  0xc5   : > { %5371 = vmatmul.mubr.f32.gmra.mrb[2].mxu0 %v466_v11  ;;  %6332 = vmatprep.subr.bf16.mxu1 %v6331_v12  ;;  %v477_v11 = vmul.f32 0.088388346, %v349_v3  ;;  %v494_v15 = vmul.f32 0.088388346, %v366_v8  ;;  %v660_v3 = vld [vmem:[%s7805_s13 + $0x228] sm:$0xff]  ;;  %v382_v54 = vld [vmem:[%s7797_s26 + $0x178] sm:$0xff] }
  0xc6   : > { %5427 = vmatmul.mubr.f32.gmra.mrb[2].mxu1 %v482_v13  ;;  %5373 = vmatprep.mubr.f32.mxu0 %v467_v14  ;;  %v493_v13 = vmul.f32 0.088388346, %v365_v5  ;;  %v478_v14 = vmul.f32 0.088388346, %v350_v6  ;;  %v675_v5 = vld [vmem:[%s7805_s13 + $0x2a0] sm:$0xff]  ;;  %v676_v6 = vld [vmem:[%s7805_s13 + $0x2a8] sm:$0xff] }
  0xc7   : > { %5429 = vmatprep.mubr.f32.mxu1 %v483_v16  ;;  %v516_v8 = vmul.f32 0.088388346, %v388_v1 }
  0xc9   : > { %5374 = vmatmul.mubr.f32.gmra.mrb[4].mxu0 %v468_v20  ;;  %v649_v20 = vld [vmem:[%s7805_s13 + $0x1d0] sm:$0xff] }
  0xca   : > { %6302 = vmatpush3.bf16.xpose.msra.mxu0 %v6299_v9  ;;  %5430 = vmatmul.mubr.f32.gmra.mrb[4].mxu1 %v484_v24  ;;  %v367_v9 = vld [vmem:[%s7797_s26 + $0x100] sm:$0xff]  ;;  %v6347_v23 = vpack.c.bf16 %v650_v21, %v649_v20  ;;  %v376_v21 = vld [vmem:[%s7797_s26 + $0x148] sm:$0xff] }
  0xcb   : > { %6334 = vmatpush3.bf16.xpose.msra.mxu1 %v6331_v12  ;;  %6304 = vmatprep.subr.bf16.mxu0 %v6303_v27  ;;  %v383_v12 = vld [vmem:[%s7797_s26 + $0x180] sm:$0xff]  ;;  %v495_v16 = vmul.f32 0.088388346, %v367_v9  ;;  %v389_v9 = vld [vmem:[%s7797_s26 + $0x1b0] sm:$0xff] }
  0xcc   : > { %6336 = vmatprep.subr.bf16.mxu1 %v6335_v30  ;;  %5376 = vmatprep.mubr.f32.mxu0 %v469_v31  ;;  %v511_v17 = vmul.f32 0.088388346, %v383_v12  ;;  %v635_v24 = vld [vmem:[%s7805_s13 + $0x160] sm:$0xff]  ;;  %v638_v31 = vld [vmem:[%s7805_s13 + $0x178] sm:$0xff] }
  0xcd   : > { %5432 = vmatprep.mubr.f32.mxu1 %v485_v33  ;;  %5377 = vmatmul.mubr.f32.gmra.mrb[6].mxu0 %v470_v34  ;;  %v6319_v28 = vpack.c.bf16 %v636_v25, %v635_v24  ;;  %v654_v33 = vld [vmem:[%s7805_s13 + $0x1f8] sm:$0xff]  ;;  %v661_v24 = vld [vmem:[%s7805_s13 + $0x230] sm:$0xff] }
  0xce   : > { %5433 = vmatmul.mubr.f32.gmra.mrb[6].mxu1 %v486_v35  ;;  %5379 = vmatprep.mubr.f32.mxu0 %v471_v36  ;;  %v6355_v35 = vpack.c.bf16 %v654_v33, %v653_v32  ;;  %v655_v36 = vld [vmem:[%s7805_s13 + $0x200] sm:$0xff]  ;;  %v390_v12 = vld [vmem:[%s7797_s26 + $0x1b8] sm:$0xff] }
  0xcf   : > { %5435 = vmatprep.mubr.f32.mxu1 %v487_v38  ;;  %v671_v38 = vld [vmem:[%s7805_s13 + $0x280] sm:$0xff]  ;;  %v6359_v40 = vpack.c.bf16 %v656_v37, %v655_v36  ;;  %v518_v19 = vmul.f32 0.088388346, %v390_v12  ;;  %v662_v25 = vld [vmem:[%s7805_s13 + $0x238] sm:$0xff] }
  0xd0   : > { %v6391_v41 = vpack.c.bf16 %v672_v39, %v671_v38  ;;  %v378_v32 = vld [vmem:[%s7797_s26 + $0x158] sm:$0xff]  ;;  %v6371_v33 = vpack.c.bf16 %v662_v25, %v661_v24  ;;  %v395_v38 = vld [vmem:[%s7797_s26 + $0x1e0] sm:$0xff] }
  0xd1   : > { %5380 = vmatmul.mubr.f32.gmra.mrb[8].mxu0 %v472_v44  ;;  %v369_v44 = vld [vmem:[%s7797_s26 + $0x110] sm:$0xff] }
  0xd2   : > { %6306 = vmatpush3.bf16.xpose.msra.mxu0 %v6303_v27  ;;  %5436 = vmatmul.mubr.f32.gmra.mrb[8].mxu1 %v488_v46  ;;  %v652_v27 = vld [vmem:[%s7805_s13 + $0x1e8] sm:$0xff]  ;;  %v385_v46 = vld [vmem:[%s7797_s26 + $0x190] sm:$0xff] }
  0xd3   : > { %6338 = vmatpush3.bf16.xpose.msra.mxu1 %v6335_v30  ;;  %6308 = vmatprep.subr.bf16.mxu0 %v6307_v49  ;;  %v6351_v29 = vpack.c.bf16 %v652_v27, %v651_v26  ;;  %v637_v30 = vld [vmem:[%s7805_s13 + $0x170] sm:$0xff]  ;;  %v678_v27 = vld [vmem:[%s7805_s13 + $0x2b8] sm:$0xff] }
  0xd4   : > { %6340 = vmatprep.subr.bf16.mxu1 %v6339_v52  ;;  %5382 = vmatprep.mubr.f32.mxu0 %v473_v53  ;;  %v6323_v34 = vpack.c.bf16 %v638_v31, %v637_v30  ;;  %v497_v53 = vmul.f32 0.088388346, %v369_v44  ;;  %v677_v26 = vld [vmem:[%s7805_s13 + $0x2b0] sm:$0xff]  ;;  %v523_v44 = vmul.f32 0.088388346, %v395_v38 }
  0xd5   : > { %5438 = vmatprep.mubr.f32.mxu1 %v489_v55  ;;  %5383 = vmatmul.mubr.f32.gmra.mrb[10].mxu0 %v474_v56  ;;  %v371_v55 = vld [vmem:[%s7797_s26 + $0x120] sm:$0xff]  ;;  %v513_v56 = vmul.f32 0.088388346, %v385_v46  ;;  %v393_v31 = vld [vmem:[%s7797_s26 + $0x1d0] sm:$0xff]  ;;  %v6403_v36 = vpack.c.bf16 %v678_v27, %v677_v26  ;;  %v400_v26 = vld [vmem:[%s7797_s26 + $0x208] sm:$0xff] }
  0xd6   : > { %5439 = vmatmul.mubr.f32.gmra.mrb[10].mxu1 %v490_v57  ;;  %5385 = vmatprep.mubr.f32.mxu0 %v475_v58  ;;  %v6363_v57 = vpack.c.bf16 %v658_v48, %v657_v47  ;;  %v387_v58 = vld [vmem:[%s7797_s26 + $0x1a0] sm:$0xff]  ;;  %v499_v62 = vmul.f32 0.088388346, %v371_v55  ;;  %v521_v39 = vmul.f32 0.088388346, %v393_v31  ;;  %v664_v47 = vld [vmem:[%s7805_s13 + $0x248] sm:$0xff] }
  0xd7   : > { %5441 = vmatprep.mubr.f32.mxu1 %v491_v60  ;;  %v515_v0 = vmul.f32 0.088388346, %v387_v58  ;;  %v663_v46 = vld [vmem:[%s7805_s13 + $0x240] sm:$0xff]  ;;  %v416_v27 = vld [vmem:[%s7797_s26 + $0x288] sm:$0xff] }
  0xd8   : > { %v679_v48 = vld [vmem:[%s7805_s13 + $0x2c0] sm:$0xff]  ;;  %v6375_v55 = vpack.c.bf16 %v664_v47, %v663_v46  ;;  %v544_v31 = vmul.f32 0.088388346, %v416_v27  ;;  %v404_v47 = vld [vmem:[%s7797_s26 + $0x228] sm:$0xff] }
  0xd9   : > { %5386 = vmatmul.mubr.f32.gmra.mrb[12].mxu0 %v476_v2  ;;  %v659_v2 = vld [vmem:[%s7805_s13 + $0x220] sm:$0xff]  ;;  %v412_v27 = vld [vmem:[%s7797_s26 + $0x268] sm:$0xff] }
  0xda   : > { %6310 = vmatpush3.bf16.xpose.msra.mxu0 %v6307_v49  ;;  %5442 = vmatmul.mubr.f32.gmra.mrb[12].mxu1 %v492_v4  ;;  %v512_v49 = vmul.f32 0.088388346, %v384_v43  ;;  %v500_v4 = vmul.f32 0.088388346, %v372_v63  ;;  %v380_v43 = vld [vmem:[%s7797_s26 + $0x168] sm:$0xff] }
  0xdb   : > { %6342 = vmatpush3.bf16.xpose.msra.mxu1 %v6339_v52  ;;  %6312 = vmatprep.subr.bf16.mxu0 %v6311_v7  ;;  %v674_v52 = vld [vmem:[%s7805_s13 + $0x298] sm:$0xff]  ;;  %v508_v50 = vmul.f32 0.088388346, %v380_v43 }
  0xdc   : > { %6344 = vmatprep.subr.bf16.mxu1 %v6343_v10  ;;  %5388 = vmatprep.mubr.f32.mxu0 %v477_v11  ;;  %v6395_v60 = vpack.c.bf16 %v674_v52, %v673_v51  ;;  %v6367_v11 = vpack.c.bf16 %v660_v3, %v659_v2  ;;  %v381_v51 = vld [vmem:[%s7797_s26 + $0x170] sm:$0xff]  ;;  %v666_v3 = vld [vmem:[%s7805_s13 + $0x258] sm:$0xff] }
  0xdd   : > { %5444 = vmatprep.mubr.f32.mxu1 %v493_v13  ;;  %5389 = vmatmul.mubr.f32.gmra.mrb[14].mxu0 %v478_v14  ;;  %v375_v13 = vld [vmem:[%s7797_s26 + $0x140] sm:$0xff]  ;;  %v6399_v14 = vpack.c.bf16 %v676_v6, %v675_v5  ;;  %v665_v2 = vld [vmem:[%s7805_s13 + $0x250] sm:$0xff]  ;;  %v682_v5 = vld [vmem:[%s7805_s13 + $0x2d8] sm:$0xff] }
  0xde   : > { %5445 = vmatmul.mubr.f32.gmra.mrb[14].mxu1 %v494_v15  ;;  %5479 = vmatprep.mubr.f32.mxu0 %v495_v16  ;;  %v391_v16 = vld [vmem:[%s7797_s26 + $0x1c0] sm:$0xff]  ;;  %v503_v20 = vmul.f32 0.088388346, %v375_v13  ;;  %v6379_v6 = vpack.c.bf16 %v666_v3, %v665_v2 }
  0xdf   : > { %5535 = vmatprep.mubr.f32.mxu1 %v511_v17  ;;  %v517_v17 = vmul.f32 0.088388346, %v389_v9  ;;  %v668_v9 = vld [vmem:[%s7805_s13 + $0x268] sm:$0xff] }
  0xe2   : > { %6314 = vmatpush3.bf16.xpose.msra.mxu0 %v6311_v7  ;;  %v373_v7 = vld [vmem:[%s7797_s26 + $0x130] sm:$0xff] }
  0xe3   : > { %6346 = vmatpush3.bf16.xpose.msra.mxu1 %v6343_v10  ;;  %6316 = vmatprep.subr.bf16.mxu0 %v6315_v22  ;;  %v374_v10 = vld [vmem:[%s7797_s26 + $0x138] sm:$0xff]  ;;  %v501_v15 = vmul.f32 0.088388346, %v373_v7 }
  0xe4   : > { %6348 = vmatprep.subr.bf16.mxu1 %v6347_v23  ;;  %v502_v18 = vmul.f32 0.088388346, %v374_v10  ;;  %v683_v10 = vld [vmem:[%s7805_s13 + $0x2e0] sm:$0xff] }
  0xea   : > { %6318 = vmatpush3.bf16.xpose.msra.mxu0 %v6315_v22  ;;  %v519_v22 = vmul.f32 0.088388346, %v391_v16  ;;  %v685_v16 = vld [vmem:[%s7805_s13 + $0x2f0] sm:$0xff] }
  0xeb   : > { %6350 = vmatpush3.bf16.xpose.msra.mxu1 %v6347_v23  ;;  %6320 = vmatprep.subr.bf16.mxu0 %v6319_v28  ;;  %v392_v23 = vld [vmem:[%s7797_s26 + $0x1c8] sm:$0xff] }
  0xec   : > { %6352 = vmatprep.subr.bf16.mxu1 %v6351_v29  ;;  %v520_v30 = vmul.f32 0.088388346, %v392_v23  ;;  %v704_v23 = vld [vmem:[%s7805_s13 + $0x388] sm:$0xff] }
  0xf2   : > { %6322 = vmatpush3.bf16.xpose.msra.mxu0 %v6319_v28  ;;  %v504_v28 = vmul.f32 0.088388346, %v376_v21  ;;  %v688_v21 = vld [vmem:[%s7805_s13 + $0x308] sm:$0xff] }
  0xf3   : > { %6354 = vmatpush3.bf16.xpose.msra.mxu1 %v6351_v29  ;;  %6324 = vmatprep.subr.bf16.mxu0 %v6323_v34  ;;  %v377_v29 = vld [vmem:[%s7797_s26 + $0x150] sm:$0xff] }
  0xf4   : > { %6356 = vmatprep.subr.bf16.mxu1 %v6355_v35  ;;  %v505_v37 = vmul.f32 0.088388346, %v377_v29  ;;  %v417_v29 = vld [vmem:[%s7797_s26 + $0x290] sm:$0xff] }
  0xf5   : > { %v545_v38 = vmul.f32 0.088388346, %v417_v29 }
  0xfa   : > { %6326 = vmatpush3.bf16.xpose.msra.mxu0 %v6323_v34  ;;  %v394_v34 = vld [vmem:[%s7797_s26 + $0x1d8] sm:$0xff] }
  0xfb   : > { %6358 = vmatpush3.bf16.xpose.msra.mxu1 %v6355_v35  ;;  %6360 = vmatprep.subr.bf16.mxu0 %v6359_v40  ;;  %v379_v35 = vld [vmem:[%s7797_s26 + $0x160] sm:$0xff] }
  0xfc   : > { %6392 = vmatprep.subr.bf16.mxu1 %v6391_v41  ;;  %v507_v42 = vmul.f32 0.088388346, %v379_v35  ;;  %v402_v35 = vld [vmem:[%s7797_s26 + $0x218] sm:$0xff] }
  0xfd   : > { %v530_v43 = vmul.f32 0.088388346, %v402_v35  ;;  %v696_v35 = vld [vmem:[%s7805_s13 + $0x348] sm:$0xff] }
 0x101   : > { %5480 = vmatmul.mubr.f32.vlgmr.msra.gmra.mrb[16].mxu0 %v496_v45  ;;  %v396_v45 = vld [vmem:[%s7797_s26 + $0x1e8] sm:$0xff] }
 0x102   : > { %5536 = vmatmul.mubr.f32.vlgmr.msra.gmra.mrb[16].mxu1 %v512_v49  ;;  %6362 = vmatpush3.bf16.xpose.msra.mxu0 %v6359_v40  ;;  %v506_v40 = vmul.f32 0.088388346, %v378_v32  ;;  %v680_v49 = vld [vmem:[%s7805_s13 + $0x2c8] sm:$0xff]  ;;  %v524_v52 = vmul.f32 0.088388346, %v396_v45  ;;  %v689_v32 = vld [vmem:[%s7805_s13 + $0x310] sm:$0xff] }
 0x103   : > { %6394 = vmatpush3.bf16.xpose.msra.mxu1 %v6391_v41  ;;  %5482 = vmatprep.mubr.f32.mxu0 %v497_v53  ;;  %v522_v41 = vmul.f32 0.088388346, %v394_v34  ;;  %v397_v53 = vld [vmem:[%s7797_s26 + $0x1f0] sm:$0xff]  ;;  %v6407_v58 = vpack.c.bf16 %v680_v49, %v679_v48  ;;  %v420_v48 = vld [vmem:[%s7797_s26 + $0x2a8] sm:$0xff] }
 0x104   : > { %5538 = vmatprep.mubr.f32.mxu1 %v513_v56  ;;  %6364 = vmatprep.subr.bf16.mxu0 %v6363_v57  ;;  %v398_v56 = vld [vmem:[%s7797_s26 + $0x1f8] sm:$0xff] }
 0x105   : > { %5483 = vmatmul.mubr.f32.gmra.mrb[18].mxu0 %v498_v59  ;;  %6396 = vmatprep.subr.bf16.mxu1 %v6395_v60  ;;  %v509_v59 = vmul.f32 0.088388346, %v381_v51  ;;  %v526_v63 = vmul.f32 0.088388346, %v398_v56  ;;  %v421_v51 = vld [vmem:[%s7797_s26 + $0x2b0] sm:$0xff] }
 0x106   : > { %5539 = vmatmul.mubr.f32.gmra.mrb[18].mxu1 %v514_v61  ;;  %5485 = vmatprep.mubr.f32.mxu0 %v499_v62  ;;  %v525_v61 = vmul.f32 0.088388346, %v397_v53  ;;  %v510_v62 = vmul.f32 0.088388346, %v382_v54  ;;  %v548_v53 = vmul.f32 0.088388346, %v420_v48 }
 0x107   : > { %5541 = vmatprep.mubr.f32.mxu1 %v515_v0  ;;  %v691_v54 = vld [vmem:[%s7805_s13 + $0x320] sm:$0xff] }
 0x109   : > { %5486 = vmatmul.mubr.f32.gmra.mrb[20].mxu0 %v500_v4  ;;  %v681_v4 = vld [vmem:[%s7805_s13 + $0x2d0] sm:$0xff] }
 0x10a   : > { %6366 = vmatpush3.bf16.xpose.msra.mxu0 %v6363_v57  ;;  %5542 = vmatmul.mubr.f32.gmra.mrb[20].mxu1 %v516_v8  ;;  %v399_v57 = vld [vmem:[%s7797_s26 + $0x200] sm:$0xff]  ;;  %v6411_v7 = vpack.c.bf16 %v682_v5, %v681_v4  ;;  %v408_v5 = vld [vmem:[%s7797_s26 + $0x248] sm:$0xff] }
 0x10b   : > { %6398 = vmatpush3.bf16.xpose.msra.mxu1 %v6395_v60  ;;  %6368 = vmatprep.subr.bf16.mxu0 %v6367_v11  ;;  %v415_v60 = vld [vmem:[%s7797_s26 + $0x280] sm:$0xff]  ;;  %v527_v0 = vmul.f32 0.088388346, %v399_v57  ;;  %v406_v57 = vld [vmem:[%s7797_s26 + $0x238] sm:$0xff] }
 0x10c   : > { %6400 = vmatprep.subr.bf16.mxu1 %v6399_v14  ;;  %5488 = vmatprep.mubr.f32.mxu0 %v501_v15  ;;  %v543_v1 = vmul.f32 0.088388346, %v415_v60  ;;  %v667_v8 = vld [vmem:[%s7805_s13 + $0x260] sm:$0xff]  ;;  %v670_v15 = vld [vmem:[%s7805_s13 + $0x278] sm:$0xff]  ;;  %v549_v60 = vmul.f32 0.088388346, %v421_v51 }
 0x10d   : > { %5544 = vmatprep.mubr.f32.mxu1 %v517_v17  ;;  %5489 = vmatmul.mubr.f32.gmra.mrb[22].mxu0 %v502_v18  ;;  %v6383_v12 = vpack.c.bf16 %v668_v9, %v667_v8  ;;  %v686_v17 = vld [vmem:[%s7805_s13 + $0x2f8] sm:$0xff]  ;;  %v409_v8 = vld [vmem:[%s7797_s26 + $0x250] sm:$0xff] }
 0x10e   : > { %5545 = vmatmul.mubr.f32.gmra.mrb[22].mxu1 %v518_v19  ;;  %5491 = vmatprep.mubr.f32.mxu0 %v503_v20  ;;  %v6419_v19 = vpack.c.bf16 %v686_v17, %v685_v16  ;;  %v687_v20 = vld [vmem:[%s7805_s13 + $0x300] sm:$0xff]  ;;  %v425_v9 = vld [vmem:[%s7797_s26 + $0x2d0] sm:$0xff]  ;;  %v710_v17 = vld [vmem:[%s7805_s13 + $0x3b8] sm:$0xff] }
 0x10f   : > { %5547 = vmatprep.mubr.f32.mxu1 %v519_v22  ;;  %v703_v22 = vld [vmem:[%s7805_s13 + $0x380] sm:$0xff]  ;;  %v6423_v24 = vpack.c.bf16 %v688_v21, %v687_v20  ;;  %v709_v16 = vld [vmem:[%s7805_s13 + $0x3b0] sm:$0xff]  ;;  %v698_v51 = vld [vmem:[%s7805_s13 + $0x358] sm:$0xff] }
 0x110   : > { %v6455_v25 = vpack.c.bf16 %v704_v23, %v703_v22  ;;  %v411_v20 = vld [vmem:[%s7797_s26 + $0x260] sm:$0xff] }
 0x111   : > { %5492 = vmatmul.mubr.f32.gmra.mrb[24].mxu0 %v504_v28  ;;  %v401_v28 = vld [vmem:[%s7797_s26 + $0x210] sm:$0xff]  ;;  %v427_v21 = vld [vmem:[%s7797_s26 + $0x2e0] sm:$0xff] }
 0x112   : > { %6370 = vmatpush3.bf16.xpose.msra.mxu0 %v6367_v11  ;;  %5548 = vmatmul.mubr.f32.gmra.mrb[24].mxu1 %v520_v30  ;;  %v684_v11 = vld [vmem:[%s7805_s13 + $0x2e8] sm:$0xff]  ;;  %v528_v30 = vmul.f32 0.088388346, %v400_v26  ;;  %v529_v34 = vmul.f32 0.088388346, %v401_v28 }
 0x113   : > { %6402 = vmatpush3.bf16.xpose.msra.mxu1 %v6399_v14  ;;  %6372 = vmatprep.subr.bf16.mxu0 %v6371_v33  ;;  %v6415_v13 = vpack.c.bf16 %v684_v11, %v683_v10  ;;  %v669_v14 = vld [vmem:[%s7805_s13 + $0x270] sm:$0xff]  ;;  %v536_v10 = vmul.f32 0.088388346, %v408_v5  ;;  %v539_v26 = vmul.f32 0.088388346, %v411_v20  ;;  %v428_v28 = vld [vmem:[%s7797_s26 + $0x2e8] sm:$0xff] }
 0x114   : > { %6404 = vmatprep.subr.bf16.mxu1 %v6403_v36  ;;  %5494 = vmatprep.mubr.f32.mxu0 %v505_v37  ;;  %v6387_v18 = vpack.c.bf16 %v670_v15, %v669_v14  ;;  %v706_v37 = vld [vmem:[%s7805_s13 + $0x398] sm:$0xff]  ;;  %v537_v14 = vmul.f32 0.088388346, %v409_v8  ;;  %v555_v29 = vmul.f32 0.088388346, %v427_v21  ;;  %v448_v5 = vld [vmem:[%s7797_s26 + $0x388] sm:$0xff] }
 0x115   : > { %5550 = vmatprep.mubr.f32.mxu1 %v521_v39  ;;  %5495 = vmatmul.mubr.f32.gmra.mrb[26].mxu0 %v506_v40  ;;  %v418_v39 = vld [vmem:[%s7797_s26 + $0x298] sm:$0xff]  ;;  %v403_v40 = vld [vmem:[%s7797_s26 + $0x220] sm:$0xff]  ;;  %v452_v21 = vld [vmem:[%s7797_s26 + $0x3a8] sm:$0xff] }
 0x116   : > { %5551 = vmatmul.mubr.f32.gmra.mrb[26].mxu1 %v522_v41  ;;  %5497 = vmatprep.mubr.f32.mxu0 %v507_v42  ;;  %v419_v41 = vld [vmem:[%s7797_s26 + $0x2a0] sm:$0xff]  ;;  %v546_v45 = vmul.f32 0.088388346, %v418_v39  ;;  %v531_v46 = vmul.f32 0.088388346, %v403_v40  ;;  %v410_v15 = vld [vmem:[%s7797_s26 + $0x258] sm:$0xff] }
 0x117   : > { %5553 = vmatprep.mubr.f32.mxu1 %v523_v44  ;;  %v547_v49 = vmul.f32 0.088388346, %v419_v41  ;;  %v538_v23 = vmul.f32 0.088388346, %v410_v15  ;;  %v712_v39 = vld [vmem:[%s7805_s13 + $0x3c8] sm:$0xff]  ;;  %v430_v41 = vld [vmem:[%s7797_s26 + $0x2f8] sm:$0xff] }
 0x118   : > { %v451_v15 = vld [vmem:[%s7797_s26 + $0x3a0] sm:$0xff] }
 0x119   : > { %5498 = vmatmul.mubr.f32.gmra.mrb[28].mxu0 %v508_v50  ;;  %v405_v50 = vld [vmem:[%s7797_s26 + $0x230] sm:$0xff]  ;;  %v579_v20 = vmul.f32 0.088388346, %v451_v15 }
 0x11a   : > { %6374 = vmatpush3.bf16.xpose.msra.mxu0 %v6371_v33  ;;  %5554 = vmatmul.mubr.f32.gmra.mrb[28].mxu1 %v524_v52  ;;  %v690_v33 = vld [vmem:[%s7805_s13 + $0x318] sm:$0xff]  ;;  %v532_v52 = vmul.f32 0.088388346, %v404_v47  ;;  %v533_v56 = vmul.f32 0.088388346, %v405_v50  ;;  %v697_v50 = vld [vmem:[%s7805_s13 + $0x350] sm:$0xff] }
 0x11b   : > { %6406 = vmatpush3.bf16.xpose.msra.mxu1 %v6403_v36  ;;  %6376 = vmatprep.subr.bf16.mxu0 %v6375_v55  ;;  %v705_v36 = vld [vmem:[%s7805_s13 + $0x390] sm:$0xff]  ;;  %v6427_v42 = vpack.c.bf16 %v690_v33, %v689_v32  ;;  %v540_v32 = vmul.f32 0.088388346, %v412_v27  ;;  %v556_v33 = vmul.f32 0.088388346, %v428_v28  ;;  %v438_v27 = vld [vmem:[%s7797_s26 + $0x338] sm:$0xff] }
 0x11c   : > { %6408 = vmatprep.subr.bf16.mxu1 %v6407_v58  ;;  %5500 = vmatprep.mubr.f32.mxu0 %v509_v59  ;;  %v6459_v44 = vpack.c.bf16 %v706_v37, %v705_v36  ;;  %v708_v59 = vld [vmem:[%s7805_s13 + $0x3a8] sm:$0xff]  ;;  %v414_v37 = vld [vmem:[%s7797_s26 + $0x278] sm:$0xff]  ;;  %v558_v47 = vmul.f32 0.088388346, %v430_v41 }
 0x11d   : > { %5556 = vmatprep.mubr.f32.mxu1 %v525_v61  ;;  %5501 = vmatmul.mubr.f32.gmra.mrb[30].mxu0 %v510_v62  ;;  %v422_v61 = vld [vmem:[%s7797_s26 + $0x2b8] sm:$0xff]  ;;  %v407_v62 = vld [vmem:[%s7797_s26 + $0x240] sm:$0xff] }
 0x11e   : > { %5557 = vmatmul.mubr.f32.gmra.mrb[30].mxu1 %v526_v63  ;;  %5591 = vmatprep.mubr.f32.mxu0 %v527_v0  ;;  %v423_v63 = vld [vmem:[%s7797_s26 + $0x2c0] sm:$0xff]  ;;  %v550_v3 = vmul.f32 0.088388346, %v422_v61  ;;  %v535_v4 = vmul.f32 0.088388346, %v407_v62  ;;  %v701_v62 = vld [vmem:[%s7805_s13 + $0x370] sm:$0xff] }
 0x11f   : > { %5647 = vmatprep.mubr.f32.mxu1 %v543_v1  ;;  %v534_v1 = vmul.f32 0.088388346, %v406_v57  ;;  %v700_v57 = vld [vmem:[%s7805_s13 + $0x368] sm:$0xff] }
 0x122   : > { %6378 = vmatpush3.bf16.xpose.msra.mxu0 %v6375_v55  ;;  %v692_v55 = vld [vmem:[%s7805_s13 + $0x328] sm:$0xff] }
 0x123   : > { %6410 = vmatpush3.bf16.xpose.msra.mxu1 %v6407_v58  ;;  %6380 = vmatprep.subr.bf16.mxu0 %v6379_v6  ;;  %v707_v58 = vld [vmem:[%s7805_s13 + $0x3a0] sm:$0xff]  ;;  %v6431_v0 = vpack.c.bf16 %v692_v55, %v691_v54  ;;  %v6443_v54 = vpack.c.bf16 %v698_v51, %v697_v50  ;;  %v444_v51 = vld [vmem:[%s7797_s26 + $0x368] sm:$0xff] }
 0x124   : > { %6412 = vmatprep.subr.bf16.mxu1 %v6411_v7  ;;  %v6463_v2 = vpack.c.bf16 %v708_v59, %v707_v58  ;;  %v715_v58 = vld [vmem:[%s7805_s13 + $0x3e0] sm:$0xff]  ;;  %v716_v59 = vld [vmem:[%s7805_s13 + $0x3e8] sm:$0xff] }
 0x125   : > { %v6479_v61 = vpack.c.bf16 %v716_v59, %v715_v58  ;;  %v461_v58 = vld [vmem:[%s7797_s26 + $0x3f0] sm:$0xff] }
 0x12a   : > { %6382 = vmatpush3.bf16.xpose.msra.mxu0 %v6379_v6  ;;  %v424_v6 = vld [vmem:[%s7797_s26 + $0x2c8] sm:$0xff] }
 0x12b   : > { %6414 = vmatpush3.bf16.xpose.msra.mxu1 %v6411_v7  ;;  %6384 = vmatprep.subr.bf16.mxu0 %v6383_v12  ;;  %v551_v7 = vmul.f32 0.088388346, %v423_v63  ;;  %v552_v11 = vmul.f32 0.088388346, %v424_v6  ;;  %v702_v63 = vld [vmem:[%s7805_s13 + $0x378] sm:$0xff]  ;;  %v433_v6 = vld [vmem:[%s7797_s26 + $0x310] sm:$0xff] }
 0x12c   : > { %6416 = vmatprep.subr.bf16.mxu1 %v6415_v13 }
 0x132   : > { %6386 = vmatpush3.bf16.xpose.msra.mxu0 %v6383_v12  ;;  %v693_v12 = vld [vmem:[%s7805_s13 + $0x330] sm:$0xff] }
 0x133   : > { %6418 = vmatpush3.bf16.xpose.msra.mxu1 %v6415_v13  ;;  %6388 = vmatprep.subr.bf16.mxu0 %v6387_v18  ;;  %v694_v13 = vld [vmem:[%s7805_s13 + $0x338] sm:$0xff] }
 0x134   : > { %6420 = vmatprep.subr.bf16.mxu1 %v6419_v19  ;;  %v6435_v22 = vpack.c.bf16 %v694_v13, %v693_v12  ;;  %v450_v13 = vld [vmem:[%s7797_s26 + $0x398] sm:$0xff] }
 0x13a   : > { %6390 = vmatpush3.bf16.xpose.msra.mxu0 %v6387_v18  ;;  %v553_v18 = vmul.f32 0.088388346, %v425_v9  ;;  %v576_v9 = vmul.f32 0.088388346, %v448_v5 }
 0x13b   : > { %6422 = vmatpush3.bf16.xpose.msra.mxu1 %v6419_v19  ;;  %6424 = vmatprep.subr.bf16.mxu0 %v6423_v24  ;;  %v426_v19 = vld [vmem:[%s7797_s26 + $0x2d8] sm:$0xff] }
 0x13c   : > { %6456 = vmatprep.subr.bf16.mxu1 %v6455_v25 }
 0x141   : > { %5592 = vmatmul.mubr.f32.vlgmr.msra.gmra.mrb[32].mxu0 %v528_v30  ;;  %v413_v30 = vld [vmem:[%s7797_s26 + $0x270] sm:$0xff] }
 0x142   : > { %5648 = vmatmul.mubr.f32.vlgmr.msra.gmra.mrb[32].mxu1 %v544_v31  ;;  %5594 = vmatprep.mubr.f32.mxu0 %v529_v34  ;;  %v429_v31 = vld [vmem:[%s7797_s26 + $0x2f0] sm:$0xff]  ;;  %v695_v34 = vld [vmem:[%s7805_s13 + $0x340] sm:$0xff]  ;;  %v541_v36 = vmul.f32 0.088388346, %v413_v30 }
 0x143   : > { %5650 = vmatprep.mubr.f32.mxu1 %v545_v38  ;;  %6426 = vmatpush3.bf16.xpose.msra.mxu0 %v6423_v24  ;;  %v6467_v24 = vpack.c.bf16 %v710_v17, %v709_v16  ;;  %v711_v38 = vld [vmem:[%s7805_s13 + $0x3c0] sm:$0xff]  ;;  %v557_v40 = vmul.f32 0.088388346, %v429_v31  ;;  %v578_v17 = vmul.f32 0.088388346, %v450_v13 }
 0x144   : > { %6458 = vmatpush3.bf16.xpose.msra.mxu1 %v6455_v25  ;;  %6428 = vmatprep.subr.bf16.mxu0 %v6427_v42  ;;  %v554_v25 = vmul.f32 0.088388346, %v426_v19  ;;  %v436_v19 = vld [vmem:[%s7797_s26 + $0x328] sm:$0xff]  ;;  %v439_v30 = vld [vmem:[%s7797_s26 + $0x340] sm:$0xff] }
 0x145   : > { %5595 = vmatmul.mubr.f32.gmra.mrb[34].mxu0 %v530_v43  ;;  %6460 = vmatprep.subr.bf16.mxu1 %v6459_v44  ;;  %v6439_v43 = vpack.c.bf16 %v696_v35, %v695_v34  ;;  %v455_v31 = vld [vmem:[%s7797_s26 + $0x3c0] sm:$0xff]  ;;  %v567_v34 = vmul.f32 0.088388346, %v439_v30  ;;  %v440_v35 = vld [vmem:[%s7797_s26 + $0x348] sm:$0xff] }
 0x146   : > { %5651 = vmatmul.mubr.f32.gmra.mrb[34].mxu1 %v546_v45  ;;  %5597 = vmatprep.mubr.f32.mxu0 %v531_v46  ;;  %v542_v45 = vmul.f32 0.088388346, %v414_v37  ;;  %v6471_v46 = vpack.c.bf16 %v712_v39, %v711_v38  ;;  %v456_v37 = vld [vmem:[%s7797_s26 + $0x3c8] sm:$0xff]  ;;  %v441_v38 = vld [vmem:[%s7797_s26 + $0x350] sm:$0xff] }
 0x147   : > { %5653 = vmatprep.mubr.f32.mxu1 %v547_v49  ;;  %v457_v39 = vld [vmem:[%s7797_s26 + $0x3d0] sm:$0xff]  ;;  %v584_v41 = vmul.f32 0.088388346, %v456_v37 }
 0x149   : > { %5598 = vmatmul.mubr.f32.gmra.mrb[36].mxu0 %v532_v52  ;;  %v713_v52 = vld [vmem:[%s7805_s13 + $0x3d0] sm:$0xff] }
 0x14a   : > { %5654 = vmatmul.mubr.f32.gmra.mrb[36].mxu1 %v548_v53  ;;  %5600 = vmatprep.mubr.f32.mxu0 %v533_v56  ;;  %v714_v53 = vld [vmem:[%s7805_s13 + $0x3d8] sm:$0xff]  ;;  %v699_v56 = vld [vmem:[%s7805_s13 + $0x360] sm:$0xff] }
 0x14b   : > { %5656 = vmatprep.mubr.f32.mxu1 %v549_v60  ;;  %6430 = vmatpush3.bf16.xpose.msra.mxu0 %v6427_v42  ;;  %v431_v42 = vld [vmem:[%s7797_s26 + $0x300] sm:$0xff]  ;;  %v6475_v55 = vpack.c.bf16 %v714_v53, %v713_v52  ;;  %v6447_v60 = vpack.c.bf16 %v700_v57, %v699_v56 }
 0x14c   : > { %6462 = vmatpush3.bf16.xpose.msra.mxu1 %v6459_v44  ;;  %6432 = vmatprep.subr.bf16.mxu0 %v6431_v0  ;;  %v447_v44 = vld [vmem:[%s7797_s26 + $0x380] sm:$0xff]  ;;  %v559_v48 = vmul.f32 0.088388346, %v431_v42  ;;  %v569_v42 = vmul.f32 0.088388346, %v441_v38 }
 0x14d   : > { %5601 = vmatmul.mubr.f32.gmra.mrb[38].mxu0 %v534_v1  ;;  %6464 = vmatprep.subr.bf16.mxu1 %v6463_v2  ;;  %v575_v49 = vmul.f32 0.088388346, %v447_v44  ;;  %v718_v1 = vld [vmem:[%s7805_s13 + $0x3f8] sm:$0xff]  ;;  %v585_v44 = vmul.f32 0.088388346, %v457_v39 }
 0x14e   : > { %5657 = vmatmul.mubr.f32.gmra.mrb[38].mxu1 %v550_v3  ;;  %5603 = vmatprep.mubr.f32.mxu0 %v535_v4  ;;  %v432_v4 = vld [vmem:[%s7797_s26 + $0x308] sm:$0xff] }
 0x14f   : > { %5659 = vmatprep.mubr.f32.mxu1 %v551_v7  ;;  %v449_v7 = vld [vmem:[%s7797_s26 + $0x390] sm:$0xff]  ;;  %v560_v8 = vmul.f32 0.088388346, %v432_v4 }
 0x150   : > { %v577_v12 = vmul.f32 0.088388346, %v449_v7 }
 0x151   : > { %5604 = vmatmul.mubr.f32.gmra.mrb[40].mxu0 %v536_v10  ;;  %v561_v10 = vmul.f32 0.088388346, %v433_v6 }
 0x152   : > { %5660 = vmatmul.mubr.f32.gmra.mrb[40].mxu1 %v552_v11  ;;  %5606 = vmatprep.mubr.f32.mxu0 %v537_v14  ;;  %v434_v11 = vld [vmem:[%s7797_s26 + $0x318] sm:$0xff]  ;;  %v435_v14 = vld [vmem:[%s7797_s26 + $0x320] sm:$0xff] }
 0x153   : > { %5662 = vmatprep.mubr.f32.mxu1 %v553_v18  ;;  %6434 = vmatpush3.bf16.xpose.msra.mxu0 %v6431_v0  ;;  %v717_v0 = vld [vmem:[%s7805_s13 + $0x3f0] sm:$0xff]  ;;  %v562_v16 = vmul.f32 0.088388346, %v434_v11  ;;  %v563_v18 = vmul.f32 0.088388346, %v435_v14 }
 0x154   : > { %6466 = vmatpush3.bf16.xpose.msra.mxu1 %v6463_v2  ;;  %6436 = vmatprep.subr.bf16.mxu0 %v6435_v22  ;;  %v6451_v2 = vpack.c.bf16 %v702_v63, %v701_v62  ;;  %v6483_v3 = vpack.c.bf16 %v718_v1, %v717_v0  ;;  %v446_v63 = vld [vmem:[%s7797_s26 + $0x378] sm:$0xff]  ;;  %v589_v1 = vmul.f32 0.088388346, %v461_v58 }
 0x155   : > { %5607 = vmatmul.mubr.f32.gmra.mrb[42].mxu0 %v538_v23  ;;  %6468 = vmatprep.subr.bf16.mxu1 %v6467_v24  ;;  %v453_v23 = vld [vmem:[%s7797_s26 + $0x3b0] sm:$0xff]  ;;  %v574_v6 = vmul.f32 0.088388346, %v446_v63 }
 0x156   : > { %5663 = vmatmul.mubr.f32.gmra.mrb[42].mxu1 %v554_v25  ;;  %5609 = vmatprep.mubr.f32.mxu0 %v539_v26  ;;  %v580_v25 = vmul.f32 0.088388346, %v452_v21  ;;  %v581_v28 = vmul.f32 0.088388346, %v453_v23 }
 0x157   : > { %5665 = vmatprep.mubr.f32.mxu1 %v555_v29  ;;  %v454_v29 = vld [vmem:[%s7797_s26 + $0x3b8] sm:$0xff] }
 0x159   : > { %5610 = vmatmul.mubr.f32.gmra.mrb[44].mxu0 %v540_v32  ;;  %v566_v32 = vmul.f32 0.088388346, %v438_v27 }
 0x15a   : > { %5666 = vmatmul.mubr.f32.gmra.mrb[44].mxu1 %v556_v33  ;;  %5612 = vmatprep.mubr.f32.mxu0 %v541_v36  ;;  %v582_v33 = vmul.f32 0.088388346, %v454_v29  ;;  %v583_v36 = vmul.f32 0.088388346, %v455_v31 }
 0x15b   : > { %5668 = vmatprep.mubr.f32.mxu1 %v557_v40  ;;  %6438 = vmatpush3.bf16.xpose.msra.mxu0 %v6435_v22  ;;  %v437_v22 = vld [vmem:[%s7797_s26 + $0x330] sm:$0xff]  ;;  %v568_v40 = vmul.f32 0.088388346, %v440_v35 }
 0x15c   : > { %6470 = vmatpush3.bf16.xpose.msra.mxu1 %v6467_v24  ;;  %6440 = vmatprep.subr.bf16.mxu0 %v6439_v43  ;;  %v564_v24 = vmul.f32 0.088388346, %v436_v19  ;;  %v565_v26 = vmul.f32 0.088388346, %v437_v22 }
 0x15d   : > { %5613 = vmatmul.mubr.f32.gmra.mrb[46].mxu0 %v542_v45  ;;  %6472 = vmatprep.subr.bf16.mxu1 %v6471_v46  ;;  %v458_v45 = vld [vmem:[%s7797_s26 + $0x3d8] sm:$0xff] }
 0x15e   : > { %5669 = vmatmul.mubr.f32.gmra.mrb[46].mxu1 %v558_v47  ;;  %5703 = vmatprep.mubr.f32.mxu0 %v559_v48  ;;  %v459_v47 = vld [vmem:[%s7797_s26 + $0x3e0] sm:$0xff] }
 0x15f   : > { %5759 = vmatprep.mubr.f32.mxu1 %v575_v49  ;;  %v586_v49 = vmul.f32 0.088388346, %v458_v45  ;;  %v587_v53 = vmul.f32 0.088388346, %v459_v47 }
 0x163   : > { %6442 = vmatpush3.bf16.xpose.msra.mxu0 %v6439_v43  ;;  %v442_v43 = vld [vmem:[%s7797_s26 + $0x358] sm:$0xff] }
 0x164   : > { %6474 = vmatpush3.bf16.xpose.msra.mxu1 %v6471_v46  ;;  %6444 = vmatprep.subr.bf16.mxu0 %v6443_v54  ;;  %v443_v46 = vld [vmem:[%s7797_s26 + $0x360] sm:$0xff]  ;;  %v570_v48 = vmul.f32 0.088388346, %v442_v43 }
 0x165   : > { %6476 = vmatprep.subr.bf16.mxu1 %v6475_v55  ;;  %v571_v50 = vmul.f32 0.088388346, %v443_v46 }
 0x16b   : > { %6446 = vmatpush3.bf16.xpose.msra.mxu0 %v6443_v54  ;;  %v460_v54 = vld [vmem:[%s7797_s26 + $0x3e8] sm:$0xff] }
 0x16c   : > { %6478 = vmatpush3.bf16.xpose.msra.mxu1 %v6475_v55  ;;  %6448 = vmatprep.subr.bf16.mxu0 %v6447_v60  ;;  %v445_v55 = vld [vmem:[%s7797_s26 + $0x370] sm:$0xff] }
 0x16d   : > { %6480 = vmatprep.subr.bf16.mxu1 %v6479_v61  ;;  %v573_v62 = vmul.f32 0.088388346, %v445_v55 }
 0x173   : > { %6450 = vmatpush3.bf16.xpose.msra.mxu0 %v6447_v60  ;;  %v572_v60 = vmul.f32 0.088388346, %v444_v51 }
 0x174   : > { %6482 = vmatpush3.bf16.xpose.msra.mxu1 %v6479_v61  ;;  %6452 = vmatprep.subr.bf16.mxu0 %v6451_v2  ;;  %v588_v61 = vmul.f32 0.088388346, %v460_v54 }
 0x175   : > { %6484 = vmatprep.subr.bf16.mxu1 %v6483_v3 }
 0x17b   : > { %6454 = vmatpush3.bf16.xpose.msra.mxu0 %v6451_v2  ;;  %v462_v2 = vld [vmem:[%s7797_s26 + $0x3f8] sm:$0xff] }
 0x17c   : > { %6486 = vmatpush3.bf16.xpose.msra.mxu1 %v6483_v3  ;;  %v590_v7 = vmul.f32 0.088388346, %v462_v2 }
 0x182   : > { %5704 = vmatmul.mubr.f32.vlgmr.msra.gmra.mrb[48].mxu0 %v560_v8 }
 0x183   : > { %5760 = vmatmul.mubr.f32.vlgmr.msra.gmra.mrb[48].mxu1 %v576_v9  ;;  %5706 = vmatprep.mubr.f32.mxu0 %v561_v10 }
 0x184   : > { %5762 = vmatprep.mubr.f32.mxu1 %v577_v12 }
 0x186   : > { %5707 = vmatmul.mubr.f32.gmra.mrb[50].mxu0 %v562_v16 }
 0x187   : > { %5763 = vmatmul.mubr.f32.gmra.mrb[50].mxu1 %v578_v17  ;;  %5709 = vmatprep.mubr.f32.mxu0 %v563_v18 }
 0x188   : > { %5765 = vmatprep.mubr.f32.mxu1 %v579_v20 }
 0x18a   : > { %5710 = vmatmul.mubr.f32.gmra.mrb[52].mxu0 %v564_v24 }
 0x18b   : > { %5766 = vmatmul.mubr.f32.gmra.mrb[52].mxu1 %v580_v25  ;;  %5712 = vmatprep.mubr.f32.mxu0 %v565_v26 }
 0x18c   : > { %5768 = vmatprep.mubr.f32.mxu1 %v581_v28 }
 0x18e   : > { %5713 = vmatmul.mubr.f32.gmra.mrb[54].mxu0 %v566_v32 }
 0x18f   : > { %5769 = vmatmul.mubr.f32.gmra.mrb[54].mxu1 %v582_v33  ;;  %5715 = vmatprep.mubr.f32.mxu0 %v567_v34 }
 0x190   : > { %5771 = vmatprep.mubr.f32.mxu1 %v583_v36 }
 0x192   : > { %5716 = vmatmul.mubr.f32.gmra.mrb[56].mxu0 %v568_v40 }
 0x193   : > { %5772 = vmatmul.mubr.f32.gmra.mrb[56].mxu1 %v584_v41  ;;  %5718 = vmatprep.mubr.f32.mxu0 %v569_v42 }
 0x194   : > { %v8062_v52 = vpop.f32.mrb[0].mxu0  ;;  %5774 = vmatprep.mubr.f32.mxu1 %v585_v44 }
 0x195   : > { %v8066_v56 = vpop.f32.mrb[0].mxu1  ;;  %2009 = vmax.xlane.f32.xlu1 %v8062_v52  ;;  %v8069_v57 = vpop.f32.mrb[1].mxu0 }
 0x196   : > { %v8072_v59 = vpop.f32.mrb[1].mxu1  ;;  %2007 = vmax.xlane.f32.xlu0 %v8069_v57  ;;  %5719 = vmatmul.mubr.f32.gmra.mrb[58].mxu0 %v570_v48 }
 0x197   : > { %5775 = vmatmul.mubr.f32.gmra.mrb[58].mxu1 %v586_v49  ;;  %5721 = vmatprep.mubr.f32.mxu0 %v571_v50 }
 0x198   : > { %v8076_v0 = vpop.f32.mrb[2].mxu0  ;;  %5777 = vmatprep.mubr.f32.mxu1 %v587_v53 }
 0x199   : > { %2041 = vmax.xlane.f32.xlu1 %v8066_v56  ;;  %v8080_v3 = vpop.f32.mrb[2].mxu1  ;;  %v8082_v4 = vpop.f32.mrb[3].mxu0 }
 0x19a   : > { %2039 = vmax.xlane.f32.xlu0 %v8072_v59  ;;  %v8085_v5 = vpop.f32.mrb[3].mxu1  ;;  %5722 = vmatmul.mubr.f32.gmra.mrb[60].mxu0 %v572_v60 }
 0x19b   : > { %5778 = vmatmul.mubr.f32.gmra.mrb[60].mxu1 %v588_v61  ;;  %5724 = vmatprep.mubr.f32.mxu0 %v573_v62 }
 0x19c   : > { %v8087_v8 = vpop.f32.mrb[4].mxu0  ;;  %5780 = vmatprep.mubr.f32.mxu1 %v589_v1 }
 0x19d   : > { %2045 = vmax.xlane.f32.xlu1 %v8080_v3  ;;  %v8090_v9 = vpop.f32.mrb[4].mxu1  ;;  %v8092_v10 = vpop.f32.mrb[5].mxu0 }
 0x19e   : > { %2013 = vmax.xlane.f32.xlu0 %v8076_v0  ;;  %v8095_v11 = vpop.f32.mrb[5].mxu1  ;;  %5725 = vmatmul.mubr.f32.gmra.mrb[62].mxu0 %v574_v6 }
 0x19f   : > { %5781 = vmatmul.mubr.f32.gmra.mrb[62].mxu1 %v590_v7 }
 0x1a0   : > { %v8097_v12 = vpop.f32.mrb[6].mxu0 }
 0x1a1   : > { %2043 = vmax.xlane.f32.xlu1 %v8085_v5  ;;  %v8100_v13 = vpop.f32.mrb[6].mxu1  ;;  %v8102_v14 = vpop.f32.mrb[7].mxu0 }
 0x1a2   : > { %2011 = vmax.xlane.f32.xlu0 %v8082_v4  ;;  %v8105_v15 = vpop.f32.mrb[7].mxu1 }
 0x1a4   : > { %v8107_v16 = vpop.f32.mrb[8].mxu0 }
 0x1a5   : > { %2049 = vmax.xlane.f32.xlu1 %v8090_v9  ;;  %v8110_v17 = vpop.f32.mrb[8].mxu1  ;;  %v8112_v18 = vpop.f32.mrb[9].mxu0 }
 0x1a6   : > { %2017 = vmax.xlane.f32.xlu0 %v8087_v8  ;;  %v8115_v19 = vpop.f32.mrb[9].mxu1 }
 0x1a8   : > { %v8117_v20 = vpop.f32.mrb[10].mxu0 }
 0x1a9   : > { %2047 = vmax.xlane.f32.xlu1 %v8095_v11  ;;  %v8120_v21 = vpop.f32.mrb[10].mxu1  ;;  %v8122_v22 = vpop.f32.mrb[11].mxu0 }
 0x1aa   : > { %2015 = vmax.xlane.f32.xlu0 %v8092_v10  ;;  %v8125_v23 = vpop.f32.mrb[11].mxu1 }
 0x1ac   : > { %v8127_v24 = vpop.f32.mrb[12].mxu0 }
 0x1ad   : > { %10487 = vst [vmem:[#allocation19_spill] sm:$0xff] %v8127_v24  ;;  %2053 = vmax.xlane.f32.xlu1 %v8100_v13  ;;  %v8130_v25 = vpop.f32.mrb[12].mxu1  ;;  %v8132_v26 = vpop.f32.mrb[13].mxu0 }
 0x1ae   : > { %10488 = vst [vmem:[#allocation20_spill] sm:$0xff] %v8130_v25  ;;  %10489 = vst [vmem:[#allocation21_spill] sm:$0xff] %v8132_v26  ;;  %2021 = vmax.xlane.f32.xlu0 %v8097_v12  ;;  %v8135_v27 = vpop.f32.mrb[13].mxu1 }
 0x1af   : > { %10490 = vst [vmem:[#allocation22_spill] sm:$0xff] %v8135_v27 }
 0x1b0   : > { %v8137_v28 = vpop.f32.mrb[14].mxu0 }
 0x1b1   : > { %10491 = vst [vmem:[#allocation23_spill] sm:$0xff] %v8137_v28  ;;  %2051 = vmax.xlane.f32.xlu1 %v8105_v15  ;;  %v8140_v29 = vpop.f32.mrb[14].mxu1  ;;  %v8142_v30 = vpop.f32.mrb[15].mxu0 }
 0x1b2   : > { %10492 = vst [vmem:[#allocation24_spill] sm:$0xff] %v8140_v29  ;;  %10493 = vst [vmem:[#allocation25_spill] sm:$0xff] %v8142_v30  ;;  %2019 = vmax.xlane.f32.xlu0 %v8102_v14  ;;  %v8145_v31 = vpop.f32.mrb[15].mxu1 }
 0x1b3   : > { %10494 = vst [vmem:[#allocation26_spill] sm:$0xff] %v8145_v31 }
 0x1b5   : > { %2057 = vmax.xlane.f32.xlu1 %v8110_v17 }
 0x1b6   : > { %2025 = vmax.xlane.f32.xlu0 %v8107_v16 }
 0x1b9   : > { %2055 = vmax.xlane.f32.xlu1 %v8115_v19 }
 0x1ba   : > { %2023 = vmax.xlane.f32.xlu0 %v8112_v18 }
 0x1bd   : > { %2061 = vmax.xlane.f32.xlu1 %v8120_v21 }
 0x1be   : > { %2029 = vmax.xlane.f32.xlu0 %v8117_v20 }
 0x1c1   : > { %2059 = vmax.xlane.f32.xlu1 %v8125_v23 }
 0x1c2   : > { %2027 = vmax.xlane.f32.xlu0 %v8122_v22 }
 0x1c5   : > { %2065 = vmax.xlane.f32.xlu1 %v8130_v25 }
 0x1c6   : > { %2033 = vmax.xlane.f32.xlu0 %v8127_v24 }
 0x1c9   : > { %2063 = vmax.xlane.f32.xlu1 %v8135_v27 }
 0x1ca   : > { %2031 = vmax.xlane.f32.xlu0 %v8132_v26 }
 0x1cd   : > { %2069 = vmax.xlane.f32.xlu1 %v8140_v29 }
 0x1ce   : > { %2037 = vmax.xlane.f32.xlu0 %v8137_v28 }
 0x1d1   : > { %2067 = vmax.xlane.f32.xlu1 %v8145_v31 }
 0x1d2   : > { %2035 = vmax.xlane.f32.xlu0 %v8142_v30 }
 0x1d4   : > { %v8163_v32 = vpop.f32.mrb[16].mxu0 }
 0x1d5   : > { %v8165_v33 = vpop.f32.mrb[16].mxu1  ;;  %v8167_v34 = vpop.f32.mrb[17].mxu0 }
 0x1d6   : > { %v8169_v35 = vpop.f32.mrb[17].mxu1  ;;  %2105 = vmax.xlane.f32.xlu1 %v8165_v33  ;;  %2073 = vmax.xlane.f32.xlu0 %v8163_v32 }
 0x1d8   : > { %v8173_v36 = vpop.f32.mrb[18].mxu0 }
 0x1d9   : > { %10495 = vst [vmem:[#allocation27_spill] sm:$0xff] %v8173_v36  ;;  %v8175_v37 = vpop.f32.mrb[18].mxu1  ;;  %v8177_v38 = vpop.f32.mrb[19].mxu0 }
 0x1da   : > { %10496 = vst [vmem:[#allocation28_spill] sm:$0xff] %v8175_v37  ;;  %10497 = vst [vmem:[#allocation29_spill] sm:$0xff] %v8177_v38  ;;  %2103 = vmax.xlane.f32.xlu1 %v8169_v35  ;;  %2071 = vmax.xlane.f32.xlu0 %v8167_v34  ;;  %v8181_v39 = vpop.f32.mrb[19].mxu1 }
 0x1db   : > { %10498 = vst [vmem:[#allocation30_spill] sm:$0xff] %v8181_v39 }
 0x1dc   : > { %v8183_v40 = vpop.f32.mrb[20].mxu0 }
 0x1dd   : > { %10499 = vst [vmem:[#allocation31_spill] sm:$0xff] %v8183_v40  ;;  %v8185_v41 = vpop.f32.mrb[20].mxu1  ;;  %v8187_v42 = vpop.f32.mrb[21].mxu0 }
 0x1de   : > { %10500 = vst [vmem:[#allocation32_spill] sm:$0xff] %v8185_v41  ;;  %10501 = vst [vmem:[#allocation33_spill] sm:$0xff] %v8187_v42  ;;  %2109 = vmax.xlane.f32.xlu1 %v8175_v37  ;;  %2077 = vmax.xlane.f32.xlu0 %v8173_v36  ;;  %v8191_v43 = vpop.f32.mrb[21].mxu1  ;;  %v749_v36 = vld [vmem:[%s8411_s21 + $0xf0] sm:$0xff] }
 0x1df   : > { %10502 = vst [vmem:[#allocation34_spill] sm:$0xff] %v8191_v43 }
 0x1e0   : > { %v8193_v44 = vpop.f32.mrb[22].mxu0 }
 0x1e1   : > { %10503 = vst [vmem:[#allocation35_spill] sm:$0xff] %v8193_v44  ;;  %v8195_v45 = vpop.f32.mrb[22].mxu1  ;;  %v8197_v46 = vpop.f32.mrb[23].mxu0 }
 0x1e2   : > { %10504 = vst [vmem:[#allocation36_spill] sm:$0xff] %v8195_v45  ;;  %10505 = vst [vmem:[#allocation37_spill] sm:$0xff] %v8197_v46  ;;  %2107 = vmax.xlane.f32.xlu1 %v8181_v39  ;;  %2075 = vmax.xlane.f32.xlu0 %v8177_v38  ;;  %v8201_v47 = vpop.f32.mrb[23].mxu1 }
 0x1e3   : > { %10506 = vst [vmem:[#allocation38_spill] sm:$0xff] %v8201_v47 }
 0x1e4   : > { %v8203_v48 = vpop.f32.mrb[24].mxu0 }
 0x1e5   : > { %10507 = vst [vmem:[#allocation39_spill] sm:$0xff] %v8203_v48  ;;  %v8205_v49 = vpop.f32.mrb[24].mxu1  ;;  %v8207_v50 = vpop.f32.mrb[25].mxu0 }
 0x1e6   : > { %10508 = vst [vmem:[#allocation40_spill] sm:$0xff] %v8205_v49  ;;  %10509 = vst [vmem:[#allocation41_spill] sm:$0xff] %v8207_v50  ;;  %2113 = vmax.xlane.f32.xlu1 %v8185_v41  ;;  %2081 = vmax.xlane.f32.xlu0 %v8183_v40  ;;  %v8211_v51 = vpop.f32.mrb[25].mxu1 }
 0x1e7   : > { %10510 = vst [vmem:[#allocation42_spill] sm:$0xff] %v8211_v51 }
 0x1e8   : > { %v8213_v53 = vpop.f32.mrb[26].mxu0 }
 0x1e9   : > { %10511 = vst [vmem:[#allocation43_spill] sm:$0xff] %v8213_v53  ;;  %v8215_v54 = vpop.f32.mrb[26].mxu1  ;;  %v8217_v55 = vpop.f32.mrb[27].mxu0 }
 0x1ea   : > { %10512 = vst [vmem:[#allocation44_spill] sm:$0xff] %v8215_v54  ;;  %10513 = vst [vmem:[#allocation45_spill] sm:$0xff] %v8217_v55  ;;  %2111 = vmax.xlane.f32.xlu1 %v8191_v43  ;;  %2079 = vmax.xlane.f32.xlu0 %v8187_v42  ;;  %v8221_v58 = vpop.f32.mrb[27].mxu1 }
 0x1eb   : > { %10514 = vst [vmem:[#allocation46_spill] sm:$0xff] %v8221_v58 }
 0x1ec   : > { %v8223_v60 = vpop.f32.mrb[28].mxu0 }
 0x1ed   : > { %10515 = vst [vmem:[#allocation47_spill] sm:$0xff] %v8223_v60  ;;  %v8225_v61 = vpop.f32.mrb[28].mxu1  ;;  %v8227_v62 = vpop.f32.mrb[29].mxu0 }
 0x1ee   : > { %10516 = vst [vmem:[#allocation48_spill] sm:$0xff] %v8225_v61  ;;  %10517 = vst [vmem:[#allocation49_spill] sm:$0xff] %v8227_v62  ;;  %2117 = vmax.xlane.f32.xlu1 %v8195_v45  ;;  %2085 = vmax.xlane.f32.xlu0 %v8193_v44  ;;  %v8231_v63 = vpop.f32.mrb[29].mxu1 }
 0x1ef   : > { %10518 = vst [vmem:[#allocation50_spill] sm:$0xff] %v8231_v63 }
 0x1f0   : > { %v8233_v1 = vpop.f32.mrb[30].mxu0 }
 0x1f1   : > { %10519 = vst [vmem:[#allocation51_spill] sm:$0xff] %v8233_v1  ;;  %v8235_v2 = vpop.f32.mrb[30].mxu1  ;;  %v8237_v6 = vpop.f32.mrb[31].mxu0 }
 0x1f2   : > { %10520 = vst [vmem:[#allocation52_spill] sm:$0xff] %v8235_v2  ;;  %10521 = vst [vmem:[#allocation53_spill] sm:$0xff] %v8237_v6  ;;  %2115 = vmax.xlane.f32.xlu1 %v8201_v47  ;;  %2083 = vmax.xlane.f32.xlu0 %v8197_v46  ;;  %v8241_v7 = vpop.f32.mrb[31].mxu1 }
 0x1f3   : > { %10522 = vst [vmem:[#allocation54_spill] sm:$0xff] %v8241_v7 }
 0x1f6   : > { %2121 = vmax.xlane.f32.xlu1 %v8205_v49  ;;  %2089 = vmax.xlane.f32.xlu0 %v8203_v48 }
 0x1fa   : > { %2119 = vmax.xlane.f32.xlu1 %v8211_v51  ;;  %2087 = vmax.xlane.f32.xlu0 %v8207_v50 }
 0x1fe   : > { %2125 = vmax.xlane.f32.xlu1 %v8215_v54  ;;  %2093 = vmax.xlane.f32.xlu0 %v8213_v53 }
 0x202   : > { %2123 = vmax.xlane.f32.xlu1 %v8221_v58  ;;  %2091 = vmax.xlane.f32.xlu0 %v8217_v55 }
 0x206   : > { %2129 = vmax.xlane.f32.xlu1 %v8225_v61  ;;  %2097 = vmax.xlane.f32.xlu0 %v8223_v60 }
 0x20a   : > { %2127 = vmax.xlane.f32.xlu1 %v8231_v63  ;;  %2095 = vmax.xlane.f32.xlu0 %v8227_v62 }
 0x20e   : > { %2133 = vmax.xlane.f32.xlu1 %v8235_v2  ;;  %2101 = vmax.xlane.f32.xlu0 %v8233_v1 }
 0x212   : > { %2131 = vmax.xlane.f32.xlu1 %v8241_v7  ;;  %2099 = vmax.xlane.f32.xlu0 %v8237_v6 }
 0x214   : > { %v8259_v53 = vpop.f32.mrb[32].mxu0 }
 0x215   : > { %10523 = vst [vmem:[#allocation55_spill] sm:$0xff] %v8259_v53  ;;  %v8261_v58 = vpop.f32.mrb[32].mxu1  ;;  %v8263_v55 = vpop.f32.mrb[33].mxu0 }
 0x216   : > { %10524 = vst [vmem:[#allocation56_spill] sm:$0xff] %v8261_v58  ;;  %10525 = vst [vmem:[#allocation57_spill] sm:$0xff] %v8263_v55  ;;  %v8265_v61 = vpop.f32.mrb[33].mxu1  ;;  %2169 = vmax.xlane.f32.xlu1 %v8261_v58  ;;  %2137 = vmax.xlane.f32.xlu0 %v8259_v53 }
 0x217   : > { %10526 = vst [vmem:[#allocation58_spill] sm:$0xff] %v8265_v61 }
 0x218   : > { %v8269_v62 = vpop.f32.mrb[34].mxu0 }
 0x219   : > { %10527 = vst [vmem:[#allocation59_spill] sm:$0xff] %v8269_v62  ;;  %v8271_v2 = vpop.f32.mrb[34].mxu1  ;;  %v8273_v1 = vpop.f32.mrb[35].mxu0 }
 0x21a   : > { %10528 = vst [vmem:[#allocation60_spill] sm:$0xff] %v8271_v2  ;;  %10529 = vst [vmem:[#allocation61_spill] sm:$0xff] %v8273_v1  ;;  %2167 = vmax.xlane.f32.xlu1 %v8265_v61  ;;  %2135 = vmax.xlane.f32.xlu0 %v8263_v55  ;;  %v8277_v6 = vpop.f32.mrb[35].mxu1 }
 0x21b   : > { %10530 = vst [vmem:[#allocation62_spill] sm:$0xff] %v8277_v6 }
 0x21c   : > { %v8279_v7 = vpop.f32.mrb[36].mxu0 }
 0x21d   : > { %10531 = vst [vmem:[#allocation63_spill] sm:$0xff] %v8279_v7  ;;  %v8281_v63 = vpop.f32.mrb[36].mxu1  ;;  %v8283_v60 = vpop.f32.mrb[37].mxu0 }
 0x21e   : > { %10532 = vst [vmem:[#allocation64_spill] sm:$0xff] %v8281_v63  ;;  %10533 = vst [vmem:[#allocation65_spill] sm:$0xff] %v8283_v60  ;;  %2173 = vmax.xlane.f32.xlu1 %v8271_v2  ;;  %2141 = vmax.xlane.f32.xlu0 %v8269_v62  ;;  %v8287_v53 = vpop.f32.mrb[37].mxu1 }
 0x21f   : > { %10534 = vst [vmem:[#allocation66_spill] sm:$0xff] %v8287_v53 }
 0x220   : > { %v8289_v58 = vpop.f32.mrb[38].mxu0 }
 0x221   : > { %10535 = vst [vmem:[#allocation67_spill] sm:$0xff] %v8289_v58  ;;  %v8291_v54 = vpop.f32.mrb[38].mxu1  ;;  %v8293_v61 = vpop.f32.mrb[39].mxu0 }
 0x222   : > { %10536 = vst [vmem:[#allocation68_spill] sm:$0xff] %v8291_v54  ;;  %10537 = vst [vmem:[#allocation69_spill] sm:$0xff] %v8293_v61  ;;  %2171 = vmax.xlane.f32.xlu1 %v8277_v6  ;;  %v2010_v55 = vpop.xlane.xlu1 %2009  ;;  %2139 = vmax.xlane.f32.xlu0 %v8273_v1  ;;  %v8297_v50 = vpop.f32.mrb[39].mxu1 }
 0x223   : > { %10538 = vst [vmem:[#allocation70_spill] sm:$0xff] %v8297_v50  ;;  %v2008_v51 = vpop.xlane.xlu0 %2007 }
 0x224   : > { %v8299_v48 = vpop.f32.mrb[40].mxu0 }
 0x225   : > { %10539 = vst [vmem:[#allocation71_spill] sm:$0xff] %v8299_v48  ;;  %v8301_v2 = vpop.f32.mrb[40].mxu1  ;;  %v8303_v62 = vpop.f32.mrb[41].mxu0 }
 0x226   : > { %10540 = vst [vmem:[#allocation72_spill] sm:$0xff] %v8301_v2  ;;  %10541 = vst [vmem:[#allocation73_spill] sm:$0xff] %v8303_v62  ;;  %2177 = vmax.xlane.f32.xlu1 %v8281_v63  ;;  %v2042_v49 = vpop.xlane.xlu1 %2041  ;;  %2145 = vmax.xlane.f32.xlu0 %v8279_v7  ;;  %v8307_v46 = vpop.f32.mrb[41].mxu1 }
 0x227   : > { %10542 = vst [vmem:[#allocation74_spill] sm:$0xff] %v8307_v46  ;;  %v2040_v6 = vpop.xlane.xlu0 %2039 }
 0x228   : > { %v8309_v47 = vpop.f32.mrb[42].mxu0 }
 0x229   : > { %10543 = vst [vmem:[#allocation75_spill] sm:$0xff] %v8309_v47  ;;  %v8311_v1 = vpop.f32.mrb[42].mxu1  ;;  %v8313_v30 = vpop.f32.mrb[43].mxu0 }
 0x22a   : > { %10544 = vst [vmem:[#allocation76_spill] sm:$0xff] %v8311_v1  ;;  %10545 = vst [vmem:[#allocation77_spill] sm:$0xff] %v8313_v30  ;;  %2175 = vmax.xlane.f32.xlu1 %v8287_v53  ;;  %v2046_v31 = vpop.xlane.xlu1 %2045  ;;  %2143 = vmax.xlane.f32.xlu0 %v8283_v60  ;;  %v8317_v44 = vpop.f32.mrb[43].mxu1 }
 0x22b   : > { %10546 = vst [vmem:[#allocation78_spill] sm:$0xff] %v8317_v44  ;;  %v2014_v63 = vpop.xlane.xlu0 %2013 }
 0x22c   : > { %v8319_v45 = vpop.f32.mrb[44].mxu0 }
 0x22d   : > { %10547 = vst [vmem:[#allocation79_spill] sm:$0xff] %v8319_v45  ;;  %v8321_v7 = vpop.f32.mrb[44].mxu1  ;;  %v8323_v28 = vpop.f32.mrb[45].mxu0 }
 0x22e   : > { %10548 = vst [vmem:[#allocation80_spill] sm:$0xff] %v8321_v7  ;;  %10549 = vst [vmem:[#allocation81_spill] sm:$0xff] %v8323_v28  ;;  %2181 = vmax.xlane.f32.xlu1 %v8291_v54  ;;  %v2044_v29 = vpop.xlane.xlu1 %2043  ;;  %2149 = vmax.xlane.f32.xlu0 %v8289_v58  ;;  %v8327_v42 = vpop.f32.mrb[45].mxu1 }
 0x22f   : > { %10550 = vst [vmem:[#allocation82_spill] sm:$0xff] %v8327_v42  ;;  %v8329_v53 = vpop.xlane.xlu0 %2011 }
 0x230   : > { %v8331_v43 = vpop.f32.mrb[46].mxu0 }
 0x231   : > { %10551 = vst [vmem:[#allocation83_spill] sm:$0xff] %v8331_v43  ;;  %v8333_v60 = vpop.f32.mrb[46].mxu1  ;;  %v8335_v26 = vpop.f32.mrb[47].mxu0 }
 0x232   : > { %10552 = vst [vmem:[#allocation84_spill] sm:$0xff] %v8333_v60  ;;  %10553 = vst [vmem:[#allocation85_spill] sm:$0xff] %v8335_v26  ;;  %2179 = vmax.xlane.f32.xlu1 %v8297_v50  ;;  %v8338_v27 = vpop.xlane.xlu1 %2049  ;;  %2147 = vmax.xlane.f32.xlu0 %v8293_v61  ;;  %v8341_v54 = vpop.f32.mrb[47].mxu1  ;;  %v2264_v61 = vsub.f32 %v8062_v52, %v2010_v55  ;;  %v2263_v52 = vsub.f32 %v8069_v57, %v2008_v51 }
 0x233   : > { %10554 = vst [vmem:[#allocation86_spill] sm:$0xff] %v8341_v54  ;;  %v8343_v40 = vpop.xlane.xlu0 %2017 }
 0x234   : > { %v2393_v38 = vmul.f32 1.442695, %v2264_v61  ;;  %v2391_v61 = vmul.f32 1.442695, %v2263_v52 }
 0x236   : > { %2185 = vmax.xlane.f32.xlu1 %v8301_v2  ;;  %v8346_v58 = vpop.xlane.xlu1 %2047  ;;  %2153 = vmax.xlane.f32.xlu0 %v8299_v48  ;;  %v2280_v48 = vsub.f32 %v8066_v56, %v2042_v49  ;;  %6824 = vpow2.f32 %v2393_v38  ;;  %v2279_v56 = vsub.f32 %v8072_v59, %v2040_v6  ;;  %v2266_v38 = vsub.f32 %v8076_v0, %v2014_v63 }
 0x237   : > { %v8349_v41 = vpop.xlane.xlu0 %2015  ;;  %v2281_v59 = vsub.f32 %v8085_v5, %v2044_v29  ;;  %v2284_v29 = vsub.f32 %v8090_v9, %v8338_v27  ;;  %v735_v9 = vld [vmem:[%s8411_s21 + $0x80] sm:$0xff]  ;;  %v736_v27 = vld [vmem:[%s8411_s21 + $0x88] sm:$0xff] }
 0x238   : > { %v2423_v57 = vmul.f32 1.442695, %v2279_v56 }
 0x239   : > { %v2427_v5 = vmul.f32 1.442695, %v2281_v59 }
 0x23a   : > { %2183 = vmax.xlane.f32.xlu1 %v8307_v46  ;;  %v8352_v24 = vpop.xlane.xlu1 %2053  ;;  %2151 = vmax.xlane.f32.xlu0 %v8303_v62  ;;  %v2425_v62 = vmul.f32 1.442695, %v2280_v48 }
 0x23b   : > { %v8355_v50 = vpop.xlane.xlu0 %2021 }
 0x23c   : > { %6826 = vpow2.f32 %v2425_v62 }
 0x23d   : > { %6828 = vpow2.f32 %v2391_v61  ;;  %v6519_v61 = vpack.c.bf16 %v736_v27, %v735_v9  ;;  %v2267_v27 = vsub.f32 %v8092_v10, %v8349_v41 }
 0x23e   : > { %2189 = vmax.xlane.f32.xlu1 %v8311_v1  ;;  %v8359_v25 = vpop.xlane.xlu1 %2051  ;;  %2157 = vmax.xlane.f32.xlu0 %v8309_v47  ;;  %6830 = vpow2.f32 %v2423_v57  ;;  %v719_v57 = vld [vmem:[%s8411_s21] sm:$0xff]  ;;  %v748_v1 = vld [vmem:[%s8411_s21 + $0xe8] sm:$0xff] }
 0x23f   : > { %v8363_v2 = vpop.xlane.xlu0 %2019  ;;  %6520 = vmatprep.subr.bf16.mxu1 %v6519_v61 }
 0x240   : > { %v8396_v0 = vpop.eup %6824  ;;  %6522 = vmatpush3.bf16.msra.mxu1 %v6519_v61 }
 0x241   : > { %10555 = vst [vmem:[#allocation87_spill] sm:$0xff] %v8396_v0 }
 0x242   : > { %2187 = vmax.xlane.f32.xlu1 %v8317_v44  ;;  %v8366_v46 = vpop.xlane.xlu1 %2057  ;;  %2155 = vmax.xlane.f32.xlu0 %v8313_v30  ;;  %v2282_v30 = vsub.f32 %v8080_v3, %v2046_v31  ;;  %v2397_v3 = vmul.f32 1.442695, %v2266_v38  ;;  %v2265_v31 = vsub.f32 %v8082_v4, %v8329_v53  ;;  %v2268_v4 = vsub.f32 %v8087_v8, %v8343_v40  ;;  %v720_v38 = vld [vmem:[%s8411_s21 + $0x8] sm:$0xff] }
 0x243   : > { %v8369_v39 = vpop.xlane.xlu0 %2025  ;;  %v6487_v59 = vpack.c.bf16 %v720_v38, %v719_v57  ;;  %v2433_v8 = vmul.f32 1.442695, %v2284_v29  ;;  %v2283_v40 = vsub.f32 %v8095_v11, %v8346_v58  ;;  %v737_v11 = vld [vmem:[%s8411_s21 + $0x90] sm:$0xff]  ;;  %v738_v58 = vld [vmem:[%s8411_s21 + $0x98] sm:$0xff] }
 0x244   : > { %v2429_v62 = vmul.f32 1.442695, %v2282_v30  ;;  %v2395_v56 = vmul.f32 1.442695, %v2265_v31  ;;  %v2401_v9 = vmul.f32 1.442695, %v2268_v4 }
 0x245   : > { %6488 = vmatprep.subr.bf16.mxu0 %v6487_v59  ;;  %v722_v4 = vld [vmem:[%s8411_s21 + $0x18] sm:$0xff] }
 0x246   : > { %2193 = vmax.xlane.f32.xlu1 %v8321_v7  ;;  %v8373_v55 = vpop.xlane.xlu1 %2055  ;;  %2161 = vmax.xlane.f32.xlu0 %v8319_v45  ;;  %v8398_v63 = vpop.eup %6826  ;;  %6832 = vpow2.f32 %v2429_v62 }
 0x247   : > { %v8377_v49 = vpop.xlane.xlu0 %2023  ;;  %10556 = vst [vmem:[#allocation88_spill] sm:$0xff] %v8398_v63  ;;  %6834 = vpow2.f32 %v2397_v3  ;;  %v8435_v57 = vpop.eup %6828  ;;  %6490 = vmatpush3.bf16.msra.mxu0 %v6487_v59  ;;  %v2399_v59 = vmul.f32 1.442695, %v2267_v27  ;;  %v724_v27 = vld [vmem:[%s8411_s21 + $0x28] sm:$0xff] }
 0x248   : > { %6836 = vpow2.f32 %v2427_v5  ;;  %10560 = vst [vmem:[#allocation92_spill] sm:$0xff] %v8435_v57  ;;  %v2271_v7 = vsub.f32 %v8112_v18, %v8377_v49 }
 0x249   : > { %6838 = vpow2.f32 %v2395_v56  ;;  %v721_v56 = vld [vmem:[%s8411_s21 + $0x10] sm:$0xff] }
 0x24a   : > { %2191 = vmax.xlane.f32.xlu1 %v8327_v42  ;;  %v8381_v48 = vpop.xlane.xlu1 %2061  ;;  %2159 = vmax.xlane.f32.xlu0 %v8323_v28  ;;  %v6491_v41 = vpack.c.bf16 %v722_v4, %v721_v56  ;;  %6840 = vpow2.f32 %v2433_v8 }
 0x24b   : > { %v8385_v51 = vpop.xlane.xlu0 %2029  ;;  %6842 = vpow2.f32 %v2401_v9  ;;  %v723_v9 = vld [vmem:[%s8411_s21 + $0x20] sm:$0xff] }
 0x24c   : > { %6492 = vmatprep.subr.bf16.mxu0 %v6491_v41  ;;  %v2274_v47 = vsub.f32 %v8117_v20, %v8385_v51 }
 0x24d   : > { %6494 = vmatpush3.bf16.msra.mxu0 %v6491_v41 }
 0x24e   : > { %2197 = vmax.xlane.f32.xlu1 %v8333_v60  ;;  %v8389_v6 = vpop.xlane.xlu1 %2059  ;;  %2165 = vmax.xlane.f32.xlu0 %v8331_v43  ;;  %v2285_v60 = vsub.f32 %v8105_v15, %v8359_v25 }
 0x24f   : > { %v8394_v52 = vpop.xlane.xlu0 %2027 }
 0x252   : > { %2681 = vadd.xlane.f32.xlu1 %v8398_v63  ;;  %v8403_v30 = vpop.xlane.xlu1 %2065  ;;  %2649 = vadd.xlane.f32.xlu0 %v8396_v0  ;;  %v6523_v0 = vpack.c.bf16 %v738_v58, %v737_v11  ;;  %v8441_v63 = vpop.eup %6830  ;;  %v2270_v11 = vsub.f32 %v8097_v12, %v8355_v50  ;;  %v6495_v50 = vpack.c.bf16 %v724_v27, %v723_v9 }
 0x253   : > { %v8408_v53 = vpop.xlane.xlu0 %2033  ;;  %10562 = vst [vmem:[#allocation94_spill] sm:$0xff] %v8441_v63  ;;  %v8461_v58 = vpop.eup %6832  ;;  %v2288_v9 = vsub.f32 %v8110_v17, %v8366_v46 }
 0x254   : > { %6524 = vmatprep.subr.bf16.mxu1 %v6523_v0  ;;  %10566 = vst [vmem:[#allocation98_spill] sm:$0xff] %v8461_v58  ;;  %v2405_v41 = vmul.f32 1.442695, %v2270_v11  ;;  %6496 = vmatprep.subr.bf16.mxu0 %v6495_v50  ;;  %v741_v11 = vld [vmem:[%s8411_s21 + $0xb0] sm:$0xff] }
 0x255   : > { %v8417_v62 = vpop.f32.mrb[48].mxu0  ;;  %6526 = vmatpush3.bf16.msra.mxu1 %v6523_v0  ;;  %6498 = vmatpush3.bf16.msra.mxu0 %v6495_v50  ;;  %v725_v50 = vld [vmem:[%s8411_s21 + $0x30] sm:$0xff] }
 0x256   : > { %10557 = vst [vmem:[#allocation89_spill] sm:$0xff] %v8417_v62  ;;  %2195 = vmax.xlane.f32.xlu1 %v8341_v54  ;;  %v8422_v3 = vpop.xlane.xlu1 %2063  ;;  %2163 = vmax.xlane.f32.xlu0 %v8335_v26  ;;  %v8425_v31 = vpop.f32.mrb[48].mxu1  ;;  %v2431_v26 = vmul.f32 1.442695, %v2283_v40  ;;  %v2286_v54 = vsub.f32 %v8100_v13, %v8352_v24  ;;  %v739_v13 = vld [vmem:[%s8411_s21 + $0xa0] sm:$0xff]  ;;  %v740_v24 = vld [vmem:[%s8411_s21 + $0xa8] sm:$0xff] }
 0x257   : > { %10558 = vst [vmem:[#allocation90_spill] sm:$0xff] %v8425_v31  ;;  %v8429_v5 = vpop.xlane.xlu0 %2031  ;;  %v8431_v29 = vpop.f32.mrb[49].mxu1  ;;  %v6527_v4 = vpack.c.bf16 %v740_v24, %v739_v13  ;;  %v2269_v13 = vsub.f32 %v8102_v14, %v8363_v2  ;;  %v742_v14 = vld [vmem:[%s8411_s21 + $0xb8] sm:$0xff]  ;;  %v2435_v2 = vmul.f32 1.442695, %v2285_v60  ;;  %v2272_v60 = vsub.f32 %v8107_v16, %v8369_v39  ;;  %v743_v16 = vld [vmem:[%s8411_s21 + $0xc0] sm:$0xff] }
 0x258   : > { %10559 = vst [vmem:[#allocation91_spill] sm:$0xff] %v8431_v29  ;;  %v8437_v38 = vpop.f32.mrb[49].mxu0  ;;  %6844 = vpow2.f32 %v2431_v26  ;;  %v744_v39 = vld [vmem:[%s8411_s21 + $0xc8] sm:$0xff] }
 0x259   : > { %10561 = vst [vmem:[#allocation93_spill] sm:$0xff] %v8437_v38  ;;  %v8443_v10 = vpop.f32.mrb[50].mxu0  ;;  %6846 = vpow2.f32 %v2399_v59  ;;  %6528 = vmatprep.subr.bf16.mxu1 %v6527_v4  ;;  %v2403_v42 = vmul.f32 1.442695, %v2269_v13  ;;  %v6535_v45 = vpack.c.bf16 %v744_v39, %v743_v16  ;;  %v746_v39 = vld [vmem:[%s8411_s21 + $0xd8] sm:$0xff] }
 0x25a   : > { %10563 = vst [vmem:[#allocation95_spill] sm:$0xff] %v8443_v10  ;;  %2679 = vadd.xlane.f32.xlu1 %v8441_v63  ;;  %v8448_v43 = vpop.xlane.xlu1 %2069  ;;  %2647 = vadd.xlane.f32.xlu0 %v8435_v57  ;;  %v8451_v61 = vpop.f32.mrb[50].mxu1  ;;  %v2437_v63 = vmul.f32 1.442695, %v2286_v54 }
 0x25b   : > { %10564 = vst [vmem:[#allocation96_spill] sm:$0xff] %v8451_v61  ;;  %v8455_v8 = vpop.xlane.xlu0 %2037  ;;  %v8457_v40 = vpop.f32.mrb[51].mxu1  ;;  %6530 = vmatpush3.bf16.msra.mxu1 %v6527_v4  ;;  %v6531_v4 = vpack.c.bf16 %v742_v14, %v741_v11 }
 0x25c   : > { %10565 = vst [vmem:[#allocation97_spill] sm:$0xff] %v8457_v40  ;;  %v8463_v56 = vpop.f32.mrb[51].mxu0  ;;  %v8467_v57 = vpop.eup %6834  ;;  %6848 = vpow2.f32 %v2437_v63 }
 0x25d   : > { %10567 = vst [vmem:[#allocation99_spill] sm:$0xff] %v8463_v56  ;;  %10568 = vst [vmem:[#allocation100_spill] sm:$0xff] %v8467_v57  ;;  %v8469_v12 = vpop.f32.mrb[52].mxu0  ;;  %v8485_v15 = vpop.eup %6836  ;;  %6850 = vpow2.f32 %v2405_v41  ;;  %6532 = vmatprep.subr.bf16.mxu1 %v6531_v4 }
 0x25e   : > { %10569 = vst [vmem:[#allocation101_spill] sm:$0xff] %v8469_v12  ;;  %2685 = vadd.xlane.f32.xlu1 %v8461_v58  ;;  %v8474_v28 = vpop.xlane.xlu1 %2067  ;;  %2653 = vadd.xlane.f32.xlu0 %v8467_v57  ;;  %v8477_v0 = vpop.f32.mrb[52].mxu1  ;;  %10572 = vst [vmem:[#allocation104_spill] sm:$0xff] %v8485_v15  ;;  %v726_v58 = vld [vmem:[%s8411_s21 + $0x38] sm:$0xff]  ;;  %6852 = vpow2.f32 %v2435_v2 }
 0x25f   : > { %10570 = vst [vmem:[#allocation102_spill] sm:$0xff] %v8477_v0  ;;  %v8481_v26 = vpop.xlane.xlu0 %2035  ;;  %v8483_v54 = vpop.f32.mrb[53].mxu1  ;;  %v6499_v46 = vpack.c.bf16 %v726_v58, %v725_v50  ;;  %6534 = vmatpush3.bf16.msra.mxu1 %v6531_v4  ;;  %v2441_v58 = vmul.f32 1.442695, %v2288_v9  ;;  %v2287_v50 = vsub.f32 %v8115_v19, %v8373_v55  ;;  %6854 = vpow2.f32 %v2403_v42  ;;  %v727_v19 = vld [vmem:[%s8411_s21 + $0x40] sm:$0xff]  ;;  %v728_v55 = vld [vmem:[%s8411_s21 + $0x48] sm:$0xff] }
 0x260   : > { %10571 = vst [vmem:[#allocation103_spill] sm:$0xff] %v8483_v54  ;;  %v8487_v25 = vpop.f32.mrb[53].mxu0  ;;  %v8489_v24 = vpop.eup %6838  ;;  %v2409_v4 = vmul.f32 1.442695, %v2272_v60  ;;  %6536 = vmatprep.subr.bf16.mxu1 %v6535_v45  ;;  %v6503_v18 = vpack.c.bf16 %v728_v55, %v727_v19 }
 0x261   : > { %10573 = vst [vmem:[#allocation105_spill] sm:$0xff] %v8487_v25  ;;  %10574 = vst [vmem:[#allocation106_spill] sm:$0xff] %v8489_v24  ;;  %v8491_v59 = vpop.f32.mrb[54].mxu0  ;;  %6500 = vmatprep.subr.bf16.mxu0 %v6499_v46  ;;  %6856 = vpow2.f32 %v2441_v58  ;;  %v2439_v44 = vmul.f32 1.442695, %v2287_v50 }
 0x262   : > { %10575 = vst [vmem:[#allocation107_spill] sm:$0xff] %v8491_v59  ;;  %2683 = vadd.xlane.f32.xlu1 %v8485_v15  ;;  %2651 = vadd.xlane.f32.xlu0 %v8489_v24  ;;  %v8499_v27 = vpop.f32.mrb[54].mxu1  ;;  %v8501_v57 = vpop.f32.mrb[55].mxu0  ;;  %6858 = vpow2.f32 %v2409_v4 }
 0x263   : > { %10576 = vst [vmem:[#allocation108_spill] sm:$0xff] %v8499_v27  ;;  %10577 = vst [vmem:[#allocation109_spill] sm:$0xff] %v8501_v57  ;;  %v8507_v63 = vpop.xlane.xlu1 %2105  ;;  %v8509_v17 = vpop.xlane.xlu0 %2073  ;;  %6502 = vmatpush3.bf16.msra.mxu0 %v6499_v46  ;;  %6538 = vmatpush3.bf16.msra.mxu1 %v6535_v45  ;;  %v745_v46 = vld [vmem:[%s8411_s21 + $0xd0] sm:$0xff]  ;;  %v2407_v45 = vmul.f32 1.442695, %v2271_v7  ;;  %6860 = vpow2.f32 %v2439_v44  ;;  %v2273_v7 = vsub.f32 %v8122_v22, %v8394_v52 }
 0x264   : > { %v8511_v24 = vpop.eup %6840  ;;  %v8517_v14 = vpop.f32.mrb[55].mxu1  ;;  %v6539_v55 = vpack.c.bf16 %v746_v39, %v745_v46  ;;  %6504 = vmatprep.subr.bf16.mxu0 %v6503_v18  ;;  %v747_v39 = vld [vmem:[%s8411_s21 + $0xe0] sm:$0xff] }
 0x265   : > { %10578 = vst [vmem:[#allocation110_spill] sm:$0xff] %v8511_v24  ;;  %10579 = vst [vmem:[#allocation111_spill] sm:$0xff] %v8517_v14  ;;  %v8519_v41 = vpop.eup %6842  ;;  %v8521_v13 = vpop.f32.mrb[56].mxu0  ;;  %6862 = vpow2.f32 %v2407_v45 }
 0x266   : > { %10580 = vst [vmem:[#allocation112_spill] sm:$0xff] %v8519_v41  ;;  %10581 = vst [vmem:[#allocation113_spill] sm:$0xff] %v8521_v13  ;;  %2689 = vadd.xlane.f32.xlu1 %v8511_v24  ;;  %2657 = vadd.xlane.f32.xlu0 %v8519_v41  ;;  %v8529_v11 = vpop.f32.mrb[56].mxu1  ;;  %v8531_v15 = vpop.f32.mrb[57].mxu0  ;;  %v2290_v24 = vsub.f32 %v8120_v21, %v8381_v48  ;;  %v729_v21 = vld [vmem:[%s8411_s21 + $0x50] sm:$0xff]  ;;  %v730_v48 = vld [vmem:[%s8411_s21 + $0x58] sm:$0xff] }
 0x267   : > { %10582 = vst [vmem:[#allocation114_spill] sm:$0xff] %v8529_v11  ;;  %10583 = vst [vmem:[#allocation115_spill] sm:$0xff] %v8531_v15  ;;  %v8535_v2 = vpop.xlane.xlu1 %2103  ;;  %v8537_v9 = vpop.xlane.xlu0 %2071  ;;  %6506 = vmatpush3.bf16.msra.mxu0 %v6503_v18  ;;  %6540 = vmatprep.subr.bf16.mxu1 %v6539_v55  ;;  %v6507_v20 = vpack.c.bf16 %v730_v48, %v729_v21  ;;  %v6543_v48 = vpack.c.bf16 %v748_v1, %v747_v39 }
 0x268   : > { %10584 = vst [vmem:[#allocation116_spill] sm:$0xff] %v8537_v9  ;;  %v8541_v41 = vpop.eup %6844  ;;  %v8547_v60 = vpop.f32.mrb[57].mxu1  ;;  %6542 = vmatpush3.bf16.msra.mxu1 %v6539_v55  ;;  %v2445_v9 = vmul.f32 1.442695, %v2290_v24  ;;  %v2413_v55 = vmul.f32 1.442695, %v2274_v47 }
 0x269   : > { %10585 = vst [vmem:[#allocation117_spill] sm:$0xff] %v8541_v41  ;;  %10586 = vst [vmem:[#allocation118_spill] sm:$0xff] %v8547_v60  ;;  %v8549_v49 = vpop.eup %6846  ;;  %v8551_v16 = vpop.f32.mrb[58].mxu0  ;;  %6508 = vmatprep.subr.bf16.mxu0 %v6507_v20  ;;  %6544 = vmatprep.subr.bf16.mxu1 %v6543_v48  ;;  %v10610_v47 = vld [vmem:[#allocation19_spill] sm:$0xff] }
 0x26a   : > { %10587 = vst [vmem:[#allocation119_spill] sm:$0xff] %v8549_v49  ;;  %10588 = vst [vmem:[#allocation120_spill] sm:$0xff] %v8551_v16  ;;  %2687 = vadd.xlane.f32.xlu1 %v8541_v41  ;;  %2655 = vadd.xlane.f32.xlu0 %v8549_v49  ;;  %v8559_v42 = vpop.f32.mrb[58].mxu1  ;;  %v8561_v19 = vpop.f32.mrb[59].mxu0  ;;  %v2289_v41 = vsub.f32 %v8125_v23, %v8389_v6  ;;  %v731_v23 = vld [vmem:[%s8411_s21 + $0x60] sm:$0xff]  ;;  %v732_v6 = vld [vmem:[%s8411_s21 + $0x68] sm:$0xff]  ;;  %6864 = vpow2.f32 %v2445_v9 }
 0x26b   : > { %10589 = vst [vmem:[#allocation121_spill] sm:$0xff] %v8559_v42  ;;  %10590 = vst [vmem:[#allocation122_spill] sm:$0xff] %v8561_v19  ;;  %v8565_v58 = vpop.xlane.xlu1 %2109  ;;  %v8567_v50 = vpop.xlane.xlu0 %2077  ;;  %6510 = vmatpush3.bf16.msra.mxu0 %v6507_v20  ;;  %v6511_v22 = vpack.c.bf16 %v732_v6, %v731_v23  ;;  %6866 = vpow2.f32 %v2413_v55  ;;  %v734_v9 = vld [vmem:[%s8411_s21 + $0x78] sm:$0xff] }
 0x26c   : > { %10591 = vst [vmem:[#allocation123_spill] sm:$0xff] %v8565_v58  ;;  %10592 = vst [vmem:[#allocation124_spill] sm:$0xff] %v8567_v50  ;;  %v8571_v49 = vpop.eup %6848  ;;  %v8577_v4 = vpop.f32.mrb[59].mxu1  ;;  %6546 = vmatpush3.bf16.msra.mxu1 %v6543_v48  ;;  %v750_v58 = vld [vmem:[%s8411_s21 + $0xf8] sm:$0xff]  ;;  %v2443_v37 = vmul.f32 1.442695, %v2289_v41 }
 0x26d   : > { %10593 = vst [vmem:[#allocation125_spill] sm:$0xff] %v8571_v49  ;;  %10594 = vst [vmem:[#allocation126_spill] sm:$0xff] %v8577_v4  ;;  %v8579_v51 = vpop.eup %6850  ;;  %v8581_v46 = vpop.f32.mrb[60].mxu0  ;;  %v10607_v50 = vld [vmem:[#allocation20_spill] sm:$0xff]  ;;  %v6547_v6 = vpack.c.bf16 %v750_v58, %v749_v36  ;;  %v2411_v48 = vmul.f32 1.442695, %v2273_v7  ;;  %6512 = vmatprep.subr.bf16.mxu0 %v6511_v22 }
 0x26e   : > { %10595 = vst [vmem:[#allocation127_spill] sm:$0xff] %v8579_v51  ;;  %10596 = vst [vmem:[#allocation128_spill] sm:$0xff] %v8581_v46  ;;  %2693 = vadd.xlane.f32.xlu1 %v8571_v49  ;;  %2661 = vadd.xlane.f32.xlu0 %v8579_v51  ;;  %v8589_v18 = vpop.f32.mrb[60].mxu1  ;;  %v8591_v21 = vpop.f32.mrb[61].mxu0  ;;  %6868 = vpow2.f32 %v2443_v37  ;;  %v10618_v36 = vld [vmem:[#allocation21_spill] sm:$0xff]  ;;  %v10621_v37 = vld [vmem:[#allocation34_spill] sm:$0xff] }
 0x26f   : > { %10597 = vst [vmem:[#allocation129_spill] sm:$0xff] %v8589_v18  ;;  %10598 = vst [vmem:[#allocation130_spill] sm:$0xff] %v8591_v21  ;;  %v8595_v44 = vpop.xlane.xlu1 %2107  ;;  %v8597_v24 = vpop.xlane.xlu0 %2075  ;;  %6514 = vmatpush3.bf16.msra.mxu0 %v6511_v22  ;;  %6548 = vmatprep.subr.bf16.mxu1 %v6547_v6  ;;  %6870 = vpow2.f32 %v2411_v48 }
 0x270   : > { %10599 = vst [vmem:[#allocation131_spill] sm:$0xff] %v8595_v44  ;;  %10600 = vst [vmem:[#allocation132_spill] sm:$0xff] %v8597_v24  ;;  %v8601_v51 = vpop.eup %6852  ;;  %v8607_v45 = vpop.f32.mrb[61].mxu1  ;;  %v2292_v44 = vsub.f32 %v10607_v50, %v8403_v30  ;;  %v2276_v24 = vsub.f32 %v10610_v47, %v8408_v53  ;;  %v733_v30 = vld [vmem:[%s8411_s21 + $0x70] sm:$0xff]  ;;  %6550 = vmatpush3.bf16.msra.mxu1 %v6547_v6  ;;  %v10617_v47 = vld [vmem:[#allocation22_spill] sm:$0xff] }
 0x271   : > { %10601 = vst [vmem:[#allocation133_spill] sm:$0xff] %v8601_v51  ;;  %10604 = vst [vmem:[#allocation134_spill] sm:$0xff] %v8607_v45  ;;  %v8609_v52 = vpop.eup %6854  ;;  %v8611_v39 = vpop.f32.mrb[62].mxu0  ;;  %v6515_v53 = vpack.c.bf16 %v734_v9, %v733_v30  ;;  %v2291_v49 = vsub.f32 %v10617_v47, %v8422_v3  ;;  %v10622_v3 = vld [vmem:[#allocation33_spill] sm:$0xff] }
 0x272   : > { %10605 = vst [vmem:[#allocation135_spill] sm:$0xff] %v8609_v52  ;;  %10606 = vst [vmem:[#allocation136_spill] sm:$0xff] %v8611_v39  ;;  %2691 = vadd.xlane.f32.xlu1 %v8601_v51  ;;  %2659 = vadd.xlane.f32.xlu0 %v8609_v52  ;;  %v8619_v20 = vpop.f32.mrb[62].mxu1  ;;  %v8621_v23 = vpop.f32.mrb[63].mxu0  ;;  %v10613_v52 = vld [vmem:[#allocation32_spill] sm:$0xff] }
 0x273   : > { %10608 = vst [vmem:[#allocation20_spill] sm:$0xff] %v8619_v20  ;;  %10609 = vst [vmem:[#allocation137_spill] sm:$0xff] %v8621_v23  ;;  %v8625_v1 = vpop.xlane.xlu1 %2113  ;;  %v8627_v41 = vpop.xlane.xlu0 %2081  ;;  %v10614_v23 = vld [vmem:[#allocation31_spill] sm:$0xff]  ;;  %v2449_v55 = vmul.f32 1.442695, %v2292_v44  ;;  %6516 = vmatprep.subr.bf16.mxu0 %v6515_v53 }
 0x274   : > { %10611 = vst [vmem:[#allocation19_spill] sm:$0xff] %v8627_v41  ;;  %v8631_v50 = vpop.eup %6856  ;;  %v8637_v58 = vpop.f32.mrb[63].mxu1  ;;  %v2417_v51 = vmul.f32 1.442695, %v2276_v24  ;;  %v2275_v41 = vsub.f32 %v10618_v36, %v8429_v5  ;;  %6518 = vmatpush3.bf16.msra.mxu0 %v6515_v53  ;;  %v2447_v24 = vmul.f32 1.442695, %v2291_v49 }
 0x275   : > { %10612 = vst [vmem:[#allocation138_spill] sm:$0xff] %v8631_v50  ;;  %10615 = vst [vmem:[#allocation32_spill] sm:$0xff] %v8637_v58  ;;  %v8639_v7 = vpop.eup %6858  ;;  %6872 = vpow2.f32 %v2449_v55  ;;  %v10624_v5 = vld [vmem:[#allocation24_spill] sm:$0xff] }
 0x276   : > { %10616 = vst [vmem:[#allocation31_spill] sm:$0xff] %v8639_v7  ;;  %2697 = vadd.xlane.f32.xlu1 %v8631_v50  ;;  %2665 = vadd.xlane.f32.xlu0 %v8639_v7  ;;  %v8651_v6 = vpop.eup %6860  ;;  %v2294_v48 = vsub.f32 %v10624_v5, %v8448_v43  ;;  %6874 = vpow2.f32 %v2417_v51  ;;  %v2415_v36 = vmul.f32 1.442695, %v2275_v41  ;;  %v10625_v7 = vld [vmem:[#allocation23_spill] sm:$0xff]  ;;  %v10628_v49 = vld [vmem:[#allocation36_spill] sm:$0xff]  ;;  %v10631_v41 = vld [vmem:[#allocation26_spill] sm:$0xff] }
 0x277   : > { %v8647_v22 = vpop.xlane.xlu1 %2111  ;;  %v8649_v30 = vpop.xlane.xlu0 %2079  ;;  %10620 = vst [vmem:[#allocation21_spill] sm:$0xff] %v8651_v6  ;;  %v2278_v44 = vsub.f32 %v10625_v7, %v8455_v8  ;;  %v10629_v43 = vld [vmem:[#allocation35_spill] sm:$0xff]  ;;  %6876 = vpow2.f32 %v2447_v24  ;;  %v10632_v7 = vld [vmem:[#allocation25_spill] sm:$0xff]  ;;  %v10636_v24 = vld [vmem:[#allocation38_spill] sm:$0xff] }
 0x278   : > { %10619 = vst [vmem:[#allocation22_spill] sm:$0xff] %v8649_v30  ;;  %v8657_v47 = vpop.eup %6862  ;;  %v2453_v51 = vmul.f32 1.442695, %v2294_v48  ;;  %6878 = vpow2.f32 %v2415_v36  ;;  %v2277_v30 = vsub.f32 %v10632_v7, %v8481_v26  ;;  %v10642_v48 = vld [vmem:[#allocation40_spill] sm:$0xff] }
 0x279   : > { %10623 = vst [vmem:[#allocation34_spill] sm:$0xff] %v8657_v47  ;;  %v8669_v53 = vpop.eup %6864  ;;  %v2421_v8 = vmul.f32 1.442695, %v2278_v44 }
 0x27a   : > { %2695 = vadd.xlane.f32.xlu1 %v8651_v6  ;;  %2663 = vadd.xlane.f32.xlu0 %v8657_v47  ;;  %10627 = vst [vmem:[#allocation24_spill] sm:$0xff] %v8669_v53  ;;  %v8675_v6 = vpop.eup %6866  ;;  %v2293_v47 = vsub.f32 %v10631_v41, %v8474_v28  ;;  %v10637_v28 = vld [vmem:[#allocation37_spill] sm:$0xff]  ;;  %6880 = vpow2.f32 %v2453_v51  ;;  %v2419_v26 = vmul.f32 1.442695, %v2277_v30 }
 0x27b   : > { %v8665_v50 = vpop.xlane.xlu1 %2117  ;;  %v8667_v9 = vpop.xlane.xlu0 %2085  ;;  %10630 = vst [vmem:[#allocation23_spill] sm:$0xff] %v8675_v6  ;;  %6882 = vpow2.f32 %v2421_v8 }
 0x27c   : > { %10626 = vst [vmem:[#allocation33_spill] sm:$0xff] %v8665_v50  ;;  %v8687_v5 = vpop.eup %6868  ;;  %v2451_v36 = vmul.f32 1.442695, %v2293_v47 }
 0x27d   : > { %10635 = vst [vmem:[#allocation26_spill] sm:$0xff] %v8687_v5 }
 0x27e   : > { %2701 = vadd.xlane.f32.xlu1 %v8669_v53  ;;  %2669 = vadd.xlane.f32.xlu0 %v8675_v6  ;;  %v8693_v53 = vpop.eup %6870  ;;  %6884 = vpow2.f32 %v2451_v36 }
 0x27f   : > { %v8683_v55 = vpop.xlane.xlu1 %2115  ;;  %v8685_v50 = vpop.xlane.xlu0 %2083  ;;  %10638 = vst [vmem:[#allocation25_spill] sm:$0xff] %v8693_v53  ;;  %6886 = vpow2.f32 %v2419_v26 }
 0x280   : > { %10633 = vst [vmem:[#allocation36_spill] sm:$0xff] %v8683_v55  ;;  %10634 = vst [vmem:[#allocation35_spill] sm:$0xff] %v8685_v50  ;;  %v8701_v6 = vpop.eup %6872 }
 0x281   : > { %10641 = vst [vmem:[#allocation139_spill] sm:$0xff] %v8701_v6  ;;  %v8707_v51 = vpop.eup %6874 }
 0x282   : > { %2699 = vadd.xlane.f32.xlu1 %v8687_v5  ;;  %2667 = vadd.xlane.f32.xlu0 %v8693_v53  ;;  %10644 = vst [vmem:[#allocation40_spill] sm:$0xff] %v8707_v51  ;;  %v8715_v8 = vpop.eup %6876 }
 0x283   : > { %v8697_v44 = vpop.xlane.xlu1 %2121  ;;  %v8699_v7 = vpop.xlane.xlu0 %2089  ;;  %10647 = vst [vmem:[#allocation142_spill] sm:$0xff] %v8715_v8 }
 0x284   : > { %10639 = vst [vmem:[#allocation38_spill] sm:$0xff] %v8697_v44  ;;  %10640 = vst [vmem:[#allocation37_spill] sm:$0xff] %v8699_v7  ;;  %v8721_v7 = vpop.eup %6878 }
 0x285   : > { %10650 = vst [vmem:[#allocation143_spill] sm:$0xff] %v8721_v7 }
 0x286   : > { %2705 = vadd.xlane.f32.xlu1 %v8701_v6  ;;  %2673 = vadd.xlane.f32.xlu0 %v8707_v51  ;;  %v8729_v51 = vpop.eup %6880 }
 0x287   : > { %v8711_v30 = vpop.xlane.xlu1 %2119  ;;  %v8713_v47 = vpop.xlane.xlu0 %2087  ;;  %10653 = vst [vmem:[#allocation146_spill] sm:$0xff] %v8729_v51 }
 0x288   : > { %10645 = vst [vmem:[#allocation140_spill] sm:$0xff] %v8711_v30  ;;  %10646 = vst [vmem:[#allocation141_spill] sm:$0xff] %v8713_v47  ;;  %v8735_v53 = vpop.eup %6882  ;;  %v10659_v47 = vld [vmem:[#allocation46_spill] sm:$0xff] }
 0x289   : > { %10656 = vst [vmem:[#allocation147_spill] sm:$0xff] %v8735_v53 }
 0x28a   : > { %2703 = vadd.xlane.f32.xlu1 %v8715_v8  ;;  %2671 = vadd.xlane.f32.xlu0 %v8721_v7  ;;  %v8743_v8 = vpop.eup %6884 }
 0x28b   : > { %v8725_v36 = vpop.xlane.xlu1 %2125  ;;  %v8727_v26 = vpop.xlane.xlu0 %2093  ;;  %10658 = vst [vmem:[#allocation149_spill] sm:$0xff] %v8743_v8 }
 0x28c   : > { %10651 = vst [vmem:[#allocation144_spill] sm:$0xff] %v8725_v36  ;;  %10652 = vst [vmem:[#allocation145_spill] sm:$0xff] %v8727_v26  ;;  %v8749_v6 = vpop.eup %6886 }
 0x28d   : > { %10661 = vst [vmem:[#allocation46_spill] sm:$0xff] %v8749_v6 }
 0x28e   : > { %2709 = vadd.xlane.f32.xlu1 %v8729_v51  ;;  %2677 = vadd.xlane.f32.xlu0 %v8735_v53  ;;  %v10663_v51 = vld [vmem:[#allocation48_spill] sm:$0xff] }
 0x28f   : > { %v8739_v50 = vpop.xlane.xlu1 %2123  ;;  %v8741_v7 = vpop.xlane.xlu0 %2091 }
 0x290   : > { %10657 = vst [vmem:[#allocation148_spill] sm:$0xff] %v8741_v7 }
 0x292   : > { %2707 = vadd.xlane.f32.xlu1 %v8743_v8  ;;  %2675 = vadd.xlane.f32.xlu0 %v8749_v6  ;;  %v10666_v6 = vld [vmem:[#allocation50_spill] sm:$0xff] }
 0x293   : > { %v8753_v30 = vpop.xlane.xlu1 %2129  ;;  %v8755_v53 = vpop.xlane.xlu0 %2097 }
 0x294   : > { %10662 = vst [vmem:[#allocation150_spill] sm:$0xff] %v8755_v53 }
 0x296   : > { %2233 = vmax.xlane.f32.xlu1 %v8425_v31  ;;  %2201 = vmax.xlane.f32.xlu0 %v8417_v62  ;;  %v10669_v62 = vld [vmem:[#allocation52_spill] sm:$0xff] }
 0x297   : > { %v8763_v36 = vpop.xlane.xlu1 %2127  ;;  %v8765_v5 = vpop.xlane.xlu0 %2095 }
 0x298   : > { %10665 = vst [vmem:[#allocation48_spill] sm:$0xff] %v8765_v5 }
 0x29a   : > { %2231 = vmax.xlane.f32.xlu1 %v8431_v29  ;;  %2199 = vmax.xlane.f32.xlu0 %v8437_v38  ;;  %v10672_v38 = vld [vmem:[#allocation54_spill] sm:$0xff] }
 0x29b   : > { %v8773_v26 = vpop.xlane.xlu1 %2133  ;;  %v8775_v44 = vpop.xlane.xlu0 %2101 }
 0x29c   : > { %10668 = vst [vmem:[#allocation50_spill] sm:$0xff] %v8775_v44 }
 0x29e   : > { %2237 = vmax.xlane.f32.xlu1 %v8451_v61  ;;  %2205 = vmax.xlane.f32.xlu0 %v8443_v10  ;;  %v10675_v10 = vld [vmem:[#allocation56_spill] sm:$0xff] }
 0x29f   : > { %v8783_v8 = vpop.xlane.xlu1 %2131  ;;  %v8785_v41 = vpop.xlane.xlu0 %2099 }
 0x2a0   : > { %10671 = vst [vmem:[#allocation52_spill] sm:$0xff] %v8785_v41 }
 0x2a2   : > { %2235 = vmax.xlane.f32.xlu1 %v8457_v40  ;;  %2203 = vmax.xlane.f32.xlu0 %v8463_v56  ;;  %v10678_v56 = vld [vmem:[#allocation58_spill] sm:$0xff] }
 0x2a3   : > { %v8793_v31 = vpop.xlane.xlu1 %2169  ;;  %v8795_v55 = vpop.xlane.xlu0 %2137 }
 0x2a4   : > { %10674 = vst [vmem:[#allocation54_spill] sm:$0xff] %v8795_v55 }
 0x2a6   : > { %2241 = vmax.xlane.f32.xlu1 %v8477_v0  ;;  %2209 = vmax.xlane.f32.xlu0 %v8469_v12  ;;  %v10681_v12 = vld [vmem:[#allocation60_spill] sm:$0xff] }
 0x2a7   : > { %v8803_v29 = vpop.xlane.xlu1 %2167  ;;  %v8805_v7 = vpop.xlane.xlu0 %2135 }
 0x2a8   : > { %10677 = vst [vmem:[#allocation56_spill] sm:$0xff] %v8805_v7 }
 0x2aa   : > { %2239 = vmax.xlane.f32.xlu1 %v8483_v54  ;;  %2207 = vmax.xlane.f32.xlu0 %v8487_v25  ;;  %v10684_v25 = vld [vmem:[#allocation62_spill] sm:$0xff] }
 0x2ab   : > { %v8813_v61 = vpop.xlane.xlu1 %2173  ;;  %v8815_v53 = vpop.xlane.xlu0 %2141 }
 0x2ac   : > { %10680 = vst [vmem:[#allocation58_spill] sm:$0xff] %v8815_v53  ;;  %v10701_v53 = vsub.f32 %v8163_v32, %v8509_v17  ;;  %v10711_v17 = vld [vmem:[#allocation76_spill] sm:$0xff] }
 0x2ae   : > { %2245 = vmax.xlane.f32.xlu1 %v8499_v27  ;;  %2213 = vmax.xlane.f32.xlu0 %v8491_v59  ;;  %v10687_v59 = vld [vmem:[#allocation64_spill] sm:$0xff] }
 0x2af   : > { %v8823_v40 = vpop.xlane.xlu1 %2171  ;;  %v8825_v5 = vpop.xlane.xlu0 %2139 }
 0x2b0   : > { %10683 = vst [vmem:[#allocation60_spill] sm:$0xff] %v8825_v5  ;;  %v10703_v5 = vld [vmem:[#allocation71_spill] sm:$0xff] }
 0x2b2   : > { %2243 = vmax.xlane.f32.xlu1 %v8517_v14  ;;  %2211 = vmax.xlane.f32.xlu0 %v8501_v57  ;;  %v10690_v57 = vld [vmem:[#allocation66_spill] sm:$0xff] }
 0x2b3   : > { %v8833_v0 = vpop.xlane.xlu1 %2177  ;;  %v8835_v44 = vpop.xlane.xlu0 %2145 }
 0x2b4   : > { %10686 = vst [vmem:[#allocation62_spill] sm:$0xff] %v8835_v44  ;;  %v10695_v44 = vld [vmem:[#allocation67_spill] sm:$0xff] }
 0x2b6   : > { %2249 = vmax.xlane.f32.xlu1 %v8529_v11  ;;  %2217 = vmax.xlane.f32.xlu0 %v8521_v13  ;;  %v10694_v13 = vld [vmem:[#allocation68_spill] sm:$0xff]  ;;  %v10700_v11 = vsub.f32 %v8165_v33, %v8507_v63  ;;  %v10705_v63 = vld [vmem:[#allocation74_spill] sm:$0xff] }
 0x2b7   : > { %v8843_v54 = vpop.xlane.xlu1 %2175  ;;  %v8845_v41 = vpop.xlane.xlu0 %2143 }
 0x2b8   : > { %10689 = vst [vmem:[#allocation64_spill] sm:$0xff] %v8845_v41  ;;  %v10699_v41 = vld [vmem:[#allocation69_spill] sm:$0xff] }
 0x2ba   : > { %2247 = vmax.xlane.f32.xlu1 %v8547_v60  ;;  %2215 = vmax.xlane.f32.xlu0 %v8531_v15  ;;  %v10698_v15 = vld [vmem:[#allocation70_spill] sm:$0xff]  ;;  %v10702_v60 = vld [vmem:[#allocation72_spill] sm:$0xff] }
 0x2bb   : > { %v8853_v27 = vpop.xlane.xlu1 %2181  ;;  %v8855_v55 = vpop.xlane.xlu0 %2149 }
 0x2bc   : > { %10692 = vst [vmem:[#allocation66_spill] sm:$0xff] %v8853_v27  ;;  %10693 = vst [vmem:[#allocation151_spill] sm:$0xff] %v8855_v55  ;;  %v2489_v27 = vmul.f32 1.442695, %v10700_v11 }
 0x2be   : > { %2253 = vmax.xlane.f32.xlu1 %v8559_v42  ;;  %2221 = vmax.xlane.f32.xlu0 %v8551_v16  ;;  %v2457_v16 = vmul.f32 1.442695, %v10701_v53  ;;  %6888 = vpow2.f32 %v2489_v27  ;;  %v10708_v27 = vld [vmem:[#allocation116_spill] sm:$0xff]  ;;  %v10712_v53 = vld [vmem:[#allocation75_spill] sm:$0xff] }
 0x2bf   : > { %v8863_v14 = vpop.xlane.xlu1 %2179  ;;  %v8865_v7 = vpop.xlane.xlu0 %2147 }
 0x2c0   : > { %10696 = vst [vmem:[#allocation68_spill] sm:$0xff] %v8863_v14  ;;  %10697 = vst [vmem:[#allocation67_spill] sm:$0xff] %v8865_v7  ;;  %6890 = vpow2.f32 %v2457_v16  ;;  %v10707_v14 = vsub.f32 %v8169_v35, %v8535_v2  ;;  %v10709_v16 = vsub.f32 %v8167_v34, %v10708_v27  ;;  %v10713_v35 = vld [vmem:[#allocation28_spill] sm:$0xff]  ;;  %v10716_v34 = vld [vmem:[#allocation27_spill] sm:$0xff] }
 0x2c1   : > { %v10717_v27 = vld [vmem:[#allocation124_spill] sm:$0xff] }
 0x2c2   : > { %2251 = vmax.xlane.f32.xlu1 %v8577_v4  ;;  %2219 = vmax.xlane.f32.xlu0 %v8561_v19  ;;  %v2487_v7 = vmul.f32 1.442695, %v10707_v14  ;;  %v10714_v14 = vld [vmem:[#allocation123_spill] sm:$0xff] }
 0x2c3   : > { %v8879_v42 = vpop.xlane.xlu1 %2185  ;;  %v8881_v55 = vpop.xlane.xlu0 %2153  ;;  %v10715_v2 = vsub.f32 %v10713_v35, %v10714_v14 }
 0x2c4   : > { %6892 = vpow2.f32 %v2487_v7 }
 0x2c6   : > { %2257 = vmax.xlane.f32.xlu1 %v8589_v18  ;;  %2225 = vmax.xlane.f32.xlu0 %v8581_v46  ;;  %v2455_v46 = vmul.f32 1.442695, %v10709_v16  ;;  %v10718_v16 = vsub.f32 %v10716_v34, %v10717_v27  ;;  %v10726_v34 = vld [vmem:[#allocation131_spill] sm:$0xff] }
 0x2c7   : > { %v8889_v33 = vpop.xlane.xlu1 %2183  ;;  %v8891_v32 = vpop.xlane.xlu0 %2151 }
 0x2c8   : > { %10704 = vst [vmem:[#allocation70_spill] sm:$0xff] %v8891_v32  ;;  %6894 = vpow2.f32 %v2455_v46  ;;  %v8925_v7 = vpop.eup %6888  ;;  %v10725_v46 = vld [vmem:[#allocation30_spill] sm:$0xff] }
 0x2c9   : > { %10721 = vst [vmem:[#allocation74_spill] sm:$0xff] %v8925_v7  ;;  %v10727_v27 = vsub.f32 %v10725_v46, %v10726_v34 }
 0x2ca   : > { %2255 = vmax.xlane.f32.xlu1 %v8607_v45  ;;  %2223 = vmax.xlane.f32.xlu0 %v8591_v21  ;;  %v2493_v45 = vmul.f32 1.442695, %v10715_v2  ;;  %v2461_v21 = vmul.f32 1.442695, %v10718_v16  ;;  %v752_v2 = vld [vmem:[%s8411_s21 + $0x108] sm:$0xff] }
 0x2cb   : > { %v8905_v18 = vpop.xlane.xlu1 %2189  ;;  %v8907_v19 = vpop.xlane.xlu0 %2157  ;;  %v2491_v16 = vmul.f32 1.442695, %v10727_v27  ;;  %v767_v27 = vld [vmem:[%s8411_s21 + $0x180] sm:$0xff] }
 0x2cc   : > { %10710 = vst [vmem:[#allocation69_spill] sm:$0xff] %v8907_v19  ;;  %6896 = vpow2.f32 %v2493_v45  ;;  %v10729_v19 = vld [vmem:[#allocation132_spill] sm:$0xff] }
 0x2cd   : > { %6898 = vpow2.f32 %v2461_v21  ;;  %v10733_v45 = vld [vmem:[#allocation80_spill] sm:$0xff]  ;;  %v10735_v21 = vsub.f32 %v10613_v52, %v8625_v1  ;;  %v10740_v52 = vld [vmem:[#allocation82_spill] sm:$0xff] }
 0x2ce   : > { %2261 = vmax.xlane.f32.xlu1 %v8619_v20  ;;  %2229 = vmax.xlane.f32.xlu0 %v8611_v39  ;;  %v8931_v39 = vpop.eup %6890  ;;  %v10728_v20 = vld [vmem:[#allocation29_spill] sm:$0xff]  ;;  %6900 = vpow2.f32 %v2491_v16 }
 0x2cf   : > { %v8921_v11 = vpop.xlane.xlu1 %2187  ;;  %v8923_v4 = vpop.xlane.xlu0 %2155  ;;  %10724 = vst [vmem:[#allocation116_spill] sm:$0xff] %v8931_v39  ;;  %v10730_v14 = vsub.f32 %v10728_v20, %v10729_v19  ;;  %v10736_v19 = vld [vmem:[#allocation137_spill] sm:$0xff] }
 0x2d0   : > { %10719 = vst [vmem:[#allocation72_spill] sm:$0xff] %v8921_v11  ;;  %10720 = vst [vmem:[#allocation71_spill] sm:$0xff] %v8923_v4  ;;  %v10737_v4 = vld [vmem:[#allocation19_spill] sm:$0xff]  ;;  %v8969_v1 = vpop.eup %6892 }
 0x2d1   : > { %v2459_v11 = vmul.f32 1.442695, %v10730_v14  ;;  %v751_v14 = vld [vmem:[%s8411_s21 + $0x100] sm:$0xff]  ;;  %10739 = vst [vmem:[#allocation28_spill] sm:$0xff] %v8969_v1 }
 0x2d2   : > { %2745 = vadd.xlane.f32.xlu1 %v8925_v7  ;;  %2713 = vadd.xlane.f32.xlu0 %v8931_v39  ;;  %v768_v7 = vld [vmem:[%s8411_s21 + $0x188] sm:$0xff]  ;;  %v2497_v39 = vmul.f32 1.442695, %v10735_v21  ;;  %v8967_v46 = vpack.c.bf16 %v752_v2, %v751_v14 }
 0x2d3   : > { %v8941_v35 = vpop.xlane.xlu1 %2193  ;;  %v8943_v32 = vpop.xlane.xlu0 %2161  ;;  %v8956_v20 = vpack.c.bf16 %v768_v7, %v767_v27  ;;  %6902 = vpow2.f32 %v2459_v11  ;;  %v10741_v7 = vld [vmem:[#allocation81_spill] sm:$0xff] }
 0x2d4   : > { %10731 = vst [vmem:[#allocation76_spill] sm:$0xff] %v8941_v35  ;;  %10732 = vst [vmem:[#allocation75_spill] sm:$0xff] %v8943_v32  ;;  %v10738_v35 = vsub.f32 %v10614_v23, %v10737_v4  ;;  %v8976_v11 = vpop.eup %6894  ;;  %6552 = vmatprep.subr.bf16.mxu0 %v8967_v46  ;;  %6904 = vpow2.f32 %v2497_v39  ;;  %v10743_v4 = vsub.f32 %v10621_v37, %v8647_v22  ;;  %v10748_v39 = vld [vmem:[#allocation33_spill] sm:$0xff]  ;;  %v10750_v37 = vld [vmem:[#allocation84_spill] sm:$0xff] }
 0x2d5   : > { %6584 = vmatprep.subr.bf16.mxu1 %v8956_v20  ;;  %10742 = vst [vmem:[#allocation123_spill] sm:$0xff] %v8976_v11 }
 0x2d6   : > { %2259 = vmax.xlane.f32.xlu1 %v8637_v58  ;;  %2227 = vmax.xlane.f32.xlu0 %v10736_v19  ;;  %v2465_v34 = vmul.f32 1.442695, %v10738_v35  ;;  %v2495_v23 = vmul.f32 1.442695, %v10743_v4  ;;  %v10744_v35 = vld [vmem:[#allocation22_spill] sm:$0xff]  ;;  %v8991_v19 = vpop.eup %6896  ;;  %v10749_v58 = vsub.f32 %v10628_v49, %v10748_v39 }
 0x2d7   : > { %v8963_v32 = vpop.xlane.xlu1 %2191  ;;  %v8965_v16 = vpop.xlane.xlu0 %2159  ;;  %v10745_v2 = vsub.f32 %v10622_v3, %v10744_v35  ;;  %10747 = vst [vmem:[#allocation124_spill] sm:$0xff] %v8991_v19  ;;  %v10753_v3 = vsub.f32 %v10629_v43, %v8667_v9  ;;  %v10758_v9 = vld [vmem:[#allocation35_spill] sm:$0xff] }
 0x2d8   : > { %6906 = vpow2.f32 %v2465_v34  ;;  %v2501_v22 = vmul.f32 1.442695, %v10749_v58  ;;  %v10756_v34 = vld [vmem:[#allocation36_spill] sm:$0xff]  ;;  %v10759_v43 = vsub.f32 %v10637_v28, %v10758_v9 }
 0x2d9   : > { %v2463_v14 = vmul.f32 1.442695, %v10745_v2  ;;  %v2469_v35 = vmul.f32 1.442695, %v10753_v3  ;;  %6908 = vpow2.f32 %v2495_v23  ;;  %v10757_v4 = vsub.f32 %v10636_v24, %v10756_v34  ;;  %v10766_v34 = vld [vmem:[#allocation37_spill] sm:$0xff] }
 0x2da   : > { %2743 = vadd.xlane.f32.xlu1 %v8969_v1  ;;  %2711 = vadd.xlane.f32.xlu0 %v8976_v11  ;;  %v9000_v1 = vpop.eup %6898  ;;  %v2467_v23 = vmul.f32 1.442695, %v10759_v43 }
 0x2db   : > { %v8987_v27 = vpop.xlane.xlu1 %2197  ;;  %v8989_v21 = vpop.xlane.xlu0 %2165  ;;  %10752 = vst [vmem:[#allocation30_spill] sm:$0xff] %v9000_v1  ;;  %6910 = vpow2.f32 %v2463_v14  ;;  %v10760_v14 = vld [vmem:[#allocation38_spill] sm:$0xff] }
 0x2dc   : > { %10746 = vst [vmem:[#allocation27_spill] sm:$0xff] %v8989_v21  ;;  %v9007_v2 = vpop.eup %6900  ;;  %6912 = vpow2.f32 %v2501_v22  ;;  %v2499_v21 = vmul.f32 1.442695, %v10757_v4  ;;  %v10761_v3 = vsub.f32 %v10642_v48, %v10760_v14  ;;  %v10765_v4 = vld [vmem:[#allocation39_spill] sm:$0xff]  ;;  %v10771_v48 = vld [vmem:[#allocation42_spill] sm:$0xff] }
 0x2dd   : > { %10754 = vst [vmem:[#allocation131_spill] sm:$0xff] %v9007_v2  ;;  %v9009_v39 = vpop.eup %6902  ;;  %6914 = vpow2.f32 %v2469_v35  ;;  %v10767_v28 = vsub.f32 %v10765_v4, %v10766_v34 }
 0x2de   : > { %2749 = vadd.xlane.f32.xlu1 %v8991_v19  ;;  %2717 = vadd.xlane.f32.xlu0 %v9000_v1  ;;  %10755 = vst [vmem:[#allocation29_spill] sm:$0xff] %v9009_v39  ;;  %v2505_v22 = vmul.f32 1.442695, %v10761_v3  ;;  %v9026_v24 = vpop.eup %6904 }
 0x2df   : > { %v2682_v49 = vpop.xlane.xlu1 %2681  ;;  %v2650_v58 = vpop.xlane.xlu0 %2649  ;;  %10764 = vst [vmem:[#allocation19_spill] sm:$0xff] %v9026_v24  ;;  %v2473_v9 = vmul.f32 1.442695, %v10767_v28 }
 0x2e0   : > { %6916 = vrcp.f32 %v2682_v49  ;;  %v10799_v49 = vld [vmem:[#allocation150_spill] sm:$0xff] }
 0x2e1   : > { %6918 = vrcp.f32 %v2650_v58  ;;  %v10772_v58 = vld [vmem:[#allocation140_spill] sm:$0xff] }
 0x2e2   : > { %2747 = vadd.xlane.f32.xlu1 %v9007_v2  ;;  %2715 = vadd.xlane.f32.xlu0 %v9009_v39  ;;  %v9035_v19 = vpop.eup %6906  ;;  %6920 = vpow2.f32 %v2499_v21  ;;  %v10773_v14 = vsub.f32 %v10771_v48, %v10772_v58  ;;  %v10777_v21 = vld [vmem:[#allocation41_spill] sm:$0xff] }
 0x2e3   : > { %v9022_v1 = vpop.xlane.xlu1 %2195  ;;  %v9024_v35 = vpop.xlane.xlu0 %2163  ;;  %10770 = vst [vmem:[#allocation82_spill] sm:$0xff] %v9035_v19  ;;  %6922 = vpow2.f32 %v2467_v23 }
 0x2e4   : > { %10762 = vst [vmem:[#allocation132_spill] sm:$0xff] %v9022_v1  ;;  %10763 = vst [vmem:[#allocation80_spill] sm:$0xff] %v9024_v35  ;;  %v2503_v3 = vmul.f32 1.442695, %v10773_v14  ;;  %6924 = vpow2.f32 %v2505_v22  ;;  %v9042_v28 = vpop.eup %6908  ;;  %v10778_v35 = vld [vmem:[#allocation141_spill] sm:$0xff]  ;;  %v10781_v22 = vld [vmem:[#allocation44_spill] sm:$0xff] }
 0x2e5   : > { %10774 = vst [vmem:[#allocation81_spill] sm:$0xff] %v9042_v28  ;;  %6926 = vpow2.f32 %v2473_v9  ;;  %v9044_v43 = vpop.eup %6910  ;;  %v10779_v48 = vsub.f32 %v10777_v21, %v10778_v35  ;;  %v10782_v14 = vld [vmem:[#allocation144_spill] sm:$0xff]  ;;  %v10785_v21 = vld [vmem:[#allocation43_spill] sm:$0xff] }
 0x2e6   : > { %2753 = vadd.xlane.f32.xlu1 %v9026_v24  ;;  %2721 = vadd.xlane.f32.xlu0 %v9035_v19  ;;  %10775 = vst [vmem:[#allocation22_spill] sm:$0xff] %v9044_v43  ;;  %6928 = vpow2.f32 %v2503_v3  ;;  %v9046_v2 = vpop.eup %6912  ;;  %v10783_v19 = vsub.f32 %v10781_v22, %v10782_v14  ;;  %v10784_v35 = vld [vmem:[#allocation88_spill] sm:$0xff] }
 0x2e7   : > { %v2680_v4 = vpop.xlane.xlu1 %2679  ;;  %v2648_v34 = vpop.xlane.xlu0 %2647  ;;  %10776 = vst [vmem:[#allocation33_spill] sm:$0xff] %v9046_v2  ;;  %v2471_v58 = vmul.f32 1.442695, %v10779_v48  ;;  %v10786_v48 = vld [vmem:[#allocation145_spill] sm:$0xff] }
 0x2e8   : > { %6930 = vrcp.f32 %v2680_v4  ;;  %v9053_v23 = vpop.eup %6914  ;;  %v2509_v9 = vmul.f32 1.442695, %v10783_v19  ;;  %v10788_v19 = vld [vmem:[#allocation87_spill] sm:$0xff] }
 0x2e9   : > { %10780 = vst [vmem:[#allocation84_spill] sm:$0xff] %v9053_v23  ;;  %6932 = vrcp.f32 %v2648_v34 }
 0x2ea   : > { %2751 = vadd.xlane.f32.xlu1 %v9042_v28  ;;  %2719 = vadd.xlane.f32.xlu0 %v9044_v43  ;;  %v6917_v39 = vpop.eup %6916  ;;  %v10787_v43 = vsub.f32 %v10785_v21, %v10786_v48  ;;  %v10796_v48 = vsub.f32 %v10663_v51, %v8753_v30  ;;  %v10801_v30 = vld [vmem:[#allocation92_spill] sm:$0xff] }
 0x2eb   : > { %v2686_v24 = vpop.xlane.xlu1 %2685  ;;  %v2654_v3 = vpop.xlane.xlu0 %2653  ;;  %v3048_v4 = vmul.f32 %v6917_v39, %v10784_v35 }
 0x2ec   : > { %6934 = vrcp.f32 %v2686_v24  ;;  %v6919_v1 = vpop.eup %6918  ;;  %v2477_v28 = vmul.f32 1.442695, %v10787_v43  ;;  %v10790_v24 = vsub.f32 %v10659_v47, %v8739_v50  ;;  %v10793_v50 = vld [vmem:[#allocation45_spill] sm:$0xff]  ;;  %v10794_v47 = vld [vmem:[#allocation148_spill] sm:$0xff] }
 0x2ed   : > { %6936 = vrcp.f32 %v2654_v3  ;;  %v3032_v34 = vmul.f32 %v6919_v1, %v10788_v19  ;;  %v9065_v22 = vpop.eup %6920  ;;  %4464 = vst [vmem:[%s9071_s27 + $0x88] sm:$0xff] %v3048_v4  ;;  %v2513_v19 = vmul.f32 1.442695, %v10796_v48 }
 0x2ee   : > { %6938 = vpow2.f32 %v2471_v58  ;;  %2757 = vadd.xlane.f32.xlu1 %v9046_v2  ;;  %2725 = vadd.xlane.f32.xlu0 %v9053_v23  ;;  %10789 = vst [vmem:[#allocation36_spill] sm:$0xff] %v9065_v22  ;;  %v2507_v14 = vmul.f32 1.442695, %v10790_v24  ;;  %v9074_v43 = vpop.eup %6922  ;;  %v753_v23 = vld [vmem:[%s8411_s21 + $0x110] sm:$0xff] }
 0x2ef   : > { %6940 = vpow2.f32 %v2509_v9  ;;  %v2684_v3 = vpop.xlane.xlu1 %2683  ;;  %v2652_v39 = vpop.xlane.xlu0 %2651  ;;  %10791 = vst [vmem:[#allocation35_spill] sm:$0xff] %v9074_v43  ;;  %4448 = vst [vmem:[%s9071_s27 + $0x8] sm:$0xff] %v3032_v34  ;;  %v10795_v9 = vsub.f32 %v10793_v50, %v10794_v47  ;;  %v770_v50 = vld [vmem:[%s8411_s21 + $0x198] sm:$0xff] }
 0x2f0   : > { %6942 = vrcp.f32 %v2684_v3  ;;  %v9077_v1 = vpop.eup %6924 }
 0x2f1   : > { %10792 = vst [vmem:[#allocation38_spill] sm:$0xff] %v9077_v1  ;;  %6944 = vrcp.f32 %v2652_v39  ;;  %v9079_v58 = vpop.eup %6926  ;;  %v2475_v35 = vmul.f32 1.442695, %v10795_v9  ;;  %v769_v39 = vld [vmem:[%s8411_s21 + $0x190] sm:$0xff]  ;;  %v10797_v9 = vld [vmem:[#allocation94_spill] sm:$0xff] }
 0x2f2   : > { %6946 = vpow2.f32 %v2477_v28  ;;  %2755 = vadd.xlane.f32.xlu1 %v9065_v22  ;;  %2723 = vadd.xlane.f32.xlu0 %v9074_v43  ;;  %v9086_v21 = vpop.eup %6928  ;;  %v754_v43 = vld [vmem:[%s8411_s21 + $0x118] sm:$0xff] }
 0x2f3   : > { %6948 = vpow2.f32 %v2507_v14  ;;  %v2690_v24 = vpop.xlane.xlu1 %2689  ;;  %v2658_v3 = vpop.xlane.xlu0 %2657  ;;  %v10798_v14 = vld [vmem:[#allocation47_spill] sm:$0xff] }
 0x2f4   : > { %v6931_v28 = vpop.eup %6930  ;;  %6950 = vrcp.f32 %v2690_v24  ;;  %v10800_v11 = vsub.f32 %v10798_v14, %v10799_v49  ;;  %v6587_v14 = vpack.c.bf16 %v770_v50, %v769_v39  ;;  %v10806_v50 = vld [vmem:[#allocation49_spill] sm:$0xff] }
 0x2f5   : > { %v6933_v47 = vpop.eup %6932  ;;  %6952 = vrcp.f32 %v2658_v3  ;;  %v3047_v22 = vmul.f32 %v6931_v28, %v10797_v9  ;;  %v10802_v3 = vsub.f32 %v10666_v6, %v8763_v36  ;;  %v10803_v9 = vld [vmem:[#allocation98_spill] sm:$0xff]  ;;  %v6555_v36 = vpack.c.bf16 %v754_v43, %v753_v23  ;;  %v772_v23 = vld [vmem:[%s8411_s21 + $0x1a8] sm:$0xff] }
 0x2f6   : > { %v6935_v2 = vpop.eup %6934  ;;  %6954 = vpow2.f32 %v2475_v35  ;;  %v2481_v51 = vmul.f32 1.442695, %v10800_v11  ;;  %2761 = vadd.xlane.f32.xlu1 %v9077_v1  ;;  %v3031_v48 = vmul.f32 %v6933_v47, %v10801_v30  ;;  %2729 = vadd.xlane.f32.xlu0 %v9079_v58  ;;  %v10807_v47 = vld [vmem:[#allocation48_spill] sm:$0xff] }
 0x2f7   : > { %v6937_v24 = vpop.eup %6936  ;;  %6956 = vpow2.f32 %v2513_v19  ;;  %v2511_v28 = vmul.f32 1.442695, %v10802_v3  ;;  %5871 = vmatprep.mubr.f32.mxu1 %v3047_v22  ;;  %4463 = vst [vmem:[%s9071_s27 + $0x80] sm:$0xff] %v3047_v22  ;;  %v2688_v35 = vpop.xlane.xlu1 %2687  ;;  %v3050_v11 = vmul.f32 %v6935_v2, %v10803_v9  ;;  %v10805_v19 = vld [vmem:[#allocation100_spill] sm:$0xff]  ;;  %v771_v2 = vld [vmem:[%s8411_s21 + $0x1a0] sm:$0xff] }
 0x2f8   : > { %v2656_v49 = vpop.xlane.xlu0 %2655  ;;  %v9107_v1 = vpop.eup %6938  ;;  %5815 = vmatprep.mubr.f32.mxu0 %v3031_v48  ;;  %4447 = vst [vmem:[%s9071_s27] sm:$0xff] %v3031_v48  ;;  %5872 = vmatmul.mubr.f32.vlgmr.msra.gmra.mrb[64].mxu1 %v3048_v4  ;;  %6958 = vrcp.f32 %v2688_v35  ;;  %v3034_v6 = vmul.f32 %v6937_v24, %v10805_v19  ;;  %v10808_v4 = vsub.f32 %v10806_v50, %v10807_v47  ;;  %v756_v43 = vld [vmem:[%s8411_s21 + $0x128] sm:$0xff]  ;;  %v10811_v19 = vld [vmem:[#allocation106_spill] sm:$0xff] }
 0x2f9   : > { %10804 = vst [vmem:[#allocation39_spill] sm:$0xff] %v9107_v1  ;;  %v9111_v22 = vpop.eup %6940  ;;  %5816 = vmatmul.mubr.f32.vlgmr.msra.gmra.mrb[64].mxu0 %v3032_v34  ;;  %6960 = vrcp.f32 %v2656_v49  ;;  %4466 = vst [vmem:[%s9071_s27 + $0x98] sm:$0xff] %v3050_v11  ;;  %6586 = vmatpush3.bf16.msra.mxu1 %v8956_v20  ;;  %v755_v34 = vld [vmem:[%s8411_s21 + $0x120] sm:$0xff]  ;;  %v10809_v20 = vsub.f32 %v10669_v62, %v8773_v26  ;;  %v10810_v35 = vld [vmem:[#allocation104_spill] sm:$0xff] }
 0x2fa   : > { %v6943_v39 = vpop.eup %6942  ;;  %6962 = vpow2.f32 %v2481_v51  ;;  %v2479_v30 = vmul.f32 1.442695, %v10808_v4  ;;  %2759 = vadd.xlane.f32.xlu1 %v9086_v21  ;;  %2727 = vadd.xlane.f32.xlu0 %v9107_v1  ;;  %4450 = vst [vmem:[%s9071_s27 + $0x18] sm:$0xff] %v3034_v6  ;;  %v774_v62 = vld [vmem:[%s8411_s21 + $0x1b8] sm:$0xff]  ;;  %v10812_v4 = vld [vmem:[#allocation51_spill] sm:$0xff] }
 0x2fb   : > { %v6945_v48 = vpop.eup %6944  ;;  %6964 = vpow2.f32 %v2511_v28  ;;  %v2517_v51 = vmul.f32 1.442695, %v10809_v20  ;;  %v2694_v24 = vpop.xlane.xlu1 %2693  ;;  %v3049_v49 = vmul.f32 %v6943_v39, %v10810_v35  ;;  %6554 = vmatpush3.bf16.msra.mxu0 %v8967_v46  ;;  %6588 = vmatprep.subr.bf16.mxu1 %v6587_v14  ;;  %v773_v28 = vld [vmem:[%s8411_s21 + $0x1b0] sm:$0xff]  ;;  %v6591_v39 = vpack.c.bf16 %v772_v23, %v771_v2  ;;  %v10813_v20 = vld [vmem:[#allocation50_spill] sm:$0xff] }
 0x2fc   : > { %v2662_v3 = vpop.xlane.xlu0 %2661  ;;  %v9130_v9 = vpop.eup %6946  ;;  %6966 = vrcp.f32 %v2694_v24  ;;  %v3033_v50 = vmul.f32 %v6945_v48, %v10811_v19  ;;  %6556 = vmatprep.subr.bf16.mxu0 %v6555_v36  ;;  %v6559_v46 = vpack.c.bf16 %v756_v43, %v755_v34  ;;  %v10814_v24 = vsub.f32 %v10812_v4, %v10813_v20  ;;  %v757_v35 = vld [vmem:[%s8411_s21 + $0x130] sm:$0xff]  ;;  %v758_v19 = vld [vmem:[%s8411_s21 + $0x138] sm:$0xff] }
 0x2fd   : > { %v9135_v26 = vpop.eup %6948  ;;  %6968 = vrcp.f32 %v2662_v3  ;;  %5874 = vmatprep.mubr.f32.mxu1 %v3049_v49  ;;  %4465 = vst [vmem:[%s9071_s27 + $0x90] sm:$0xff] %v3049_v49  ;;  %6590 = vmatpush3.bf16.msra.mxu1 %v6587_v14  ;;  %v10815_v14 = vsub.f32 %v10672_v38, %v8783_v8  ;;  %v10816_v34 = vld [vmem:[#allocation110_spill] sm:$0xff]  ;;  %v6595_v3 = vpack.c.bf16 %v774_v62, %v773_v28  ;;  %v10819_v28 = vld [vmem:[#allocation52_spill] sm:$0xff] }
 0x2fe   : > { %v6951_v47 = vpop.eup %6950  ;;  %6970 = vpow2.f32 %v2479_v30  ;;  %v2485_v48 = vmul.f32 1.442695, %v10814_v24  ;;  %2765 = vadd.xlane.f32.xlu1 %v9111_v22  ;;  %5818 = vmatprep.mubr.f32.mxu0 %v3033_v50  ;;  %4449 = vst [vmem:[%s9071_s27 + $0x10] sm:$0xff] %v3033_v50  ;;  %v10817_v50 = vld [vmem:[#allocation112_spill] sm:$0xff]  ;;  %v6563_v8 = vpack.c.bf16 %v758_v19, %v757_v35  ;;  %v10821_v20 = vsub.f32 %v10675_v10, %v8793_v31 }
 0x2ff   : > { %v6953_v1 = vpop.eup %6952  ;;  %6972 = vpow2.f32 %v2517_v51  ;;  %v2515_v2 = vmul.f32 1.442695, %v10815_v14  ;;  %5875 = vmatmul.mubr.f32.gmra.mrb[66].mxu1 %v3050_v11  ;;  %v2692_v23 = vpop.xlane.xlu1 %2691  ;;  %5819 = vmatmul.mubr.f32.gmra.mrb[66].mxu0 %v3034_v6  ;;  %v3052_v43 = vmul.f32 %v6951_v47, %v10816_v34  ;;  %v10818_v6 = vld [vmem:[#allocation53_spill] sm:$0xff] }
 0x300   : > { %v2660_v30 = vpop.xlane.xlu0 %2659  ;;  %v9149_v49 = vpop.eup %6954  ;;  %6974 = vrcp.f32 %v2692_v23  ;;  %2733 = vadd.xlane.f32.xlu0 %v9130_v9  ;;  %v3036_v51 = vmul.f32 %v6953_v1, %v10817_v50  ;;  %6558 = vmatpush3.bf16.msra.mxu0 %v6555_v36  ;;  %v10820_v62 = vsub.f32 %v10818_v6, %v10819_v28  ;;  %v775_v1 = vld [vmem:[%s8411_s21 + $0x1c0] sm:$0xff]  ;;  %v776_v36 = vld [vmem:[%s8411_s21 + $0x1c8] sm:$0xff]  ;;  %v2553_v24 = vmul.f32 1.442695, %v10821_v20  ;;  %v10825_v6 = vld [vmem:[#allocation54_spill] sm:$0xff] }
 0x301   : > { %v9153_v38 = vpop.eup %6956  ;;  %6976 = vrcp.f32 %v2660_v30  ;;  %4468 = vst [vmem:[%s9071_s27 + $0xa8] sm:$0xff] %v3052_v43  ;;  %6592 = vmatprep.subr.bf16.mxu1 %v6591_v39  ;;  %6560 = vmatprep.subr.bf16.mxu0 %v6559_v46  ;;  %v759_v23 = vld [vmem:[%s8411_s21 + $0x140] sm:$0xff]  ;;  %v760_v30 = vld [vmem:[%s8411_s21 + $0x148] sm:$0xff]  ;;  %v6599_v31 = vpack.c.bf16 %v776_v36, %v775_v1  ;;  %v10828_v36 = vld [vmem:[#allocation125_spill] sm:$0xff] }
 0x302   : > { %v6959_v11 = vpop.eup %6958  ;;  %6978 = vpow2.f32 %v2485_v48  ;;  %v2483_v47 = vmul.f32 1.442695, %v10820_v62  ;;  %2763 = vadd.xlane.f32.xlu1 %v9135_v26  ;;  %4452 = vst [vmem:[%s9071_s27 + $0x28] sm:$0xff] %v3036_v51  ;;  %6594 = vmatpush3.bf16.msra.mxu1 %v6591_v39  ;;  %v10822_v48 = vld [vmem:[#allocation117_spill] sm:$0xff]  ;;  %v10823_v39 = vld [vmem:[#allocation119_spill] sm:$0xff]  ;;  %v6567_v20 = vpack.c.bf16 %v760_v30, %v759_v23  ;;  %v10831_v30 = vld [vmem:[#allocation56_spill] sm:$0xff] }
 0x303   : > { %v6961_v4 = vpop.eup %6960  ;;  %6980 = vpow2.f32 %v2515_v2  ;;  %v2698_v35 = vpop.xlane.xlu1 %2697  ;;  %v3051_v14 = vmul.f32 %v6959_v11, %v10822_v48  ;;  %6596 = vmatprep.subr.bf16.mxu1 %v6595_v3  ;;  %v10824_v11 = vld [vmem:[#allocation55_spill] sm:$0xff]  ;;  %v10830_v23 = vld [vmem:[#allocation57_spill] sm:$0xff] }
 0x304   : > { %v2666_v19 = vpop.xlane.xlu0 %2665  ;;  %v9169_v34 = vpop.eup %6962  ;;  %6982 = vrcp.f32 %v2698_v35  ;;  %2731 = vadd.xlane.f32.xlu0 %v9149_v49  ;;  %v3035_v2 = vmul.f32 %v6961_v4, %v10823_v39  ;;  %6562 = vmatpush3.bf16.msra.mxu0 %v6559_v46  ;;  %v10826_v28 = vsub.f32 %v10824_v11, %v10825_v6  ;;  %v10827_v4 = vsub.f32 %v10678_v56, %v8803_v29  ;;  %v777_v56 = vld [vmem:[%s8411_s21 + $0x1d0] sm:$0xff] }
 0x305   : > { %v9173_v50 = vpop.eup %6964  ;;  %6984 = vrcp.f32 %v2666_v19  ;;  %5877 = vmatprep.mubr.f32.mxu1 %v3051_v14  ;;  %4467 = vst [vmem:[%s9071_s27 + $0xa0] sm:$0xff] %v3051_v14  ;;  %6564 = vmatprep.subr.bf16.mxu0 %v6563_v8  ;;  %v10829_v14 = vld [vmem:[#allocation127_spill] sm:$0xff]  ;;  %v10832_v39 = vsub.f32 %v10830_v23, %v10831_v30  ;;  %v764_v30 = vld [vmem:[%s8411_s21 + $0x168] sm:$0xff] }
 0x306   : > { %v6967_v10 = vpop.eup %6966  ;;  %6986 = vpow2.f32 %v2483_v47  ;;  %v2521_v62 = vmul.f32 1.442695, %v10826_v28  ;;  %2769 = vadd.xlane.f32.xlu1 %v9153_v38  ;;  %5821 = vmatprep.mubr.f32.mxu0 %v3035_v2  ;;  %4451 = vst [vmem:[%s9071_s27 + $0x20] sm:$0xff] %v3035_v2  ;;  %v2551_v35 = vmul.f32 1.442695, %v10827_v4  ;;  %v10833_v28 = vld [vmem:[#allocation133_spill] sm:$0xff] }
 0x307   : > { %v6969_v46 = vpop.eup %6968  ;;  %6988 = vpow2.f32 %v2553_v24  ;;  %5878 = vmatmul.mubr.f32.gmra.mrb[68].mxu1 %v3052_v43  ;;  %v2696_v47 = vpop.xlane.xlu1 %2695  ;;  %5822 = vmatmul.mubr.f32.gmra.mrb[68].mxu0 %v3036_v51  ;;  %v3054_v19 = vmul.f32 %v6967_v10, %v10828_v36  ;;  %v778_v43 = vld [vmem:[%s8411_s21 + $0x1d8] sm:$0xff]  ;;  %v2519_v2 = vmul.f32 1.442695, %v10832_v39  ;;  %v763_v23 = vld [vmem:[%s8411_s21 + $0x160] sm:$0xff] }
 0x308   : > { %v2664_v1 = vpop.xlane.xlu0 %2663  ;;  %v9185_v48 = vpop.eup %6970  ;;  %6990 = vrcp.f32 %v2696_v47  ;;  %2737 = vadd.xlane.f32.xlu0 %v9169_v34  ;;  %v3038_v24 = vmul.f32 %v6969_v46, %v10829_v14  ;;  %6598 = vmatpush3.bf16.msra.mxu1 %v6595_v3  ;;  %v761_v3 = vld [vmem:[%s8411_s21 + $0x150] sm:$0xff]  ;;  %v762_v10 = vld [vmem:[%s8411_s21 + $0x158] sm:$0xff]  ;;  %v779_v46 = vld [vmem:[%s8411_s21 + $0x1e0] sm:$0xff]  ;;  %v6603_v36 = vpack.c.bf16 %v778_v43, %v777_v56 }
 0x309   : > { %v9189_v29 = vpop.eup %6972  ;;  %6992 = vrcp.f32 %v2664_v1  ;;  %4470 = vst [vmem:[%s9071_s27 + $0xb8] sm:$0xff] %v3054_v19  ;;  %6566 = vmatpush3.bf16.msra.mxu0 %v6563_v8  ;;  %6600 = vmatprep.subr.bf16.mxu1 %v6599_v31  ;;  %v10834_v47 = vld [vmem:[#allocation135_spill] sm:$0xff]  ;;  %v780_v14 = vld [vmem:[%s8411_s21 + $0x1e8] sm:$0xff]  ;;  %v10837_v43 = vld [vmem:[#allocation58_spill] sm:$0xff] }
 0x30a   : > { %v6975_v51 = vpop.eup %6974  ;;  %6994 = vpow2.f32 %v2521_v62  ;;  %2767 = vadd.xlane.f32.xlu1 %v9173_v50  ;;  %4454 = vst [vmem:[%s9071_s27 + $0x38] sm:$0xff] %v3038_v24  ;;  %6568 = vmatprep.subr.bf16.mxu0 %v6567_v20  ;;  %v10836_v56 = vld [vmem:[#allocation59_spill] sm:$0xff] }
 0x30b   : > { %v6977_v8 = vpop.eup %6976  ;;  %6996 = vpow2.f32 %v2551_v35  ;;  %v2702_v11 = vpop.xlane.xlu1 %2701  ;;  %v3053_v62 = vmul.f32 %v6975_v51, %v10833_v28  ;;  %v6571_v51 = vpack.c.bf16 %v762_v10, %v761_v3  ;;  %v6607_v10 = vpack.c.bf16 %v780_v14, %v779_v46 }
 0x30c   : > { %v2670_v6 = vpop.xlane.xlu0 %2669  ;;  %v9203_v4 = vpop.eup %6978  ;;  %6998 = vrcp.f32 %v2702_v11  ;;  %2735 = vadd.xlane.f32.xlu0 %v9185_v48  ;;  %v3037_v1 = vmul.f32 %v6977_v8, %v10834_v47  ;;  %6602 = vmatpush3.bf16.msra.mxu1 %v6599_v31  ;;  %v10835_v11 = vsub.f32 %v10681_v12, %v8813_v61  ;;  %v10838_v8 = vsub.f32 %v10836_v56, %v10837_v43  ;;  %v10840_v47 = vld [vmem:[#allocation31_spill] sm:$0xff]  ;;  %v10842_v56 = vld [vmem:[#allocation61_spill] sm:$0xff] }
 0x30d   : > { %v9210_v35 = vpop.eup %6980  ;;  %7000 = vrcp.f32 %v2670_v6  ;;  %5880 = vmatprep.mubr.f32.mxu1 %v3053_v62  ;;  %4469 = vst [vmem:[%s9071_s27 + $0xb0] sm:$0xff] %v3053_v62  ;;  %6570 = vmatpush3.bf16.msra.mxu0 %v6567_v20  ;;  %v9222_v61 = vpack.c.bf16 %v764_v30, %v763_v23  ;;  %v10841_v14 = vsub.f32 %v10684_v25, %v8823_v40  ;;  %v782_v30 = vld [vmem:[%s8411_s21 + $0x1f8] sm:$0xff] }
 0x30e   : > { %v6983_v39 = vpop.eup %6982  ;;  %7002 = vpow2.f32 %v2519_v2  ;;  %v2557_v28 = vmul.f32 1.442695, %v10835_v11  ;;  %2773 = vadd.xlane.f32.xlu1 %v9189_v29  ;;  %5824 = vmatprep.mubr.f32.mxu0 %v3037_v1  ;;  %4453 = vst [vmem:[%s9071_s27 + $0x30] sm:$0xff] %v3037_v1  ;;  %v2525_v6 = vmul.f32 1.442695, %v10838_v8  ;;  %v10839_v2 = vld [vmem:[#allocation138_spill] sm:$0xff] }
 0x30f   : > { %v6985_v31 = vpop.eup %6984  ;;  %5881 = vmatmul.mubr.f32.gmra.mrb[70].mxu1 %v3054_v19  ;;  %v2700_v62 = vpop.xlane.xlu1 %2699  ;;  %5825 = vmatmul.mubr.f32.gmra.mrb[70].mxu0 %v3038_v24  ;;  %v3056_v3 = vmul.f32 %v6983_v39, %v10839_v2  ;;  %v781_v24 = vld [vmem:[%s8411_s21 + $0x1f0] sm:$0xff]  ;;  %v2555_v23 = vmul.f32 1.442695, %v10841_v14  ;;  %v766_v11 = vld [vmem:[%s8411_s21 + $0x178] sm:$0xff]  ;;  %v799_v14 = vld [vmem:[%s8411_s21 + $0x280] sm:$0xff] }
 0x310   : > { %v2668_v20 = vpop.xlane.xlu0 %2667  ;;  %v9224_v12 = vpop.eup %6986  ;;  %7004 = vrcp.f32 %v2700_v62  ;;  %2741 = vadd.xlane.f32.xlu0 %v9203_v4  ;;  %v3040_v1 = vmul.f32 %v6985_v31, %v10840_v47  ;;  %6604 = vmatprep.subr.bf16.mxu1 %v6603_v36  ;;  %v765_v39 = vld [vmem:[%s8411_s21 + $0x170] sm:$0xff]  ;;  %v6611_v47 = vpack.c.bf16 %v782_v30, %v781_v24  ;;  %v10849_v24 = vld [vmem:[#allocation62_spill] sm:$0xff] }
 0x311   : > { %v9228_v19 = vpop.eup %6988  ;;  %7006 = vrcp.f32 %v2668_v20  ;;  %4472 = vst [vmem:[%s9071_s27 + $0xc8] sm:$0xff] %v3056_v3  ;;  %6606 = vmatpush3.bf16.msra.mxu1 %v6603_v36  ;;  %6572 = vmatprep.subr.bf16.mxu0 %v6571_v51  ;;  %v10843_v36 = vld [vmem:[#allocation60_spill] sm:$0xff]  ;;  %v10845_v20 = vld [vmem:[#allocation21_spill] sm:$0xff] }
 0x312   : > { %v6991_v46 = vpop.eup %6990  ;;  %7008 = vpow2.f32 %v2557_v28  ;;  %2771 = vadd.xlane.f32.xlu1 %v9210_v35  ;;  %4456 = vst [vmem:[%s9071_s27 + $0x48] sm:$0xff] %v3040_v1  ;;  %6574 = vmatpush3.bf16.msra.mxu0 %v6571_v51  ;;  %v10844_v43 = vsub.f32 %v10842_v56, %v10843_v36  ;;  %v10846_v51 = vld [vmem:[#allocation34_spill] sm:$0xff]  ;;  %v800_v56 = vld [vmem:[%s8411_s21 + $0x288] sm:$0xff] }
 0x313   : > { %v6993_v31 = vpop.eup %6992  ;;  %7010 = vpow2.f32 %v2525_v6  ;;  %v2706_v62 = vpop.xlane.xlu1 %2705  ;;  %v3055_v40 = vmul.f32 %v6991_v46, %v10845_v20  ;;  %6608 = vmatprep.subr.bf16.mxu1 %v6607_v10  ;;  %6576 = vmatprep.subr.bf16.mxu0 %v9222_v61  ;;  %v6579_v46 = vpack.c.bf16 %v766_v11, %v765_v39  ;;  %v784_v20 = vld [vmem:[%s8411_s21 + $0x208] sm:$0xff] }
 0x314   : > { %v2523_v8 = vmul.f32 1.442695, %v10844_v43  ;;  %v2674_v28 = vpop.xlane.xlu0 %2673  ;;  %v9245_v25 = vpop.eup %6994  ;;  %7012 = vrcp.f32 %v2706_v62  ;;  %2739 = vadd.xlane.f32.xlu0 %v9224_v12  ;;  %v3039_v6 = vmul.f32 %v6993_v31, %v10846_v51  ;;  %v10847_v43 = vsub.f32 %v10687_v59, %v8833_v0  ;;  %v783_v31 = vld [vmem:[%s8411_s21 + $0x200] sm:$0xff] }
 0x315   : > { %v9249_v2 = vpop.eup %6996  ;;  %7014 = vrcp.f32 %v2674_v28  ;;  %5883 = vmatprep.mubr.f32.mxu1 %v3055_v40  ;;  %4471 = vst [vmem:[%s9071_s27 + $0xc0] sm:$0xff] %v3055_v40  ;;  %6610 = vmatpush3.bf16.msra.mxu1 %v6607_v10  ;;  %v10848_v10 = vld [vmem:[#allocation63_spill] sm:$0xff]  ;;  %v10851_v40 = vld [vmem:[#allocation24_spill] sm:$0xff]  ;;  %v9265_v59 = vpack.c.bf16 %v800_v56, %v799_v14  ;;  %v10853_v14 = vsub.f32 %v10690_v57, %v8843_v54  ;;  %v10858_v54 = vld [vmem:[#allocation25_spill] sm:$0xff] }
 0x316   : > { %v6999_v36 = vpop.eup %6998  ;;  %7016 = vpow2.f32 %v2555_v23  ;;  %v2561_v62 = vmul.f32 1.442695, %v10847_v43  ;;  %2809 = vadd.xlane.f32.xlu1 %v9228_v19  ;;  %5827 = vmatprep.mubr.f32.mxu0 %v3039_v6  ;;  %4455 = vst [vmem:[%s9071_s27 + $0x40] sm:$0xff] %v3039_v6  ;;  %v10850_v30 = vsub.f32 %v10848_v10, %v10849_v24  ;;  %v10852_v6 = vld [vmem:[#allocation23_spill] sm:$0xff]  ;;  %v10855_v43 = vld [vmem:[#allocation64_spill] sm:$0xff] }
 0x317   : > { %v7001_v28 = vpop.eup %7000  ;;  %7018 = vpow2.f32 %v2523_v8  ;;  %5884 = vmatmul.mubr.f32.gmra.mrb[72].mxu1 %v3056_v3  ;;  %v2704_v11 = vpop.xlane.xlu1 %2703  ;;  %5828 = vmatmul.mubr.f32.gmra.mrb[72].mxu0 %v3040_v1  ;;  %v3058_v0 = vmul.f32 %v6999_v36, %v10851_v40  ;;  %v9273_v3 = vpack.c.bf16 %v784_v20, %v783_v31  ;;  %v2559_v56 = vmul.f32 1.442695, %v10853_v14  ;;  %v10857_v20 = vld [vmem:[#allocation26_spill] sm:$0xff]  ;;  %v10861_v14 = vld [vmem:[#allocation139_spill] sm:$0xff] }
 0x318   : > { %v2529_v39 = vmul.f32 1.442695, %v10850_v30  ;;  %v2672_v23 = vpop.xlane.xlu0 %2671  ;;  %v9267_v51 = vpop.eup %7002  ;;  %7020 = vrcp.f32 %v2704_v11  ;;  %2777 = vadd.xlane.f32.xlu0 %v9245_v25  ;;  %v3042_v8 = vmul.f32 %v7001_v28, %v10852_v6  ;;  %6578 = vmatpush3.bf16.msra.mxu0 %v9222_v61  ;;  %v10854_v61 = vld [vmem:[#allocation65_spill] sm:$0xff] }
 0x319   : > { %7022 = vrcp.f32 %v2672_v23  ;;  %4474 = vst [vmem:[%s9071_s27 + $0xd8] sm:$0xff] %v3058_v0  ;;  %6612 = vmatprep.subr.bf16.mxu1 %v6611_v47  ;;  %6580 = vmatprep.subr.bf16.mxu0 %v6579_v46  ;;  %v10856_v28 = vsub.f32 %v10854_v61, %v10855_v43  ;;  %v10859_v23 = vld [vmem:[#allocation66_spill] sm:$0xff] }
 0x31a   : > { %v7005_v1 = vpop.eup %7004  ;;  %7024 = vpow2.f32 %v2561_v62  ;;  %2807 = vadd.xlane.f32.xlu1 %v9249_v2  ;;  %4458 = vst [vmem:[%s9071_s27 + $0x58] sm:$0xff] %v3042_v8  ;;  %6614 = vmatpush3.bf16.msra.mxu1 %v6611_v47  ;;  %v10860_v40 = vsub.f32 %v10694_v13, %v10859_v23  ;;  %v10868_v23 = vld [vmem:[#allocation143_spill] sm:$0xff] }
 0x31b   : > { %v7007_v36 = vpop.eup %7006  ;;  %7026 = vpow2.f32 %v2529_v39  ;;  %v2527_v10 = vmul.f32 1.442695, %v10856_v28  ;;  %v2710_v24 = vpop.xlane.xlu1 %2709  ;;  %v3057_v30 = vmul.f32 %v7005_v1, %v10857_v20  ;;  %6648 = vmatprep.subr.bf16.mxu1 %v9265_v59 }
 0x31c   : > { %v2678_v31 = vpop.xlane.xlu0 %2677  ;;  %v9285_v57 = vpop.eup %7008  ;;  %7028 = vrcp.f32 %v2710_v24  ;;  %2775 = vadd.xlane.f32.xlu0 %v9267_v51  ;;  %v3041_v47 = vmul.f32 %v7007_v36, %v10858_v54  ;;  %6582 = vmatpush3.bf16.msra.mxu0 %v6579_v46  ;;  %v2565_v46 = vmul.f32 1.442695, %v10860_v40 }
 0x31d   : > { %v9289_v62 = vpop.eup %7010  ;;  %7030 = vrcp.f32 %v2678_v31  ;;  %5886 = vmatprep.mubr.f32.mxu1 %v3057_v30  ;;  %4473 = vst [vmem:[%s9071_s27 + $0xd0] sm:$0xff] %v3057_v30  ;;  %6616 = vmatprep.subr.bf16.mxu0 %v9273_v3  ;;  %v10865_v31 = vld [vmem:[#allocation68_spill] sm:$0xff] }
 0x31e   : > { %v7013_v39 = vpop.eup %7012  ;;  %7032 = vpow2.f32 %v2559_v56  ;;  %2813 = vadd.xlane.f32.xlu1 %v9285_v57  ;;  %5830 = vmatprep.mubr.f32.mxu0 %v3041_v47  ;;  %4457 = vst [vmem:[%s9071_s27 + $0x50] sm:$0xff] %v3041_v47  ;;  %v10862_v56 = vld [vmem:[#allocation40_spill] sm:$0xff]  ;;  %v10866_v20 = vsub.f32 %v10698_v15, %v10865_v31 }
 0x31f   : > { %v7015_v11 = vpop.eup %7014  ;;  %7034 = vpow2.f32 %v2527_v10  ;;  %5887 = vmatmul.mubr.f32.gmra.mrb[74].mxu1 %v3058_v0  ;;  %v2708_v6 = vpop.xlane.xlu1 %2707  ;;  %5831 = vmatmul.mubr.f32.gmra.mrb[74].mxu0 %v3042_v8  ;;  %v3060_v36 = vmul.f32 %v7013_v39, %v10861_v14  ;;  %v10863_v10 = vld [vmem:[#allocation151_spill] sm:$0xff] }
 0x320   : > { %v2676_v1 = vpop.xlane.xlu0 %2675  ;;  %v9299_v61 = vpop.eup %7016  ;;  %7036 = vrcp.f32 %v2708_v6  ;;  %2781 = vadd.xlane.f32.xlu0 %v9289_v62  ;;  %v3044_v43 = vmul.f32 %v7015_v11, %v10862_v56  ;;  %v10864_v13 = vsub.f32 %v10695_v44, %v10863_v10  ;;  %v2563_v30 = vmul.f32 1.442695, %v10866_v20  ;;  %v10867_v44 = vld [vmem:[#allocation142_spill] sm:$0xff]  ;;  %v10873_v20 = vld [vmem:[#allocation147_spill] sm:$0xff] }
 0x321   : > { %v9303_v28 = vpop.eup %7018  ;;  %7038 = vrcp.f32 %v2676_v1  ;;  %4476 = vst [vmem:[%s9071_s27 + $0xe8] sm:$0xff] %v3060_v36  ;;  %v10871_v10 = vsub.f32 %v10702_v60, %v8879_v42  ;;  %v10874_v42 = vsub.f32 %v10703_v5, %v8881_v55  ;;  %v10877_v5 = vld [vmem:[#allocation46_spill] sm:$0xff] }
 0x322   : > { %v2533_v24 = vmul.f32 1.442695, %v10864_v13  ;;  %v7021_v0 = vpop.eup %7020  ;;  %2811 = vadd.xlane.f32.xlu1 %v9299_v61  ;;  %4460 = vst [vmem:[%s9071_s27 + $0x68] sm:$0xff] %v3044_v43  ;;  %7040 = vpow2.f32 %v2565_v46  ;;  %v10869_v46 = vld [vmem:[#allocation67_spill] sm:$0xff] }
 0x323   : > { %v7023_v8 = vpop.eup %7022  ;;  %v9314_v54 = vpop.xlane.xlu1 %2233  ;;  %v3059_v39 = vmul.f32 %v7021_v0, %v10867_v44  ;;  %v10870_v15 = vsub.f32 %v10699_v41, %v10869_v46  ;;  %v2569_v13 = vmul.f32 1.442695, %v10871_v10  ;;  %v10872_v0 = vld [vmem:[#allocation146_spill] sm:$0xff]  ;;  %v2537_v60 = vmul.f32 1.442695, %v10874_v42 }
 0x324   : > { %v9316_v47 = vpop.xlane.xlu0 %2201  ;;  %v9319_v11 = vpop.eup %7024  ;;  %2779 = vadd.xlane.f32.xlu0 %v9303_v28  ;;  %v3043_v40 = vmul.f32 %v7023_v8, %v10868_v23  ;;  %7042 = vpow2.f32 %v2533_v24  ;;  %v10879_v10 = vld [vmem:[#allocation70_spill] sm:$0xff] }
 0x325   : > { %v9323_v6 = vpop.eup %7026  ;;  %v2531_v1 = vmul.f32 1.442695, %v10870_v15  ;;  %5889 = vmatprep.mubr.f32.mxu1 %v3059_v39  ;;  %4475 = vst [vmem:[%s9071_s27 + $0xe0] sm:$0xff] %v3059_v39  ;;  %7044 = vpow2.f32 %v2563_v30  ;;  %v10875_v39 = vsub.f32 %v10705_v63, %v8889_v33  ;;  %v10876_v15 = vld [vmem:[#allocation149_spill] sm:$0xff]  ;;  %v10881_v63 = vsub.f32 %v10711_v17, %v8905_v18  ;;  %v10885_v18 = vld [vmem:[#allocation78_spill] sm:$0xff]  ;;  %v10886_v17 = vld [vmem:[#allocation72_spill] sm:$0xff] }
 0x326   : > { %v7029_v14 = vpop.eup %7028  ;;  %2817 = vadd.xlane.f32.xlu1 %v9319_v11  ;;  %5833 = vmatprep.mubr.f32.mxu0 %v3043_v40  ;;  %4459 = vst [vmem:[%s9071_s27 + $0x60] sm:$0xff] %v3043_v40 }
 0x327   : > { %v7031_v56 = vpop.eup %7030  ;;  %5890 = vmatmul.mubr.f32.gmra.mrb[76].mxu1 %v3060_v36  ;;  %v9334_v24 = vpop.xlane.xlu1 %2231  ;;  %5834 = vmatmul.mubr.f32.gmra.mrb[76].mxu0 %v3044_v43  ;;  %v3062_v8 = vmul.f32 %v7029_v14, %v10872_v0  ;;  %7046 = vpow2.f32 %v2531_v1  ;;  %v2567_v23 = vmul.f32 1.442695, %v10875_v39 }
 0x328   : > { %v9336_v41 = vpop.xlane.xlu0 %2199  ;;  %v9339_v31 = vpop.eup %7032  ;;  %2785 = vadd.xlane.f32.xlu0 %v9323_v6  ;;  %v3046_v44 = vmul.f32 %v7031_v56, %v10873_v20  ;;  %7048 = vpow2.f32 %v2569_v13  ;;  %v10878_v56 = vld [vmem:[#allocation73_spill] sm:$0xff]  ;;  %v2573_v20 = vmul.f32 1.442695, %v10881_v63  ;;  %v10893_v63 = vld [vmem:[#allocation76_spill] sm:$0xff] }
 0x329   : > { %v9343_v30 = vpop.eup %7034  ;;  %4478 = vst [vmem:[%s9071_s27 + $0xf8] sm:$0xff] %v3062_v8  ;;  %7050 = vpow2.f32 %v2537_v60  ;;  %v10880_v13 = vsub.f32 %v10878_v56, %v10879_v10  ;;  %v10890_v56 = vld [vmem:[#allocation71_spill] sm:$0xff] }
 0x32a   : > { %v7037_v36 = vpop.eup %7036  ;;  %2815 = vadd.xlane.f32.xlu1 %v9339_v31  ;;  %4462 = vst [vmem:[%s9071_s27 + $0x78] sm:$0xff] %v3046_v44  ;;  %7052 = vpow2.f32 %v2567_v23 }
 0x32b   : > { %v7039_v43 = vpop.eup %7038  ;;  %v9354_v40 = vpop.xlane.xlu1 %2237  ;;  %v3061_v55 = vmul.f32 %v7037_v36, %v10876_v15  ;;  %v2535_v0 = vmul.f32 1.442695, %v10880_v13 }
 0x32c   : > { %v9356_v46 = vpop.xlane.xlu0 %2205  ;;  %2783 = vadd.xlane.f32.xlu0 %v9343_v30  ;;  %v3045_v1 = vmul.f32 %v7039_v43, %v10877_v5  ;;  %v9361_v14 = vpop.eup %7040  ;;  %v10882_v43 = vld [vmem:[#allocation69_spill] sm:$0xff] }
 0x32d   : > { %5892 = vmatprep.mubr.f32.mxu1 %v3061_v55  ;;  %4477 = vst [vmem:[%s9071_s27 + $0xf0] sm:$0xff] %v3061_v55  ;;  %7054 = vpow2.f32 %v2535_v0  ;;  %v10883_v39 = vsub.f32 %v10712_v53, %v10882_v43  ;;  %v10889_v53 = vld [vmem:[#allocation77_spill] sm:$0xff] }
 0x32e   : > { %2821 = vadd.xlane.f32.xlu1 %v9361_v14  ;;  %5836 = vmatprep.mubr.f32.mxu0 %v3045_v1  ;;  %4461 = vst [vmem:[%s9071_s27 + $0x70] sm:$0xff] %v3045_v1  ;;  %v9369_v33 = vpop.eup %7042  ;;  %7056 = vpow2.f32 %v2573_v20  ;;  %v10891_v10 = vsub.f32 %v10889_v53, %v10890_v56  ;;  %v10894_v20 = vsub.f32 %v10733_v45, %v10893_v63 }
 0x32f   : > { %5893 = vmatmul.mubr.f32.gmra.mrb[78].mxu1 %v3062_v8  ;;  %v9374_v42 = vpop.xlane.xlu1 %2235  ;;  %5837 = vmatmul.mubr.f32.gmra.mrb[78].mxu0 %v3046_v44  ;;  %v9379_v36 = vpop.eup %7044  ;;  %v2541_v15 = vmul.f32 1.442695, %v10883_v39  ;;  %v10887_v8 = vsub.f32 %v10885_v18, %v10886_v17  ;;  %v10896_v17 = vld [vmem:[#allocation79_spill] sm:$0xff]  ;;  %v10900_v45 = vsub.f32 %v10740_v52, %v8963_v32  ;;  %v10904_v32 = vsub.f32 %v10750_v37, %v8987_v27  ;;  %v10910_v27 = vld [vmem:[#allocation86_spill] sm:$0xff]  ;;  %v10911_v37 = vld [vmem:[#allocation132_spill] sm:$0xff] }
 0x330   : > { %v9376_v60 = vpop.xlane.xlu0 %2203  ;;  %2789 = vadd.xlane.f32.xlu0 %v9369_v33  ;;  %v2539_v13 = vmul.f32 1.442695, %v10891_v10  ;;  %v2577_v43 = vmul.f32 1.442695, %v10894_v20 }
 0x331   : > { %v9385_v23 = vpop.eup %7046  ;;  %v2571_v44 = vmul.f32 1.442695, %v10887_v8  ;;  %7058 = vpow2.f32 %v2541_v15  ;;  %v10897_v8 = vld [vmem:[#allocation75_spill] sm:$0xff]  ;;  %v2575_v10 = vmul.f32 1.442695, %v10900_v45 }
 0x332   : > { %2819 = vadd.xlane.f32.xlu1 %v9379_v36  ;;  %10884 = vst [vmem:[#allocation37_spill] sm:$0xff] %v9385_v23  ;;  %v9395_v1 = vpop.eup %7048  ;;  %v10898_v53 = vsub.f32 %v10896_v17, %v10897_v8  ;;  %v10902_v17 = vsub.f32 %v10741_v7, %v8965_v16  ;;  %v2581_v52 = vmul.f32 1.442695, %v10904_v32  ;;  %v10906_v16 = vld [vmem:[#allocation83_spill] sm:$0xff]  ;;  %v10912_v32 = vsub.f32 %v10910_v27, %v10911_v37 }
 0x333   : > { %v9390_v55 = vpop.xlane.xlu1 %2241  ;;  %10888 = vst [vmem:[#allocation42_spill] sm:$0xff] %v9395_v1  ;;  %v9401_v0 = vpop.eup %7050  ;;  %7060 = vpow2.f32 %v2571_v44  ;;  %v10907_v7 = vld [vmem:[#allocation27_spill] sm:$0xff] }
 0x334   : > { %v9392_v5 = vpop.xlane.xlu0 %2209  ;;  %2787 = vadd.xlane.f32.xlu0 %v9385_v23  ;;  %10892 = vst [vmem:[#allocation140_spill] sm:$0xff] %v9401_v0  ;;  %v9411_v15 = vpop.eup %7052  ;;  %7062 = vpow2.f32 %v2539_v13  ;;  %v2545_v56 = vmul.f32 1.442695, %v10898_v53  ;;  %v2543_v8 = vmul.f32 1.442695, %v10902_v17  ;;  %v10908_v17 = vsub.f32 %v10906_v16, %v10907_v7  ;;  %v10914_v16 = vld [vmem:[#allocation85_spill] sm:$0xff] }
 0x335   : > { %10895 = vst [vmem:[#allocation41_spill] sm:$0xff] %v9411_v15  ;;  %7064 = vpow2.f32 %v2577_v43  ;;  %v10915_v7 = vld [vmem:[#allocation80_spill] sm:$0xff] }
 0x336   : > { %2825 = vadd.xlane.f32.xlu1 %v9395_v1  ;;  %7066 = vpow2.f32 %v2545_v56 }
 0x337   : > { %v9406_v39 = vpop.xlane.xlu1 %2239  ;;  %v9417_v44 = vpop.eup %7054  ;;  %7068 = vpow2.f32 %v2575_v10 }
 0x338   : > { %v9408_v18 = vpop.xlane.xlu0 %2207  ;;  %2793 = vadd.xlane.f32.xlu0 %v9401_v0  ;;  %10899 = vst [vmem:[#allocation141_spill] sm:$0xff] %v9417_v44  ;;  %v9427_v13 = vpop.eup %7056  ;;  %7070 = vpow2.f32 %v2543_v8 }
 0x339   : > { %10901 = vst [vmem:[#allocation44_spill] sm:$0xff] %v9427_v13  ;;  %7072 = vpow2.f32 %v2581_v52 }
 0x33a   : > { %2823 = vadd.xlane.f32.xlu1 %v9411_v15  ;;  %v10913_v15 = vld [vmem:[#allocation90_spill] sm:$0xff] }
 0x33b   : > { %v9422_v63 = vpop.xlane.xlu1 %2245  ;;  %v9433_v43 = vpop.eup %7058  ;;  %v2376_v0 = vsub.f32 %v10913_v15, %v9314_v54  ;;  %v10919_v15 = vld [vmem:[#allocation91_spill] sm:$0xff] }
 0x33c   : > { %v9424_v20 = vpop.xlane.xlu0 %2213  ;;  %2791 = vadd.xlane.f32.xlu0 %v9417_v44  ;;  %10903 = vst [vmem:[#allocation144_spill] sm:$0xff] %v9433_v43  ;;  %v2579_v44 = vmul.f32 1.442695, %v10912_v32  ;;  %v2375_v32 = vsub.f32 %v10919_v15, %v9334_v24  ;;  %v10923_v24 = vld [vmem:[#allocation96_spill] sm:$0xff] }
 0x33d   : > { %v9443_v56 = vpop.eup %7060  ;;  %v2617_v54 = vmul.f32 1.442695, %v2376_v0 }
 0x33e   : > { %2829 = vadd.xlane.f32.xlu1 %v9427_v13  ;;  %10905 = vst [vmem:[#allocation88_spill] sm:$0xff] %v9443_v56  ;;  %v2549_v13 = vmul.f32 1.442695, %v10908_v17  ;;  %v9449_v10 = vpop.eup %7062  ;;  %v10916_v17 = vsub.f32 %v10914_v16, %v10915_v7  ;;  %v2615_v0 = vmul.f32 1.442695, %v2375_v32  ;;  %v2378_v7 = vsub.f32 %v10923_v24, %v9354_v40  ;;  %v10927_v40 = vld [vmem:[#allocation97_spill] sm:$0xff] }
 0x33f   : > { %v9438_v53 = vpop.xlane.xlu1 %2243  ;;  %10909 = vst [vmem:[#allocation43_spill] sm:$0xff] %v9449_v10  ;;  %v9461_v8 = vpop.eup %7064  ;;  %v2377_v24 = vsub.f32 %v10927_v40, %v9374_v42  ;;  %v10931_v42 = vld [vmem:[#allocation102_spill] sm:$0xff] }
 0x340   : > { %v9440_v45 = vpop.xlane.xlu0 %2211  ;;  %2797 = vadd.xlane.f32.xlu0 %v9433_v43  ;;  %7074 = vpow2.f32 %v2549_v13  ;;  %v2547_v52 = vmul.f32 1.442695, %v10916_v17  ;;  %v9469_v37 = vpop.eup %7066  ;;  %v2621_v32 = vmul.f32 1.442695, %v2378_v7  ;;  %v2380_v40 = vsub.f32 %v10931_v42, %v9390_v55  ;;  %v10935_v55 = vld [vmem:[#allocation103_spill] sm:$0xff] }
 0x341   : > { %10918 = vst [vmem:[#allocation145_spill] sm:$0xff] %v9469_v37  ;;  %7076 = vpow2.f32 %v2579_v44  ;;  %v9478_v13 = vpop.eup %7068  ;;  %v2619_v7 = vmul.f32 1.442695, %v2377_v24  ;;  %v2379_v42 = vsub.f32 %v10935_v55, %v9406_v39 }
 0x342   : > { %2827 = vadd.xlane.f32.xlu1 %v9443_v56  ;;  %v10917_v56 = vld [vmem:[#allocation89_spill] sm:$0xff]  ;;  %10920 = vst [vmem:[#allocation87_spill] sm:$0xff] %v9478_v13  ;;  %7078 = vpow2.f32 %v2547_v52  ;;  %v9483_v44 = vpop.eup %7070  ;;  %v2625_v24 = vmul.f32 1.442695, %v2380_v40 }
 0x343   : > { %v9456_v43 = vpop.xlane.xlu1 %2249  ;;  %v2360_v27 = vsub.f32 %v10917_v56, %v9316_v47  ;;  %v10921_v47 = vld [vmem:[#allocation93_spill] sm:$0xff]  ;;  %10922 = vst [vmem:[#allocation45_spill] sm:$0xff] %v9483_v44  ;;  %7080 = vpow2.f32 %v2617_v54  ;;  %v9492_v52 = vpop.eup %7072  ;;  %v2623_v39 = vmul.f32 1.442695, %v2379_v42 }
 0x344   : > { %v9458_v1 = vpop.xlane.xlu0 %2217  ;;  %2795 = vadd.xlane.f32.xlu0 %v9449_v10  ;;  %v2359_v56 = vsub.f32 %v10921_v47, %v9336_v41  ;;  %10924 = vst [vmem:[#allocation148_spill] sm:$0xff] %v9492_v52  ;;  %v10925_v41 = vld [vmem:[#allocation95_spill] sm:$0xff] }
 0x345   : > { %v2585_v16 = vmul.f32 1.442695, %v2360_v27  ;;  %v2362_v47 = vsub.f32 %v10925_v41, %v9356_v46  ;;  %v10929_v46 = vld [vmem:[#allocation99_spill] sm:$0xff] }
 0x346   : > { %2833 = vadd.xlane.f32.xlu1 %v9461_v8  ;;  %v2583_v27 = vmul.f32 1.442695, %v2359_v56  ;;  %v2361_v41 = vsub.f32 %v10929_v46, %v9376_v60  ;;  %v10933_v60 = vld [vmem:[#allocation101_spill] sm:$0xff] }
 0x347   : > { %v9473_v10 = vpop.xlane.xlu1 %2247  ;;  %7082 = vpow2.f32 %v2585_v16  ;;  %v2589_v56 = vmul.f32 1.442695, %v2362_v47  ;;  %v2364_v46 = vsub.f32 %v10933_v60, %v9392_v5  ;;  %v10938_v60 = vld [vmem:[#allocation108_spill] sm:$0xff] }
 0x348   : > { %v9475_v23 = vpop.xlane.xlu0 %2215  ;;  %2801 = vadd.xlane.f32.xlu0 %v9469_v37  ;;  %7084 = vpow2.f32 %v2615_v0  ;;  %v2587_v47 = vmul.f32 1.442695, %v2361_v41 }
 0x349   : > { %7086 = vpow2.f32 %v2583_v27  ;;  %v2593_v5 = vmul.f32 1.442695, %v2364_v46  ;;  %v10941_v46 = vld [vmem:[#allocation107_spill] sm:$0xff] }
 0x34a   : > { %2831 = vadd.xlane.f32.xlu1 %v9478_v13  ;;  %v9497_v54 = vpop.eup %7074  ;;  %7088 = vpow2.f32 %v2621_v32 }
 0x34b   : > { %v9487_v17 = vpop.xlane.xlu1 %2253  ;;  %10926 = vst [vmem:[#allocation94_spill] sm:$0xff] %v9497_v54  ;;  %v9506_v16 = vpop.eup %7076  ;;  %7090 = vpow2.f32 %v2589_v56 }
 0x34c   : > { %v9489_v15 = vpop.xlane.xlu0 %2221  ;;  %2799 = vadd.xlane.f32.xlu0 %v9483_v44  ;;  %10928 = vst [vmem:[#allocation47_spill] sm:$0xff] %v9506_v16  ;;  %v9511_v0 = vpop.eup %7078  ;;  %7092 = vpow2.f32 %v2619_v7  ;;  %v2382_v7 = vsub.f32 %v10938_v60, %v9422_v63  ;;  %v2366_v63 = vsub.f32 %v10941_v46, %v9424_v20 }
 0x34d   : > { %10930 = vst [vmem:[#allocation150_spill] sm:$0xff] %v9511_v0  ;;  %v9520_v27 = vpop.eup %7080  ;;  %7094 = vpow2.f32 %v2587_v47 }
 0x34e   : > { %2837 = vadd.xlane.f32.xlu1 %v9492_v52  ;;  %10932 = vst [vmem:[#allocation92_spill] sm:$0xff] %v9520_v27  ;;  %7096 = vpow2.f32 %v2625_v24  ;;  %v2629_v47 = vmul.f32 1.442695, %v2382_v7  ;;  %v10943_v24 = vld [vmem:[#allocation111_spill] sm:$0xff]  ;;  %v2597_v20 = vmul.f32 1.442695, %v2366_v63 }
 0x34f   : > { %v9501_v13 = vpop.xlane.xlu1 %2251  ;;  %7098 = vpow2.f32 %v2593_v5  ;;  %v2381_v42 = vsub.f32 %v10943_v24, %v9438_v53  ;;  %v10946_v7 = vld [vmem:[#allocation114_spill] sm:$0xff] }
 0x350   : > { %v9503_v37 = vpop.xlane.xlu0 %2219  ;;  %2805 = vadd.xlane.f32.xlu0 %v9497_v54  ;;  %7100 = vpow2.f32 %v2623_v39  ;;  %v2384_v46 = vsub.f32 %v10946_v7, %v9456_v43  ;;  %v10949_v43 = vld [vmem:[#allocation113_spill] sm:$0xff] }
 0x351   : > { %v9525_v32 = vpop.eup %7082  ;;  %v2627_v53 = vmul.f32 1.442695, %v2381_v42 }
 0x352   : > { %2835 = vadd.xlane.f32.xlu1 %v9506_v16  ;;  %10934 = vst [vmem:[#allocation98_spill] sm:$0xff] %v9525_v32  ;;  %v9536_v41 = vpop.eup %7084 }
 0x353   : > { %v9515_v52 = vpop.xlane.xlu1 %2257  ;;  %10937 = vst [vmem:[#allocation100_spill] sm:$0xff] %v9536_v41  ;;  %v9541_v40 = vpop.eup %7086 }
 0x354   : > { %v9517_v44 = vpop.xlane.xlu0 %2225  ;;  %2803 = vadd.xlane.f32.xlu0 %v9511_v0  ;;  %v10936_v0 = vld [vmem:[#allocation105_spill] sm:$0xff]  ;;  %10939 = vst [vmem:[#allocation49_spill] sm:$0xff] %v9541_v40 }
 0x355   : > { %v2363_v56 = vsub.f32 %v10936_v0, %v9408_v18  ;;  %v9548_v0 = vpop.eup %7088 }
 0x356   : > { %2873 = vadd.xlane.f32.xlu1 %v9520_v27  ;;  %10940 = vst [vmem:[#allocation48_spill] sm:$0xff] %v9548_v0  ;;  %v9553_v60 = vpop.eup %7090 }
 0x357   : > { %v9529_v16 = vpop.xlane.xlu1 %2255  ;;  %v2591_v18 = vmul.f32 1.442695, %v2363_v56  ;;  %10942 = vst [vmem:[#allocation104_spill] sm:$0xff] %v9553_v60  ;;  %v10944_v56 = vld [vmem:[#allocation109_spill] sm:$0xff]  ;;  %v9560_v5 = vpop.eup %7092 }
 0x358   : > { %v9531_v54 = vpop.xlane.xlu0 %2223  ;;  %2841 = vadd.xlane.f32.xlu0 %v9525_v32  ;;  %10945 = vst [vmem:[#allocation106_spill] sm:$0xff] %v9560_v5  ;;  %v9565_v39 = vpop.eup %7094 }
 0x359   : > { %7102 = vpow2.f32 %v2591_v18  ;;  %10947 = vst [vmem:[#allocation51_spill] sm:$0xff] %v9565_v39 }
 0x35a   : > { %2871 = vadd.xlane.f32.xlu1 %v9536_v41  ;;  %7104 = vpow2.f32 %v2629_v47  ;;  %v2633_v47 = vmul.f32 1.442695, %v2384_v46 }
 0x35b   : > { %v9543_v55 = vpop.xlane.xlu1 %2261 }
 0x35c   : > { %v9545_v27 = vpop.xlane.xlu0 %2229  ;;  %2839 = vadd.xlane.f32.xlu0 %v9541_v40  ;;  %v2365_v40 = vsub.f32 %v10944_v56, %v9440_v45  ;;  %v9572_v56 = vpop.eup %7096 }
 0x35d   : > { %10948 = vst [vmem:[#allocation50_spill] sm:$0xff] %v9572_v56  ;;  %v9577_v63 = vpop.eup %7098 }
 0x35e   : > { %2877 = vadd.xlane.f32.xlu1 %v9548_v0  ;;  %v2595_v45 = vmul.f32 1.442695, %v2365_v40  ;;  %10950 = vst [vmem:[#allocation110_spill] sm:$0xff] %v9577_v63  ;;  %v9582_v40 = vpop.eup %7100 }
 0x35f   : > { %v2746_v41 = vpop.xlane.xlu1 %2745  ;;  %10952 = vst [vmem:[#allocation112_spill] sm:$0xff] %v9582_v40 }
 0x360   : > { %v2714_v32 = vpop.xlane.xlu0 %2713  ;;  %2845 = vadd.xlane.f32.xlu0 %v9553_v60  ;;  %7106 = vrcp.f32 %v2746_v41  ;;  %v2368_v41 = vsub.f32 %v10949_v43, %v9458_v1  ;;  %v10954_v1 = vld [vmem:[#allocation115_spill] sm:$0xff] }
 0x361   : > { %7108 = vrcp.f32 %v2714_v32  ;;  %v10951_v32 = vld [vmem:[#allocation118_spill] sm:$0xff]  ;;  %v2367_v43 = vsub.f32 %v10954_v1, %v9475_v23 }
 0x362   : > { %2875 = vadd.xlane.f32.xlu1 %v9560_v5  ;;  %7110 = vpow2.f32 %v2597_v20  ;;  %v2383_v42 = vsub.f32 %v10951_v32, %v9473_v10  ;;  %v2601_v46 = vmul.f32 1.442695, %v2368_v41  ;;  %v10956_v32 = vld [vmem:[#allocation121_spill] sm:$0xff]  ;;  %v10957_v23 = vld [vmem:[#allocation74_spill] sm:$0xff] }
 0x363   : > { %v9567_v18 = vpop.xlane.xlu1 %2259  ;;  %7112 = vpow2.f32 %v2627_v53  ;;  %v9584_v20 = vpop.eup %7102  ;;  %v2599_v1 = vmul.f32 1.442695, %v2367_v43 }
 0x364   : > { %v9569_v24 = vpop.xlane.xlu0 %2227  ;;  %2843 = vadd.xlane.f32.xlu0 %v9565_v39  ;;  %7114 = vpow2.f32 %v2595_v45  ;;  %10953 = vst [vmem:[#allocation53_spill] sm:$0xff] %v9584_v20  ;;  %v9589_v53 = vpop.eup %7104  ;;  %v2631_v10 = vmul.f32 1.442695, %v2383_v42  ;;  %v2386_v45 = vsub.f32 %v10956_v32, %v9487_v17  ;;  %v10958_v42 = vld [vmem:[#allocation120_spill] sm:$0xff]  ;;  %v10961_v32 = vld [vmem:[#allocation126_spill] sm:$0xff] }
 0x365   : > { %7116 = vpow2.f32 %v2633_v47  ;;  %10955 = vst [vmem:[#allocation52_spill] sm:$0xff] %v9589_v53  ;;  %v10959_v39 = vld [vmem:[#allocation116_spill] sm:$0xff] }
 0x366   : > { %2881 = vadd.xlane.f32.xlu1 %v9572_v56 }
 0x367   : > { %v2744_v7 = vpop.xlane.xlu1 %2743 }
 0x368   : > { %v2712_v5 = vpop.xlane.xlu0 %2711  ;;  %2849 = vadd.xlane.f32.xlu0 %v9577_v63  ;;  %7118 = vrcp.f32 %v2744_v7 }
 0x369   : > { %7120 = vrcp.f32 %v2712_v5 }
 0x36a   : > { %2879 = vadd.xlane.f32.xlu1 %v9582_v40  ;;  %v7107_v47 = vpop.eup %7106  ;;  %v2370_v40 = vsub.f32 %v10958_v42, %v9489_v15  ;;  %v10965_v42 = vld [vmem:[#allocation129_spill] sm:$0xff] }
 0x36b   : > { %v2750_v63 = vpop.xlane.xlu1 %2749  ;;  %v7109_v41 = vpop.eup %7108  ;;  %v3080_v7 = vmul.f32 %v7107_v47, %v10957_v23  ;;  %v802_v47 = vld [vmem:[%s8411_s21 + $0x298] sm:$0xff] }
 0x36c   : > { %v2718_v56 = vpop.xlane.xlu0 %2717  ;;  %7122 = vrcp.f32 %v2750_v63  ;;  %2847 = vadd.xlane.f32.xlu0 %v9584_v20  ;;  %v3064_v17 = vmul.f32 %v7109_v41, %v10959_v39  ;;  %v9599_v5 = vpop.eup %7110  ;;  %v2637_v63 = vmul.f32 1.442695, %v2386_v45  ;;  %v2385_v20 = vsub.f32 %v10961_v32, %v9501_v13  ;;  %v801_v13 = vld [vmem:[%s8411_s21 + $0x290] sm:$0xff] }
 0x36d   : > { %7124 = vrcp.f32 %v2718_v56  ;;  %10960 = vst [vmem:[#allocation117_spill] sm:$0xff] %v9599_v5  ;;  %4496 = vst [vmem:[%s9071_s27 + $0x188] sm:$0xff] %v3080_v7  ;;  %v9606_v15 = vpop.eup %7112  ;;  %v2605_v43 = vmul.f32 1.442695, %v2370_v40  ;;  %v2388_v32 = vsub.f32 %v10965_v42, %v9515_v52  ;;  %v10966_v40 = vld [vmem:[#allocation28_spill] sm:$0xff] }
 0x36e   : > { %7126 = vpow2.f32 %v2601_v46  ;;  %2885 = vadd.xlane.f32.xlu1 %v9589_v53  ;;  %4480 = vst [vmem:[%s9071_s27 + $0x108] sm:$0xff] %v3064_v17  ;;  %10962 = vst [vmem:[#allocation119_spill] sm:$0xff] %v9606_v15  ;;  %v9608_v39 = vpop.eup %7114  ;;  %v2635_v23 = vmul.f32 1.442695, %v2385_v20  ;;  %v786_v53 = vld [vmem:[%s8411_s21 + $0x218] sm:$0xff]  ;;  %v10967_v52 = vld [vmem:[#allocation128_spill] sm:$0xff] }
 0x36f   : > { %7128 = vpow2.f32 %v2631_v10  ;;  %v2748_v56 = vpop.xlane.xlu1 %2747  ;;  %10963 = vst [vmem:[#allocation55_spill] sm:$0xff] %v9608_v39  ;;  %v10964_v10 = vld [vmem:[#allocation122_spill] sm:$0xff]  ;;  %v9615_v41 = vpop.eup %7116  ;;  %v2372_v42 = vsub.f32 %v10967_v52, %v9517_v44 }
 0x370   : > { %v2716_v46 = vpop.xlane.xlu0 %2715  ;;  %7130 = vrcp.f32 %v2748_v56  ;;  %2853 = vadd.xlane.f32.xlu0 %v9599_v5  ;;  %v2369_v45 = vsub.f32 %v10964_v10, %v9503_v37  ;;  %v785_v5 = vld [vmem:[%s8411_s21 + $0x210] sm:$0xff]  ;;  %v10971_v44 = vld [vmem:[#allocation30_spill] sm:$0xff] }
 0x371   : > { %7132 = vrcp.f32 %v2716_v46 }
 0x372   : > { %7134 = vpow2.f32 %v2599_v1  ;;  %2883 = vadd.xlane.f32.xlu1 %v9606_v15  ;;  %v7119_v1 = vpop.eup %7118  ;;  %v9621_v15 = vpack.c.bf16 %v802_v47, %v801_v13  ;;  %v2603_v20 = vmul.f32 1.442695, %v2369_v45 }
 0x373   : > { %7136 = vpow2.f32 %v2637_v63  ;;  %v2754_v56 = vpop.xlane.xlu1 %2753  ;;  %v7121_v37 = vpop.eup %7120  ;;  %v3079_v10 = vmul.f32 %v7119_v1, %v10966_v40  ;;  %v10969_v1 = vld [vmem:[#allocation134_spill] sm:$0xff]  ;;  %v10970_v40 = vld [vmem:[#allocation124_spill] sm:$0xff] }
 0x374   : > { %v2722_v46 = vpop.xlane.xlu0 %2721  ;;  %7138 = vrcp.f32 %v2754_v56  ;;  %2851 = vadd.xlane.f32.xlu0 %v9608_v39  ;;  %v10968_v56 = vld [vmem:[#allocation123_spill] sm:$0xff]  ;;  %v2387_v13 = vsub.f32 %v10969_v1, %v9529_v16 }
 0x375   : > { %7140 = vrcp.f32 %v2722_v46  ;;  %v3063_v39 = vmul.f32 %v7121_v37, %v10968_v56  ;;  %v2641_v46 = vmul.f32 1.442695, %v2388_v32  ;;  %5983 = vmatprep.mubr.f32.mxu1 %v3079_v10  ;;  %4495 = vst [vmem:[%s9071_s27 + $0x180] sm:$0xff] %v3079_v10  ;;  %v6619_v32 = vpack.c.bf16 %v786_v53, %v785_v5  ;;  %v804_v53 = vld [vmem:[%s8411_s21 + $0x2a8] sm:$0xff]  ;;  %v10974_v56 = vld [vmem:[#allocation131_spill] sm:$0xff] }
 0x376   : > { %v7123_v63 = vpop.eup %7122  ;;  %7142 = vpow2.f32 %v2605_v43  ;;  %2889 = vadd.xlane.f32.xlu1 %v9615_v41  ;;  %5984 = vmatmul.mubr.f32.vlgmr.msra.gmra.mrb[80].mxu1 %v3080_v7  ;;  %v2609_v10 = vmul.f32 1.442695, %v2372_v42 }
 0x377   : > { %v7125_v60 = vpop.eup %7124  ;;  %7144 = vpow2.f32 %v2635_v23  ;;  %v2752_v47 = vpop.xlane.xlu1 %2751  ;;  %v3082_v45 = vmul.f32 %v7123_v63, %v10970_v40  ;;  %5927 = vmatprep.mubr.f32.mxu0 %v3063_v39  ;;  %4479 = vst [vmem:[%s9071_s27 + $0x100] sm:$0xff] %v3063_v39  ;;  %v10972_v63 = vld [vmem:[#allocation130_spill] sm:$0xff]  ;;  %6650 = vmatpush3.bf16.msra.mxu1 %v9265_v59  ;;  %v10973_v39 = vld [vmem:[#allocation32_spill] sm:$0xff] }
 0x378   : > { %v2720_v43 = vpop.xlane.xlu0 %2719  ;;  %v9633_v0 = vpop.eup %7126  ;;  %7146 = vrcp.f32 %v2752_v47  ;;  %v3066_v23 = vmul.f32 %v7125_v60, %v10971_v44  ;;  %5928 = vmatmul.mubr.f32.vlgmr.msra.gmra.mrb[80].mxu0 %v3064_v17  ;;  %v2371_v7 = vsub.f32 %v10972_v63, %v9531_v54  ;;  %v803_v60 = vld [vmem:[%s8411_s21 + $0x2a0] sm:$0xff]  ;;  %v2639_v17 = vmul.f32 1.442695, %v2387_v13  ;;  %6652 = vmatprep.subr.bf16.mxu1 %v9621_v15  ;;  %v788_v47 = vld [vmem:[%s8411_s21 + $0x228] sm:$0xff]  ;;  %v10976_v44 = vld [vmem:[#allocation137_spill] sm:$0xff] }
 0x379   : > { %v9637_v16 = vpop.eup %7128  ;;  %2857 = vadd.xlane.f32.xlu0 %v9633_v0  ;;  %7148 = vrcp.f32 %v2720_v43  ;;  %4498 = vst [vmem:[%s9071_s27 + $0x198] sm:$0xff] %v3082_v45  ;;  %v2389_v52 = vsub.f32 %v10973_v39, %v9567_v18  ;;  %6618 = vmatpush3.bf16.msra.mxu0 %v9273_v3  ;;  %v787_v54 = vld [vmem:[%s8411_s21 + $0x220] sm:$0xff]  ;;  %v6655_v18 = vpack.c.bf16 %v804_v53, %v803_v60  ;;  %v10977_v39 = vld [vmem:[#allocation20_spill] sm:$0xff] }
 0x37a   : > { %v7131_v37 = vpop.eup %7130  ;;  %7150 = vpow2.f32 %v2603_v20  ;;  %2887 = vadd.xlane.f32.xlu1 %v9637_v16  ;;  %4482 = vst [vmem:[%s9071_s27 + $0x118] sm:$0xff] %v3066_v23  ;;  %6620 = vmatprep.subr.bf16.mxu0 %v6619_v32  ;;  %v2607_v40 = vmul.f32 1.442695, %v2371_v7  ;;  %v6623_v63 = vpack.c.bf16 %v788_v47, %v787_v54  ;;  %v10978_v7 = vld [vmem:[#allocation19_spill] sm:$0xff]  ;;  %v10980_v47 = vld [vmem:[#allocation136_spill] sm:$0xff] }
 0x37b   : > { %v7133_v5 = vpop.eup %7132  ;;  %7152 = vpow2.f32 %v2641_v46  ;;  %v2758_v20 = vpop.xlane.xlu1 %2757  ;;  %v3081_v1 = vmul.f32 %v7131_v37, %v10974_v56  ;;  %v10975_v46 = vld [vmem:[#allocation29_spill] sm:$0xff]  ;;  %v2373_v37 = vsub.f32 %v10976_v44, %v9569_v24  ;;  %v10979_v56 = vld [vmem:[#allocation82_spill] sm:$0xff]  ;;  %6654 = vmatpush3.bf16.msra.mxu1 %v9621_v15 }
 0x37c   : > { %v2726_v42 = vpop.xlane.xlu0 %2725  ;;  %v9655_v59 = vpop.eup %7134  ;;  %7154 = vrcp.f32 %v2758_v20  ;;  %v3065_v13 = vmul.f32 %v7133_v5, %v10975_v46  ;;  %v2390_v20 = vsub.f32 %v10977_v39, %v9543_v55  ;;  %v805_v55 = vld [vmem:[%s8411_s21 + $0x2b0] sm:$0xff]  ;;  %6656 = vmatprep.subr.bf16.mxu1 %v6655_v18  ;;  %v2374_v46 = vsub.f32 %v10980_v47, %v9545_v27  ;;  %v10982_v27 = vld [vmem:[#allocation22_spill] sm:$0xff]  ;;  %v791_v47 = vld [vmem:[%s8411_s21 + $0x240] sm:$0xff] }
 0x37d   : > { %v9658_v43 = vpop.eup %7136  ;;  %2855 = vadd.xlane.f32.xlu0 %v9655_v59  ;;  %7156 = vrcp.f32 %v2726_v42  ;;  %5986 = vmatprep.mubr.f32.mxu1 %v3081_v1  ;;  %4497 = vst [vmem:[%s9071_s27 + $0x190] sm:$0xff] %v3081_v1  ;;  %v2643_v42 = vmul.f32 1.442695, %v2389_v52  ;;  %v790_v52 = vld [vmem:[%s8411_s21 + $0x238] sm:$0xff]  ;;  %v2611_v15 = vmul.f32 1.442695, %v2373_v37 }
 0x37e   : > { %v7139_v3 = vpop.eup %7138  ;;  %7158 = vpow2.f32 %v2609_v10  ;;  %2893 = vadd.xlane.f32.xlu1 %v9658_v43  ;;  %5930 = vmatprep.mubr.f32.mxu0 %v3065_v13  ;;  %4481 = vst [vmem:[%s9071_s27 + $0x110] sm:$0xff] %v3065_v13  ;;  %v2645_v13 = vmul.f32 1.442695, %v2390_v20  ;;  %v792_v20 = vld [vmem:[%s8411_s21 + $0x248] sm:$0xff] }
 0x37f   : > { %v7141_v5 = vpop.eup %7140  ;;  %7160 = vpow2.f32 %v2639_v17  ;;  %5987 = vmatmul.mubr.f32.gmra.mrb[82].mxu1 %v3082_v45  ;;  %v2756_v10 = vpop.xlane.xlu1 %2755  ;;  %5931 = vmatmul.mubr.f32.gmra.mrb[82].mxu0 %v3066_v23  ;;  %v3084_v60 = vmul.f32 %v7139_v3, %v10978_v7  ;;  %v806_v45 = vld [vmem:[%s8411_s21 + $0x2b8] sm:$0xff]  ;;  %v789_v23 = vld [vmem:[%s8411_s21 + $0x230] sm:$0xff] }
 0x380   : > { %v2724_v24 = vpop.xlane.xlu0 %2723  ;;  %v9669_v53 = vpop.eup %7142  ;;  %7162 = vrcp.f32 %v2756_v10  ;;  %v3068_v1 = vmul.f32 %v7141_v5, %v10979_v56  ;;  %6622 = vmatpush3.bf16.msra.mxu0 %v6619_v32  ;;  %v10981_v5 = vld [vmem:[#allocation81_spill] sm:$0xff]  ;;  %6658 = vmatpush3.bf16.msra.mxu1 %v6655_v18  ;;  %v6627_v7 = vpack.c.bf16 %v790_v52, %v789_v23  ;;  %v808_v56 = vld [vmem:[%s8411_s21 + $0x2c8] sm:$0xff] }
 0x381   : > { %v9674_v17 = vpop.eup %7144  ;;  %2861 = vadd.xlane.f32.xlu0 %v9669_v53  ;;  %7164 = vrcp.f32 %v2724_v24  ;;  %4500 = vst [vmem:[%s9071_s27 + $0x1a8] sm:$0xff] %v3084_v60  ;;  %6624 = vmatprep.subr.bf16.mxu0 %v6623_v63  ;;  %v6659_v24 = vpack.c.bf16 %v806_v45, %v805_v55  ;;  %v10983_v45 = vld [vmem:[#allocation33_spill] sm:$0xff] }
 0x382   : > { %v7147_v54 = vpop.eup %7146  ;;  %7166 = vpow2.f32 %v2607_v40  ;;  %2891 = vadd.xlane.f32.xlu1 %v9674_v17  ;;  %4484 = vst [vmem:[%s9071_s27 + $0x128] sm:$0xff] %v3068_v1  ;;  %v807_v40 = vld [vmem:[%s8411_s21 + $0x2c0] sm:$0xff] }
 0x383   : > { %v7149_v32 = vpop.eup %7148  ;;  %7168 = vpow2.f32 %v2643_v42  ;;  %v2762_v3 = vpop.xlane.xlu1 %2761  ;;  %v3083_v39 = vmul.f32 %v7147_v54, %v10981_v5  ;;  %v2613_v5 = vmul.f32 1.442695, %v2374_v46  ;;  %v6663_v52 = vpack.c.bf16 %v808_v56, %v807_v40  ;;  %v10984_v46 = vld [vmem:[#allocation84_spill] sm:$0xff]  ;;  %6660 = vmatprep.subr.bf16.mxu1 %v6659_v24  ;;  %v793_v56 = vld [vmem:[%s8411_s21 + $0x250] sm:$0xff] }
 0x384   : > { %v2730_v44 = vpop.xlane.xlu0 %2729  ;;  %v9687_v10 = vpop.eup %7150  ;;  %7170 = vrcp.f32 %v2762_v3  ;;  %v3067_v37 = vmul.f32 %v7149_v32, %v10982_v27  ;;  %6626 = vmatpush3.bf16.msra.mxu0 %v6623_v63  ;;  %v6631_v32 = vpack.c.bf16 %v792_v20, %v791_v47  ;;  %6662 = vmatpush3.bf16.msra.mxu1 %v6659_v24  ;;  %v10985_v27 = vld [vmem:[#allocation36_spill] sm:$0xff]  ;;  %v794_v47 = vld [vmem:[%s8411_s21 + $0x258] sm:$0xff]  ;;  %v10986_v24 = vld [vmem:[#allocation35_spill] sm:$0xff] }
 0x385   : > { %v9693_v42 = vpop.eup %7152  ;;  %2859 = vadd.xlane.f32.xlu0 %v9687_v10  ;;  %7172 = vrcp.f32 %v2730_v44  ;;  %5989 = vmatprep.mubr.f32.mxu1 %v3083_v39  ;;  %4499 = vst [vmem:[%s9071_s27 + $0x1a0] sm:$0xff] %v3083_v39  ;;  %v810_v44 = vld [vmem:[%s8411_s21 + $0x2d8] sm:$0xff] }
 0x386   : > { %v7155_v54 = vpop.eup %7154  ;;  %7174 = vpow2.f32 %v2611_v15  ;;  %2897 = vadd.xlane.f32.xlu1 %v9693_v42  ;;  %5933 = vmatprep.mubr.f32.mxu0 %v3067_v37  ;;  %4483 = vst [vmem:[%s9071_s27 + $0x120] sm:$0xff] %v3067_v37 }
 0x387   : > { %v7157_v18 = vpop.eup %7156  ;;  %7176 = vpow2.f32 %v2645_v13  ;;  %5990 = vmatmul.mubr.f32.gmra.mrb[84].mxu1 %v3084_v60  ;;  %v2760_v63 = vpop.xlane.xlu1 %2759  ;;  %5934 = vmatmul.mubr.f32.gmra.mrb[84].mxu0 %v3068_v1  ;;  %v3086_v23 = vmul.f32 %v7155_v54, %v10983_v45  ;;  %v809_v1 = vld [vmem:[%s8411_s21 + $0x2d0] sm:$0xff] }
 0x388   : > { %v2728_v55 = vpop.xlane.xlu0 %2727  ;;  %v9700_v3 = vpop.eup %7158  ;;  %7178 = vrcp.f32 %v2760_v63  ;;  %v3070_v15 = vmul.f32 %v7157_v18, %v10984_v46  ;;  %6628 = vmatprep.subr.bf16.mxu0 %v6627_v7  ;;  %6664 = vmatprep.subr.bf16.mxu1 %v6663_v52  ;;  %v6667_v18 = vpack.c.bf16 %v810_v44, %v809_v1  ;;  %v811_v44 = vld [vmem:[%s8411_s21 + $0x2e0] sm:$0xff] }
 0x389   : > { %v9703_v13 = vpop.eup %7160  ;;  %2865 = vadd.xlane.f32.xlu0 %v9700_v3  ;;  %7180 = vrcp.f32 %v2728_v55  ;;  %4502 = vst [vmem:[%s9071_s27 + $0x1b8] sm:$0xff] %v3086_v23  ;;  %6630 = vmatpush3.bf16.msra.mxu0 %v6627_v7  ;;  %v6635_v55 = vpack.c.bf16 %v794_v47, %v793_v56  ;;  %v796_v56 = vld [vmem:[%s8411_s21 + $0x268] sm:$0xff] }
 0x38a   : > { %v7163_v60 = vpop.eup %7162  ;;  %7182 = vpow2.f32 %v2613_v5  ;;  %2895 = vadd.xlane.f32.xlu1 %v9703_v13  ;;  %4486 = vst [vmem:[%s9071_s27 + $0x138] sm:$0xff] %v3070_v15  ;;  %6632 = vmatprep.subr.bf16.mxu0 %v6631_v32 }
 0x38b   : > { %v7165_v39 = vpop.eup %7164  ;;  %v2766_v40 = vpop.xlane.xlu1 %2765  ;;  %v3085_v37 = vmul.f32 %v7163_v60, %v10985_v27  ;;  %v10987_v60 = vld [vmem:[#allocation38_spill] sm:$0xff]  ;;  %6666 = vmatpush3.bf16.msra.mxu1 %v6663_v52  ;;  %v812_v27 = vld [vmem:[%s8411_s21 + $0x2e8] sm:$0xff] }
 0x38c   : > { %v9714_v20 = vpop.eup %7166  ;;  %7184 = vrcp.f32 %v2766_v40  ;;  %v3069_v54 = vmul.f32 %v7165_v39, %v10986_v24  ;;  %6668 = vmatprep.subr.bf16.mxu1 %v6667_v18  ;;  %v814_v52 = vld [vmem:[%s8411_s21 + $0x2f8] sm:$0xff] }
 0x38d   : > { %v9717_v5 = vpop.eup %7168  ;;  %2863 = vadd.xlane.f32.xlu0 %v9714_v20  ;;  %v2734_v7 = vpop.xlane.xlu0 %2733  ;;  %5992 = vmatprep.mubr.f32.mxu1 %v3085_v37  ;;  %4501 = vst [vmem:[%s9071_s27 + $0x1b0] sm:$0xff] %v3085_v37 }
 0x38e   : > { %v7171_v63 = vpop.eup %7170  ;;  %7186 = vrcp.f32 %v2734_v7  ;;  %2899 = vadd.xlane.f32.xlu1 %v9717_v5  ;;  %5936 = vmatprep.mubr.f32.mxu0 %v3069_v54  ;;  %4485 = vst [vmem:[%s9071_s27 + $0x130] sm:$0xff] %v3069_v54  ;;  %v6671_v7 = vpack.c.bf16 %v812_v27, %v811_v44 }
 0x38f   : > { %v7173_v45 = vpop.eup %7172  ;;  %5993 = vmatmul.mubr.f32.gmra.mrb[86].mxu1 %v3086_v23  ;;  %v2764_v46 = vpop.xlane.xlu1 %2763  ;;  %5937 = vmatmul.mubr.f32.gmra.mrb[86].mxu0 %v3070_v15  ;;  %v3088_v39 = vmul.f32 %v7171_v63, %v10987_v60  ;;  %v795_v15 = vld [vmem:[%s8411_s21 + $0x260] sm:$0xff]  ;;  %v797_v63 = vld [vmem:[%s8411_s21 + $0x270] sm:$0xff] }
 0x390   : > { %v9724_v40 = vpop.eup %7174  ;;  %7188 = vrcp.f32 %v2764_v46  ;;  %v3072_v1 = vmul.f32 %v7173_v45, %v9079_v58  ;;  %6634 = vmatpush3.bf16.msra.mxu0 %v6631_v32  ;;  %v813_v58 = vld [vmem:[%s8411_s21 + $0x2f0] sm:$0xff]  ;;  %v798_v45 = vld [vmem:[%s8411_s21 + $0x278] sm:$0xff]  ;;  %v10990_v60 = vld [vmem:[#allocation39_spill] sm:$0xff]  ;;  %6670 = vmatpush3.bf16.msra.mxu1 %v6667_v18 }
 0x391   : > { %10988 = vst [vmem:[#allocation54_spill] sm:$0xff] %v9724_v40  ;;  %v9729_v37 = vpop.eup %7176  ;;  %2867 = vadd.xlane.f32.xlu0 %v9724_v40  ;;  %v2732_v23 = vpop.xlane.xlu0 %2731  ;;  %4504 = vst [vmem:[%s9071_s27 + $0x1c8] sm:$0xff] %v3088_v39  ;;  %6636 = vmatprep.subr.bf16.mxu0 %v6635_v55  ;;  %v6643_v27 = vpack.c.bf16 %v798_v45, %v797_v63 }
 0x392   : > { %10989 = vst [vmem:[#allocation125_spill] sm:$0xff] %v9729_v37  ;;  %v7179_v47 = vpop.eup %7178  ;;  %7190 = vrcp.f32 %v2732_v23  ;;  %2901 = vadd.xlane.f32.xlu1 %v9729_v37  ;;  %4488 = vst [vmem:[%s9071_s27 + $0x148] sm:$0xff] %v3072_v1  ;;  %v6639_v37 = vpack.c.bf16 %v796_v56, %v795_v15  ;;  %6672 = vmatprep.subr.bf16.mxu1 %v6671_v7  ;;  %v831_v15 = vld [vmem:[%s8411_s21 + $0x380] sm:$0xff]  ;;  %v832_v56 = vld [vmem:[%s8411_s21 + $0x388] sm:$0xff] }
 0x393   : > { %v7181_v32 = vpop.eup %7180  ;;  %v2770_v24 = vpop.xlane.xlu1 %2769  ;;  %v3087_v54 = vmul.f32 %v7179_v47, %v9086_v21  ;;  %v6675_v21 = vpack.c.bf16 %v814_v52, %v813_v58  ;;  %v815_v58 = vld [vmem:[%s8411_s21 + $0x300] sm:$0xff] }
 0x394   : > { %v9742_v46 = vpop.eup %7182  ;;  %7192 = vrcp.f32 %v2770_v24  ;;  %v3071_v23 = vmul.f32 %v7181_v32, %v10990_v60  ;;  %6638 = vmatpush3.bf16.msra.mxu0 %v6635_v55  ;;  %6674 = vmatpush3.bf16.msra.mxu1 %v6671_v7 }
 0x395   : > { %2869 = vadd.xlane.f32.xlu0 %v9742_v46  ;;  %v2738_v40 = vpop.xlane.xlu0 %2737  ;;  %5995 = vmatprep.mubr.f32.mxu1 %v3087_v54  ;;  %4503 = vst [vmem:[%s9071_s27 + $0x1c0] sm:$0xff] %v3087_v54 }
 0x396   : > { %v7185_v44 = vpop.eup %7184  ;;  %7194 = vrcp.f32 %v2738_v40  ;;  %5939 = vmatprep.mubr.f32.mxu0 %v3071_v23  ;;  %4487 = vst [vmem:[%s9071_s27 + $0x140] sm:$0xff] %v3071_v23  ;;  %5996 = vmatmul.mubr.f32.gmra.mrb[88].mxu1 %v3088_v39  ;;  %v816_v40 = vld [vmem:[%s8411_s21 + $0x308] sm:$0xff] }
 0x397   : > { %v2768_v18 = vpop.xlane.xlu1 %2767  ;;  %5940 = vmatmul.mubr.f32.gmra.mrb[88].mxu0 %v3072_v1  ;;  %v3090_v55 = vmul.f32 %v7185_v44, %v9111_v22  ;;  %6640 = vmatprep.subr.bf16.mxu0 %v6639_v37  ;;  %v9755_v22 = vpack.c.bf16 %v832_v56, %v831_v15  ;;  %v9759_v54 = vpack.c.bf16 %v816_v40, %v815_v58 }
 0x398   : > { %v7187_v47 = vpop.eup %7186  ;;  %7196 = vrcp.f32 %v2768_v18  ;;  %6642 = vmatpush3.bf16.msra.mxu0 %v6639_v37  ;;  %6676 = vmatprep.subr.bf16.mxu1 %v6675_v21 }
 0x399   : > { %v2736_v52 = vpop.xlane.xlu0 %2735  ;;  %4506 = vst [vmem:[%s9071_s27 + $0x1d8] sm:$0xff] %v3090_v55  ;;  %v3074_v32 = vmul.f32 %v7187_v47, %v9130_v9  ;;  %6644 = vmatprep.subr.bf16.mxu0 %v6643_v27  ;;  %6678 = vmatpush3.bf16.msra.mxu1 %v6675_v21 }
 0x39a   : > { %v7189_v39 = vpop.eup %7188  ;;  %7198 = vrcp.f32 %v2736_v52  ;;  %6712 = vmatprep.subr.bf16.mxu1 %v9755_v22 }
 0x39b   : > { %v2774_v1 = vpop.xlane.xlu1 %2773  ;;  %v3089_v24 = vmul.f32 %v7189_v39, %v9135_v26  ;;  %4490 = vst [vmem:[%s9071_s27 + $0x158] sm:$0xff] %v3074_v32 }
 0x39c   : > { %v7191_v7 = vpop.eup %7190  ;;  %7200 = vrcp.f32 %v2774_v1  ;;  %6646 = vmatpush3.bf16.msra.mxu0 %v6643_v27 }
 0x39d   : > { %v2742_v63 = vpop.xlane.xlu0 %2741  ;;  %5998 = vmatprep.mubr.f32.mxu1 %v3089_v24  ;;  %4505 = vst [vmem:[%s9071_s27 + $0x1d0] sm:$0xff] %v3089_v24  ;;  %v3073_v9 = vmul.f32 %v7191_v7, %v9149_v49  ;;  %6680 = vmatprep.subr.bf16.mxu0 %v9759_v54 }
 0x39e   : > { %v7193_v37 = vpop.eup %7192  ;;  %7202 = vrcp.f32 %v2742_v63  ;;  %5999 = vmatmul.mubr.f32.gmra.mrb[90].mxu1 %v3090_v55 }
 0x39f   : > { %5942 = vmatprep.mubr.f32.mxu0 %v3073_v9  ;;  %4489 = vst [vmem:[%s9071_s27 + $0x150] sm:$0xff] %v3073_v9  ;;  %v2772_v26 = vpop.xlane.xlu1 %2771  ;;  %v3092_v45 = vmul.f32 %v7193_v37, %v9153_v38  ;;  %v834_v9 = vld [vmem:[%s8411_s21 + $0x398] sm:$0xff] }
 0x3a0   : > { %v7195_v60 = vpop.eup %7194  ;;  %7204 = vrcp.f32 %v2772_v26  ;;  %5943 = vmatmul.mubr.f32.gmra.mrb[90].mxu0 %v3074_v32 }
 0x3a1   : > { %v2740_v23 = vpop.xlane.xlu0 %2739  ;;  %4508 = vst [vmem:[%s9071_s27 + $0x1e8] sm:$0xff] %v3092_v45  ;;  %v3076_v49 = vmul.f32 %v7195_v60, %v9169_v34  ;;  %v818_v60 = vld [vmem:[%s8411_s21 + $0x318] sm:$0xff] }
 0x3a2   : > { %v7197_v21 = vpop.eup %7196  ;;  %7206 = vrcp.f32 %v2740_v23 }
 0x3a3   : > { %v2810_v44 = vpop.xlane.xlu1 %2809  ;;  %v3091_v27 = vmul.f32 %v7197_v21, %v9173_v50  ;;  %4492 = vst [vmem:[%s9071_s27 + $0x168] sm:$0xff] %v3076_v49 }
 0x3a4   : > { %v7199_v18 = vpop.eup %7198  ;;  %7208 = vrcp.f32 %v2810_v44  ;;  %v835_v44 = vld [vmem:[%s8411_s21 + $0x3a0] sm:$0xff] }
 0x3a5   : > { %v2778_v38 = vpop.xlane.xlu0 %2777  ;;  %6001 = vmatprep.mubr.f32.mxu1 %v3091_v27  ;;  %4507 = vst [vmem:[%s9071_s27 + $0x1e0] sm:$0xff] %v3091_v27  ;;  %v3075_v55 = vmul.f32 %v7199_v18, %v9185_v48  ;;  %v836_v27 = vld [vmem:[%s8411_s21 + $0x3a8] sm:$0xff] }
 0x3a6   : > { %v7201_v15 = vpop.eup %7200  ;;  %7210 = vrcp.f32 %v2778_v38  ;;  %6002 = vmatmul.mubr.f32.gmra.mrb[92].mxu1 %v3092_v45  ;;  %v817_v45 = vld [vmem:[%s8411_s21 + $0x310] sm:$0xff] }
 0x3a7   : > { %5945 = vmatprep.mubr.f32.mxu0 %v3075_v55  ;;  %4491 = vst [vmem:[%s9071_s27 + $0x160] sm:$0xff] %v3075_v55  ;;  %v2808_v34 = vpop.xlane.xlu1 %2807  ;;  %v3094_v56 = vmul.f32 %v7201_v15, %v9189_v29  ;;  %v819_v15 = vld [vmem:[%s8411_s21 + $0x320] sm:$0xff] }
 0x3a8   : > { %v7203_v50 = vpop.eup %7202  ;;  %7212 = vrcp.f32 %v2808_v34  ;;  %5946 = vmatmul.mubr.f32.gmra.mrb[92].mxu0 %v3076_v49  ;;  %v820_v34 = vld [vmem:[%s8411_s21 + $0x328] sm:$0xff] }
 0x3a9   : > { %v2776_v47 = vpop.xlane.xlu0 %2775  ;;  %4510 = vst [vmem:[%s9071_s27 + $0x1f8] sm:$0xff] %v3094_v56  ;;  %v3078_v58 = vmul.f32 %v7203_v50, %v9203_v4 }
 0x3aa   : > { %v7205_v40 = vpop.eup %7204  ;;  %7214 = vrcp.f32 %v2776_v47 }
 0x3ab   : > { %v2814_v48 = vpop.xlane.xlu1 %2813  ;;  %v3093_v52 = vmul.f32 %v7205_v40, %v9210_v35  ;;  %4494 = vst [vmem:[%s9071_s27 + $0x178] sm:$0xff] %v3078_v58 }
 0x3ac   : > { %v7207_v32 = vpop.eup %7206  ;;  %7216 = vrcp.f32 %v2814_v48 }
 0x3ad   : > { %v2782_v39 = vpop.xlane.xlu0 %2781  ;;  %6004 = vmatprep.mubr.f32.mxu1 %v3093_v52  ;;  %4509 = vst [vmem:[%s9071_s27 + $0x1f0] sm:$0xff] %v3093_v52  ;;  %v3077_v29 = vmul.f32 %v7207_v32, %v9224_v12  ;;  %v833_v12 = vld [vmem:[%s8411_s21 + $0x390] sm:$0xff] }
 0x3ae   : > { %v7209_v1 = vpop.eup %7208  ;;  %7218 = vrcp.f32 %v2782_v39  ;;  %6005 = vmatmul.mubr.f32.gmra.mrb[94].mxu1 %v3094_v56  ;;  %v6715_v49 = vpack.c.bf16 %v834_v9, %v833_v12  ;;  %v821_v32 = vld [vmem:[%s8411_s21 + $0x330] sm:$0xff]  ;;  %v822_v39 = vld [vmem:[%s8411_s21 + $0x338] sm:$0xff]  ;;  %v823_v12 = vld [vmem:[%s8411_s21 + $0x340] sm:$0xff] }
 0x3af   : > { %v3112_v4 = vmul.f32 %v7209_v1, %v9228_v19  ;;  %5948 = vmatprep.mubr.f32.mxu0 %v3077_v29  ;;  %4493 = vst [vmem:[%s9071_s27 + $0x170] sm:$0xff] %v3077_v29  ;;  %v2812_v35 = vpop.xlane.xlu1 %2811  ;;  %v824_v9 = vld [vmem:[%s8411_s21 + $0x348] sm:$0xff] }
 0x3b0   : > { %v7211_v24 = vpop.eup %7210  ;;  %7220 = vrcp.f32 %v2812_v35  ;;  %5949 = vmatmul.mubr.f32.gmra.mrb[94].mxu0 %v3078_v58  ;;  %v837_v58 = vld [vmem:[%s8411_s21 + $0x3b0] sm:$0xff]  ;;  %v840_v35 = vld [vmem:[%s8411_s21 + $0x3c8] sm:$0xff] }
 0x3b1   : > { %4528 = vst [vmem:[%s9071_s27 + $0x288] sm:$0xff] %v3112_v4  ;;  %v3096_v7 = vmul.f32 %v7211_v24, %v9245_v25  ;;  %v2780_v63 = vpop.xlane.xlu0 %2779  ;;  %v6691_v24 = vpack.c.bf16 %v822_v39, %v821_v32 }
 0x3b2   : > { %v7213_v37 = vpop.eup %7212  ;;  %7222 = vrcp.f32 %v2780_v63 }
 0x3b3   : > { %4512 = vst [vmem:[%s9071_s27 + $0x208] sm:$0xff] %v3096_v7  ;;  %v2818_v19 = vpop.xlane.xlu1 %2817  ;;  %v3111_v26 = vmul.f32 %v7213_v37, %v9249_v2  ;;  %v6683_v2 = vpack.c.bf16 %v818_v60, %v817_v45  ;;  %v841_v45 = vld [vmem:[%s8411_s21 + $0x3d0] sm:$0xff]  ;;  %v842_v60 = vld [vmem:[%s8411_s21 + $0x3d8] sm:$0xff] }
 0x3b4   : > { %v7215_v23 = vpop.eup %7214  ;;  %7224 = vrcp.f32 %v2818_v19 }
 0x3b5   : > { %v2786_v25 = vpop.xlane.xlu0 %2785  ;;  %6095 = vmatprep.mubr.f32.mxu1 %v3111_v26  ;;  %4527 = vst [vmem:[%s9071_s27 + $0x280] sm:$0xff] %v3111_v26  ;;  %v3095_v21 = vmul.f32 %v7215_v23, %v9267_v51  ;;  %v6719_v51 = vpack.c.bf16 %v836_v27, %v835_v44  ;;  %v826_v44 = vld [vmem:[%s8411_s21 + $0x358] sm:$0xff] }
 0x3b6   : > { %v7217_v18 = vpop.eup %7216  ;;  %7226 = vrcp.f32 %v2786_v25  ;;  %6096 = vmatmul.mubr.f32.vlgmr.msra.gmra.mrb[96].mxu1 %v3112_v4  ;;  %v839_v4 = vld [vmem:[%s8411_s21 + $0x3c0] sm:$0xff] }
 0x3b7   : > { %6039 = vmatprep.mubr.f32.mxu0 %v3095_v21  ;;  %4511 = vst [vmem:[%s9071_s27 + $0x200] sm:$0xff] %v3095_v21  ;;  %v2816_v38 = vpop.xlane.xlu1 %2815  ;;  %v3114_v55 = vmul.f32 %v7217_v18, %v9285_v57  ;;  %6714 = vmatpush3.bf16.msra.mxu1 %v9755_v22  ;;  %v838_v57 = vld [vmem:[%s8411_s21 + $0x3b8] sm:$0xff]  ;;  %v6687_v22 = vpack.c.bf16 %v820_v34, %v819_v15  ;;  %v825_v21 = vld [vmem:[%s8411_s21 + $0x350] sm:$0xff] }
 0x3b8   : > { %v7219_v56 = vpop.eup %7218  ;;  %7228 = vrcp.f32 %v2816_v38  ;;  %6040 = vmatmul.mubr.f32.vlgmr.msra.gmra.mrb[96].mxu0 %v3096_v7  ;;  %6716 = vmatprep.subr.bf16.mxu1 %v6715_v49  ;;  %v6727_v37 = vpack.c.bf16 %v840_v35, %v839_v4  ;;  %v843_v38 = vld [vmem:[%s8411_s21 + $0x3e0] sm:$0xff]  ;;  %v6699_v15 = vpack.c.bf16 %v826_v44, %v825_v21  ;;  %v10994_v21 = vld [vmem:[#allocation41_spill] sm:$0xff] }
 0x3b9   : > { %v2784_v50 = vpop.xlane.xlu0 %2783  ;;  %4530 = vst [vmem:[%s9071_s27 + $0x298] sm:$0xff] %v3114_v55  ;;  %v3098_v47 = vmul.f32 %v7219_v56, %v9289_v62  ;;  %6682 = vmatpush3.bf16.msra.mxu0 %v9759_v54  ;;  %v6723_v62 = vpack.c.bf16 %v838_v57, %v837_v58 }
 0x3ba   : > { %v7221_v40 = vpop.eup %7220  ;;  %7230 = vrcp.f32 %v2784_v50  ;;  %6684 = vmatprep.subr.bf16.mxu0 %v6683_v2  ;;  %v828_v50 = vld [vmem:[%s8411_s21 + $0x368] sm:$0xff] }
 0x3bb   : > { %v2822_v48 = vpop.xlane.xlu1 %2821  ;;  %v3113_v52 = vmul.f32 %v7221_v40, %v9299_v61  ;;  %4514 = vst [vmem:[%s9071_s27 + $0x218] sm:$0xff] %v3098_v47  ;;  %6718 = vmatpush3.bf16.msra.mxu1 %v6715_v49  ;;  %v845_v40 = vld [vmem:[%s8411_s21 + $0x3f0] sm:$0xff] }
 0x3bc   : > { %v7223_v29 = vpop.eup %7222  ;;  %7232 = vrcp.f32 %v2822_v48  ;;  %6720 = vmatprep.subr.bf16.mxu1 %v6719_v51 }
 0x3bd   : > { %v2790_v54 = vpop.xlane.xlu0 %2789  ;;  %6098 = vmatprep.mubr.f32.mxu1 %v3113_v52  ;;  %4529 = vst [vmem:[%s9071_s27 + $0x290] sm:$0xff] %v3113_v52  ;;  %v3097_v1 = vmul.f32 %v7223_v29, %v9303_v28  ;;  %6686 = vmatpush3.bf16.msra.mxu0 %v6683_v2  ;;  %v829_v29 = vld [vmem:[%s8411_s21 + $0x370] sm:$0xff] }
 0x3be   : > { %v7225_v61 = vpop.eup %7224  ;;  %7234 = vrcp.f32 %v2790_v54  ;;  %6099 = vmatmul.mubr.f32.gmra.mrb[98].mxu1 %v3114_v55  ;;  %6688 = vmatprep.subr.bf16.mxu0 %v6687_v22  ;;  %v844_v55 = vld [vmem:[%s8411_s21 + $0x3e8] sm:$0xff] }
 0x3bf   : > { %6042 = vmatprep.mubr.f32.mxu0 %v3097_v1  ;;  %4513 = vst [vmem:[%s9071_s27 + $0x210] sm:$0xff] %v3097_v1  ;;  %v2820_v7 = vpop.xlane.xlu1 %2819  ;;  %v3116_v63 = vmul.f32 %v7225_v61, %v9319_v11  ;;  %6722 = vmatpush3.bf16.msra.mxu1 %v6719_v51  ;;  %v6695_v11 = vpack.c.bf16 %v824_v9, %v823_v12  ;;  %v827_v51 = vld [vmem:[%s8411_s21 + $0x360] sm:$0xff]  ;;  %v10991_v61 = vld [vmem:[#allocation37_spill] sm:$0xff]  ;;  %v10992_v9 = vld [vmem:[#allocation42_spill] sm:$0xff] }
 0x3c0   : > { %v7227_v28 = vpop.eup %7226  ;;  %7236 = vrcp.f32 %v2820_v7  ;;  %6043 = vmatmul.mubr.f32.gmra.mrb[98].mxu0 %v3098_v47  ;;  %6724 = vmatprep.subr.bf16.mxu1 %v6723_v62  ;;  %v6735_v47 = vpack.c.bf16 %v844_v55, %v843_v38  ;;  %v6703_v48 = vpack.c.bf16 %v828_v50, %v827_v51  ;;  %v10997_v50 = vld [vmem:[#allocation144_spill] sm:$0xff] }
 0x3c1   : > { %v2788_v19 = vpop.xlane.xlu0 %2787  ;;  %4532 = vst [vmem:[%s9071_s27 + $0x2a8] sm:$0xff] %v3116_v63  ;;  %v3100_v26 = vmul.f32 %v7227_v28, %v9323_v6  ;;  %6690 = vmatpush3.bf16.msra.mxu0 %v6687_v22  ;;  %v6731_v6 = vpack.c.bf16 %v842_v60, %v841_v45  ;;  %v846_v22 = vld [vmem:[%s8411_s21 + $0x3f8] sm:$0xff] }
 0x3c2   : > { %v7229_v23 = vpop.eup %7228  ;;  %7238 = vrcp.f32 %v2788_v19  ;;  %6692 = vmatprep.subr.bf16.mxu0 %v6691_v24  ;;  %v6739_v4 = vpack.c.bf16 %v846_v22, %v845_v40 }
 0x3c3   : > { %v2826_v49 = vpop.xlane.xlu1 %2825  ;;  %v3115_v25 = vmul.f32 %v7229_v23, %v9339_v31  ;;  %4516 = vst [vmem:[%s9071_s27 + $0x228] sm:$0xff] %v3100_v26  ;;  %6726 = vmatpush3.bf16.msra.mxu1 %v6723_v62  ;;  %v830_v62 = vld [vmem:[%s8411_s21 + $0x378] sm:$0xff] }
 0x3c4   : > { %v7231_v27 = vpop.eup %7230  ;;  %7240 = vrcp.f32 %v2826_v49  ;;  %6728 = vmatprep.subr.bf16.mxu1 %v6727_v37 }
 0x3c5   : > { %v2794_v18 = vpop.xlane.xlu0 %2793  ;;  %6101 = vmatprep.mubr.f32.mxu1 %v3115_v25  ;;  %4531 = vst [vmem:[%s9071_s27 + $0x2a0] sm:$0xff] %v3115_v25  ;;  %v3099_v2 = vmul.f32 %v7231_v27, %v9343_v30  ;;  %6694 = vmatpush3.bf16.msra.mxu0 %v6691_v24 }
 0x3c6   : > { %v7233_v31 = vpop.eup %7232  ;;  %7242 = vrcp.f32 %v2794_v18  ;;  %6102 = vmatmul.mubr.f32.gmra.mrb[100].mxu1 %v3116_v63  ;;  %6696 = vmatprep.subr.bf16.mxu0 %v6695_v11  ;;  %v6707_v63 = vpack.c.bf16 %v830_v62, %v829_v29  ;;  %v10999_v29 = vld [vmem:[#allocation43_spill] sm:$0xff] }
 0x3c7   : > { %6045 = vmatprep.mubr.f32.mxu0 %v3099_v2  ;;  %4515 = vst [vmem:[%s9071_s27 + $0x220] sm:$0xff] %v3099_v2  ;;  %v2824_v34 = vpop.xlane.xlu1 %2823  ;;  %v3118_v56 = vmul.f32 %v7233_v31, %v9361_v14  ;;  %6730 = vmatpush3.bf16.msra.mxu1 %v6727_v37  ;;  %v10995_v2 = vld [vmem:[#allocation141_spill] sm:$0xff] }
 0x3c8   : > { %v7235_v30 = vpop.eup %7234  ;;  %7244 = vrcp.f32 %v2824_v34  ;;  %6046 = vmatmul.mubr.f32.gmra.mrb[100].mxu0 %v3100_v26  ;;  %6732 = vmatprep.subr.bf16.mxu1 %v6731_v6  ;;  %v10993_v26 = vld [vmem:[#allocation140_spill] sm:$0xff] }
 0x3c9   : > { %v2792_v58 = vpop.xlane.xlu0 %2791  ;;  %4534 = vst [vmem:[%s9071_s27 + $0x2b8] sm:$0xff] %v3118_v56  ;;  %v3102_v57 = vmul.f32 %v7235_v30, %v9369_v33  ;;  %6698 = vmatpush3.bf16.msra.mxu0 %v6695_v11 }
 0x3ca   : > { %v7237_v14 = vpop.eup %7236  ;;  %7246 = vrcp.f32 %v2792_v58  ;;  %6700 = vmatprep.subr.bf16.mxu0 %v6699_v15 }
 0x3cb   : > { %v5873_v52 = vpop.f32.mrb[64].mxu1  ;;  %v2830_v32 = vpop.xlane.xlu1 %2829  ;;  %v3117_v39 = vmul.f32 %v7237_v14, %v9379_v36  ;;  %4518 = vst [vmem:[%s9071_s27 + $0x238] sm:$0xff] %v3102_v57  ;;  %6734 = vmatpush3.bf16.msra.mxu1 %v6731_v6  ;;  %v10998_v14 = vld [vmem:[#allocation88_spill] sm:$0xff] }
 0x3cc   : > { %v7239_v54 = vpop.eup %7238  ;;  %4336 = vst [vmem:[%s9842_s19 + $0x88] sm:$0xff] %v5873_v52  ;;  %v5817_v33 = vpop.f32.mrb[64].mxu0  ;;  %7248 = vrcp.f32 %v2830_v32  ;;  %6736 = vmatprep.subr.bf16.mxu1 %v6735_v47 }
 0x3cd   : > { %v3370_v1 = vpop.f32.mrb[65].mxu1  ;;  %4320 = vst [vmem:[%s9842_s19 + $0x8] sm:$0xff] %v5817_v33  ;;  %v3225_v36 = vpop.f32.mrb[65].mxu0  ;;  %6104 = vmatprep.mubr.f32.mxu1 %v3117_v39  ;;  %4533 = vst [vmem:[%s9071_s27 + $0x2b0] sm:$0xff] %v3117_v39  ;;  %v3101_v24 = vmul.f32 %v7239_v54, %v10991_v61  ;;  %6702 = vmatpush3.bf16.msra.mxu0 %v6699_v15  ;;  %v10996_v15 = vld [vmem:[#allocation44_spill] sm:$0xff] }
 0x3ce   : > { %4335 = vst [vmem:[%s9842_s19 + $0x80] sm:$0xff] %v3370_v1  ;;  %v2798_v35 = vpop.xlane.xlu0 %2797  ;;  %v7241_v7 = vpop.eup %7240  ;;  %4319 = vst [vmem:[%s9842_s19] sm:$0xff] %v3225_v36  ;;  %6105 = vmatmul.mubr.f32.gmra.mrb[102].mxu1 %v3118_v56  ;;  %6704 = vmatprep.subr.bf16.mxu0 %v6703_v48 }
 0x3cf   : > { %7250 = vrcp.f32 %v2798_v35  ;;  %6048 = vmatprep.mubr.f32.mxu0 %v3101_v24  ;;  %4517 = vst [vmem:[%s9071_s27 + $0x230] sm:$0xff] %v3101_v24  ;;  %v2828_v12 = vpop.xlane.xlu1 %2827  ;;  %v3120_v28 = vmul.f32 %v7241_v7, %v10992_v9  ;;  %6738 = vmatpush3.bf16.msra.mxu1 %v6735_v47  ;;  %v11000_v35 = vld [vmem:[#allocation145_spill] sm:$0xff] }
 0x3d0   : > { %v7243_v37 = vpop.eup %7242  ;;  %7252 = vrcp.f32 %v2828_v12  ;;  %6049 = vmatmul.mubr.f32.gmra.mrb[102].mxu0 %v3102_v57  ;;  %6740 = vmatprep.subr.bf16.mxu1 %v6739_v4 }
 0x3d1   : > { %4536 = vst [vmem:[%s9071_s27 + $0x2c8] sm:$0xff] %v3120_v28  ;;  %v3104_v45 = vmul.f32 %v7243_v37, %v10993_v26  ;;  %6706 = vmatpush3.bf16.msra.mxu0 %v6703_v48 }
 0x3d2   : > { %v2796_v19 = vpop.xlane.xlu0 %2795  ;;  %v7245_v60 = vpop.eup %7244  ;;  %6708 = vmatprep.subr.bf16.mxu0 %v6707_v63 }
 0x3d3   : > { %7254 = vrcp.f32 %v2796_v19  ;;  %v5876_v23 = vpop.f32.mrb[66].mxu1  ;;  %v5820_v11 = vpop.f32.mrb[66].mxu0  ;;  %v3119_v44 = vmul.f32 %v7245_v60, %v10994_v21  ;;  %4520 = vst [vmem:[%s9071_s27 + $0x248] sm:$0xff] %v3104_v45  ;;  %6742 = vmatpush3.bf16.msra.mxu1 %v6739_v4 }
 0x3d4   : > { %4338 = vst [vmem:[%s9842_s19 + $0x98] sm:$0xff] %v5876_v23  ;;  %4322 = vst [vmem:[%s9842_s19 + $0x18] sm:$0xff] %v5820_v11  ;;  %v3380_v49 = vpop.f32.mrb[67].mxu1  ;;  %v2834_v25 = vpop.xlane.xlu1 %2833 }
 0x3d5   : > { %v7247_v27 = vpop.eup %7246  ;;  %4337 = vst [vmem:[%s9842_s19 + $0x90] sm:$0xff] %v3380_v49  ;;  %7256 = vrcp.f32 %v2834_v25  ;;  %v3235_v6 = vpop.f32.mrb[67].mxu0  ;;  %6107 = vmatprep.mubr.f32.mxu1 %v3119_v44  ;;  %4535 = vst [vmem:[%s9071_s27 + $0x2c0] sm:$0xff] %v3119_v44  ;;  %6710 = vmatpush3.bf16.msra.mxu0 %v6707_v63  ;;  %v11003_v49 = vld [vmem:[#allocation148_spill] sm:$0xff] }
 0x3d6   : > { %4321 = vst [vmem:[%s9842_s19 + $0x10] sm:$0xff] %v3235_v6  ;;  %v2802_v18 = vpop.xlane.xlu0 %2801  ;;  %v3103_v38 = vmul.f32 %v7247_v27, %v10995_v2  ;;  %v7249_v55 = vpop.eup %7248  ;;  %6108 = vmatmul.mubr.f32.gmra.mrb[104].mxu1 %v3120_v28  ;;  %v11004_v27 = vld [vmem:[#allocation94_spill] sm:$0xff] }
 0x3d7   : > { %7258 = vrcp.f32 %v2802_v18  ;;  %v3122_v34 = vmul.f32 %v7249_v55, %v10996_v15  ;;  %v11005_v15 = vld [vmem:[#allocation47_spill] sm:$0xff] }
 0x3d8   : > { %6051 = vmatprep.mubr.f32.mxu0 %v3103_v38  ;;  %4519 = vst [vmem:[%s9071_s27 + $0x240] sm:$0xff] %v3103_v38  ;;  %v2832_v31 = vpop.xlane.xlu1 %2831 }
 0x3d9   : > { %v7251_v56 = vpop.eup %7250  ;;  %7260 = vrcp.f32 %v2832_v31  ;;  %6052 = vmatmul.mubr.f32.gmra.mrb[104].mxu0 %v3104_v45  ;;  %4538 = vst [vmem:[%s9071_s27 + $0x2d8] sm:$0xff] %v3122_v34  ;;  %v11002_v45 = vld [vmem:[#allocation45_spill] sm:$0xff] }
 0x3da   : > { %v2800_v51 = vpop.xlane.xlu0 %2799  ;;  %v3106_v30 = vmul.f32 %v7251_v56, %v10997_v50  ;;  %v7253_v47 = vpop.eup %7252 }
 0x3db   : > { %7262 = vrcp.f32 %v2800_v51  ;;  %v5879_v58 = vpop.f32.mrb[68].mxu1  ;;  %v5823_v57 = vpop.f32.mrb[68].mxu0  ;;  %v3121_v48 = vmul.f32 %v7253_v47, %v10998_v14 }
 0x3dc   : > { %4340 = vst [vmem:[%s9842_s19 + $0xa8] sm:$0xff] %v5879_v58  ;;  %4324 = vst [vmem:[%s9842_s19 + $0x28] sm:$0xff] %v5823_v57  ;;  %v3390_v40 = vpop.f32.mrb[69].mxu1  ;;  %v2838_v22 = vpop.xlane.xlu1 %2837  ;;  %v11007_v57 = vld [vmem:[#allocation92_spill] sm:$0xff] }
 0x3dd   : > { %4522 = vst [vmem:[%s9071_s27 + $0x258] sm:$0xff] %v3106_v30  ;;  %v7255_v52 = vpop.eup %7254  ;;  %4339 = vst [vmem:[%s9842_s19 + $0xa0] sm:$0xff] %v3390_v40  ;;  %7264 = vrcp.f32 %v2838_v22  ;;  %v3245_v32 = vpop.f32.mrb[69].mxu0  ;;  %6110 = vmatprep.mubr.f32.mxu1 %v3121_v48 }
 0x3de   : > { %4323 = vst [vmem:[%s9842_s19 + $0x20] sm:$0xff] %v3245_v32  ;;  %v2806_v39 = vpop.xlane.xlu0 %2805  ;;  %4537 = vst [vmem:[%s9071_s27 + $0x2d0] sm:$0xff] %v3121_v48  ;;  %v3105_v62 = vmul.f32 %v7255_v52, %v10999_v29  ;;  %6111 = vmatmul.mubr.f32.gmra.mrb[106].mxu1 %v3122_v34  ;;  %v11008_v48 = vld [vmem:[#allocation98_spill] sm:$0xff] }
 0x3df   : > { %v7257_v54 = vpop.eup %7256  ;;  %7266 = vrcp.f32 %v2806_v39 }
 0x3e0   : > { %6054 = vmatprep.mubr.f32.mxu0 %v3105_v62  ;;  %4521 = vst [vmem:[%s9071_s27 + $0x250] sm:$0xff] %v3105_v62  ;;  %v2836_v33 = vpop.xlane.xlu1 %2835  ;;  %v3124_v1 = vmul.f32 %v7257_v54, %v9461_v8  ;;  %v11001_v8 = vld [vmem:[#allocation87_spill] sm:$0xff] }
 0x3e1   : > { %v7259_v4 = vpop.eup %7258  ;;  %7268 = vrcp.f32 %v2836_v33  ;;  %6055 = vmatmul.mubr.f32.gmra.mrb[106].mxu0 %v3106_v30  ;;  %v11006_v30 = vld [vmem:[#allocation150_spill] sm:$0xff] }
 0x3e2   : > { %v2804_v36 = vpop.xlane.xlu0 %2803  ;;  %4540 = vst [vmem:[%s9071_s27 + $0x2e8] sm:$0xff] %v3124_v1  ;;  %v3108_v61 = vmul.f32 %v7259_v4, %v11000_v35  ;;  %v5882_v7 = vpop.f32.mrb[70].mxu1 }
 0x3e3   : > { %v7261_v24 = vpop.eup %7260  ;;  %7270 = vrcp.f32 %v2804_v36  ;;  %v5826_v63 = vpop.f32.mrb[70].mxu0  ;;  %4342 = vst [vmem:[%s9842_s19 + $0xb8] sm:$0xff] %v5882_v7 }
 0x3e4   : > { %4326 = vst [vmem:[%s9842_s19 + $0x38] sm:$0xff] %v5826_v63  ;;  %v3400_v12 = vpop.f32.mrb[71].mxu1  ;;  %v2874_v9 = vpop.xlane.xlu1 %2873  ;;  %v3123_v28 = vmul.f32 %v7261_v24, %v11001_v8  ;;  %4524 = vst [vmem:[%s9071_s27 + $0x268] sm:$0xff] %v3108_v61  ;;  %v11010_v24 = vld [vmem:[#allocation49_spill] sm:$0xff] }
 0x3e5   : > { %v7263_v37 = vpop.eup %7262  ;;  %4341 = vst [vmem:[%s9842_s19 + $0xb0] sm:$0xff] %v3400_v12  ;;  %7272 = vrcp.f32 %v2874_v9  ;;  %v3255_v19 = vpop.f32.mrb[71].mxu0  ;;  %v11011_v9 = vld [vmem:[#allocation48_spill] sm:$0xff] }
 0x3e6   : > { %4325 = vst [vmem:[%s9842_s19 + $0x30] sm:$0xff] %v3255_v19  ;;  %v2842_v26 = vpop.xlane.xlu0 %2841  ;;  %6113 = vmatprep.mubr.f32.mxu1 %v3123_v28  ;;  %4539 = vst [vmem:[%s9071_s27 + $0x2e0] sm:$0xff] %v3123_v28  ;;  %v3107_v60 = vmul.f32 %v7263_v37, %v11002_v45  ;;  %v11012_v19 = vld [vmem:[#allocation104_spill] sm:$0xff] }
 0x3e7   : > { %v7265_v23 = vpop.eup %7264  ;;  %7274 = vrcp.f32 %v2842_v26  ;;  %6114 = vmatmul.mubr.f32.gmra.mrb[108].mxu1 %v3124_v1  ;;  %v11009_v1 = vld [vmem:[#allocation100_spill] sm:$0xff] }
 0x3e8   : > { %6057 = vmatprep.mubr.f32.mxu0 %v3107_v60  ;;  %4523 = vst [vmem:[%s9071_s27 + $0x260] sm:$0xff] %v3107_v60  ;;  %v2872_v11 = vpop.xlane.xlu1 %2871  ;;  %v3126_v25 = vmul.f32 %v7265_v23, %v11003_v49 }
 0x3e9   : > { %v7267_v21 = vpop.eup %7266  ;;  %7276 = vrcp.f32 %v2872_v11  ;;  %6058 = vmatmul.mubr.f32.gmra.mrb[108].mxu0 %v3108_v61 }
 0x3ea   : > { %v2840_v44 = vpop.xlane.xlu0 %2839  ;;  %4542 = vst [vmem:[%s9071_s27 + $0x2f8] sm:$0xff] %v3126_v25  ;;  %v3110_v6 = vmul.f32 %v7267_v21, %v11004_v27  ;;  %v5885_v2 = vpop.f32.mrb[72].mxu1 }
 0x3eb   : > { %v7269_v18 = vpop.eup %7268  ;;  %7278 = vrcp.f32 %v2840_v44  ;;  %v5829_v38 = vpop.f32.mrb[72].mxu0  ;;  %4344 = vst [vmem:[%s9842_s19 + $0xc8] sm:$0xff] %v5885_v2 }
 0x3ec   : > { %4328 = vst [vmem:[%s9842_s19 + $0x48] sm:$0xff] %v5829_v38  ;;  %v3410_v55 = vpop.f32.mrb[73].mxu1  ;;  %v2878_v31 = vpop.xlane.xlu1 %2877  ;;  %v3125_v34 = vmul.f32 %v7269_v18, %v11005_v15  ;;  %4526 = vst [vmem:[%s9071_s27 + $0x278] sm:$0xff] %v3110_v6  ;;  %v11014_v18 = vld [vmem:[#allocation51_spill] sm:$0xff] }
 0x3ed   : > { %v7271_v56 = vpop.eup %7270  ;;  %4343 = vst [vmem:[%s9842_s19 + $0xc0] sm:$0xff] %v3410_v55  ;;  %7280 = vrcp.f32 %v2878_v31  ;;  %v3265_v51 = vpop.f32.mrb[73].mxu0  ;;  %v11015_v31 = vld [vmem:[#allocation50_spill] sm:$0xff] }
 0x3ee   : > { %4327 = vst [vmem:[%s9842_s19 + $0x40] sm:$0xff] %v3265_v51  ;;  %v2846_v50 = vpop.xlane.xlu0 %2845  ;;  %6116 = vmatprep.mubr.f32.mxu1 %v3125_v34  ;;  %4541 = vst [vmem:[%s9071_s27 + $0x2f0] sm:$0xff] %v3125_v34  ;;  %v3109_v47 = vmul.f32 %v7271_v56, %v11006_v30  ;;  %v11016_v51 = vld [vmem:[#allocation110_spill] sm:$0xff] }
 0x3ef   : > { %v7273_v58 = vpop.eup %7272  ;;  %7282 = vrcp.f32 %v2846_v50  ;;  %6117 = vmatmul.mubr.f32.gmra.mrb[110].mxu1 %v3126_v25  ;;  %v11013_v25 = vld [vmem:[#allocation106_spill] sm:$0xff] }
 0x3f0   : > { %v3144_v40 = vmul.f32 %v7273_v58, %v11007_v57  ;;  %6060 = vmatprep.mubr.f32.mxu0 %v3109_v47  ;;  %4525 = vst [vmem:[%s9071_s27 + $0x270] sm:$0xff] %v3109_v47  ;;  %v2876_v22 = vpop.xlane.xlu1 %2875 }
 0x3f1   : > { %v7275_v14 = vpop.eup %7274  ;;  %7284 = vrcp.f32 %v2876_v22  ;;  %6061 = vmatmul.mubr.f32.gmra.mrb[110].mxu0 %v3110_v6  ;;  %v11017_v22 = vld [vmem:[#allocation112_spill] sm:$0xff] }
 0x3f2   : > { %4560 = vst [vmem:[%s9071_s27 + $0x388] sm:$0xff] %v3144_v40  ;;  %v3128_v52 = vmul.f32 %v7275_v14, %v11008_v48  ;;  %v2844_v32 = vpop.xlane.xlu0 %2843  ;;  %v5888_v29 = vpop.f32.mrb[74].mxu1 }
 0x3f3   : > { %v7277_v39 = vpop.eup %7276  ;;  %7286 = vrcp.f32 %v2844_v32  ;;  %v5832_v62 = vpop.f32.mrb[74].mxu0  ;;  %4346 = vst [vmem:[%s9842_s19 + $0xd8] sm:$0xff] %v5888_v29  ;;  %v11018_v32 = vld [vmem:[#allocation53_spill] sm:$0xff] }
 0x3f4   : > { %4544 = vst [vmem:[%s9071_s27 + $0x308] sm:$0xff] %v3128_v52  ;;  %4330 = vst [vmem:[%s9842_s19 + $0x58] sm:$0xff] %v5832_v62  ;;  %v3420_v54 = vpop.f32.mrb[75].mxu1  ;;  %v2882_v33 = vpop.xlane.xlu1 %2881  ;;  %v3143_v4 = vmul.f32 %v7277_v39, %v11009_v1 }
 0x3f5   : > { %v7279_v36 = vpop.eup %7278  ;;  %4345 = vst [vmem:[%s9842_s19 + $0xd0] sm:$0xff] %v3420_v54  ;;  %7288 = vrcp.f32 %v2882_v33  ;;  %v3275_v35 = vpop.f32.mrb[75].mxu0  ;;  %v11019_v33 = vld [vmem:[#allocation52_spill] sm:$0xff] }
 0x3f6   : > { %4329 = vst [vmem:[%s9842_s19 + $0x50] sm:$0xff] %v3275_v35  ;;  %v2850_v61 = vpop.xlane.xlu0 %2849  ;;  %6207 = vmatprep.mubr.f32.mxu1 %v3143_v4  ;;  %4559 = vst [vmem:[%s9071_s27 + $0x380] sm:$0xff] %v3143_v4  ;;  %v3127_v7 = vmul.f32 %v7279_v36, %v11010_v24  ;;  %v11020_v36 = vld [vmem:[#allocation117_spill] sm:$0xff] }
 0x3f7   : > { %v7281_v63 = vpop.eup %7280  ;;  %7290 = vrcp.f32 %v2850_v61  ;;  %6208 = vmatmul.mubr.f32.vlgmr.msra.gmra.mrb[112].mxu1 %v3144_v40 }
 0x3f8   : > { %6151 = vmatprep.mubr.f32.mxu0 %v3127_v7  ;;  %4543 = vst [vmem:[%s9071_s27 + $0x300] sm:$0xff] %v3127_v7  ;;  %v2880_v12 = vpop.xlane.xlu1 %2879  ;;  %v3146_v8 = vmul.f32 %v7281_v63, %v11011_v9  ;;  %v11021_v63 = vld [vmem:[#allocation119_spill] sm:$0xff] }
 0x3f9   : > { %v7283_v28 = vpop.eup %7282  ;;  %7292 = vrcp.f32 %v2880_v12  ;;  %6152 = vmatmul.mubr.f32.vlgmr.msra.gmra.mrb[112].mxu0 %v3128_v52 }
 0x3fa   : > { %v2848_v37 = vpop.xlane.xlu0 %2847  ;;  %4562 = vst [vmem:[%s9071_s27 + $0x398] sm:$0xff] %v3146_v8  ;;  %v3130_v26 = vmul.f32 %v7283_v28, %v11012_v19  ;;  %v5891_v60 = vpop.f32.mrb[76].mxu1 }
 0x3fb   : > { %v7285_v45 = vpop.eup %7284  ;;  %7294 = vrcp.f32 %v2848_v37  ;;  %v5835_v23 = vpop.f32.mrb[76].mxu0  ;;  %4348 = vst [vmem:[%s9842_s19 + $0xe8] sm:$0xff] %v5891_v60 }
 0x3fc   : > { %4332 = vst [vmem:[%s9842_s19 + $0x68] sm:$0xff] %v5835_v23  ;;  %v3430_v11 = vpop.f32.mrb[77].mxu1  ;;  %v2886_v49 = vpop.xlane.xlu1 %2885  ;;  %v3145_v21 = vmul.f32 %v7285_v45, %v11013_v25  ;;  %4546 = vst [vmem:[%s9071_s27 + $0x318] sm:$0xff] %v3130_v26 }
 0x3fd   : > { %v7287_v44 = vpop.eup %7286  ;;  %4347 = vst [vmem:[%s9842_s19 + $0xe0] sm:$0xff] %v3430_v11  ;;  %7296 = vrcp.f32 %v2886_v49  ;;  %v3285_v27 = vpop.f32.mrb[77].mxu0 }
 0x3fe   : > { %4331 = vst [vmem:[%s9842_s19 + $0x60] sm:$0xff] %v3285_v27  ;;  %v2854_v6 = vpop.xlane.xlu0 %2853  ;;  %6210 = vmatprep.mubr.f32.mxu1 %v3145_v21  ;;  %4561 = vst [vmem:[%s9071_s27 + $0x390] sm:$0xff] %v3145_v21  ;;  %v3129_v2 = vmul.f32 %v7287_v44, %v11014_v18 }
 0x3ff   : > { %v7289_v38 = vpop.eup %7288  ;;  %7298 = vrcp.f32 %v2854_v6  ;;  %6211 = vmatmul.mubr.f32.gmra.mrb[114].mxu1 %v3146_v8  ;;  %v11022_v8 = vld [vmem:[#allocation55_spill] sm:$0xff] }
 0x400   : > { %6154 = vmatprep.mubr.f32.mxu0 %v3129_v2  ;;  %4545 = vst [vmem:[%s9071_s27 + $0x310] sm:$0xff] %v3129_v2  ;;  %v2884_v55 = vpop.xlane.xlu1 %2883  ;;  %v3148_v15 = vmul.f32 %v7289_v38, %v11015_v31 }
 0x401   : > { %v7291_v34 = vpop.eup %7290  ;;  %7300 = vrcp.f32 %v2884_v55  ;;  %6155 = vmatmul.mubr.f32.gmra.mrb[114].mxu0 %v3130_v26 }
 0x402   : > { %v2852_v56 = vpop.xlane.xlu0 %2851  ;;  %4564 = vst [vmem:[%s9071_s27 + $0x3a8] sm:$0xff] %v3148_v15  ;;  %v3132_v50 = vmul.f32 %v7291_v34, %v11016_v51  ;;  %v5894_v47 = vpop.f32.mrb[78].mxu1 }
 0x403   : > { %v7293_v30 = vpop.eup %7292  ;;  %7302 = vrcp.f32 %v2852_v56  ;;  %v5838_v58 = vpop.f32.mrb[78].mxu0  ;;  %4350 = vst [vmem:[%s9842_s19 + $0xf8] sm:$0xff] %v5894_v47 }
 0x404   : > { %4334 = vst [vmem:[%s9842_s19 + $0x78] sm:$0xff] %v5838_v58  ;;  %v3440_v57 = vpop.f32.mrb[79].mxu1  ;;  %v2890_v40 = vpop.xlane.xlu1 %2889  ;;  %v3147_v14 = vmul.f32 %v7293_v30, %v11017_v22  ;;  %4548 = vst [vmem:[%s9071_s27 + $0x328] sm:$0xff] %v3132_v50  ;;  %v11023_v22 = vld [vmem:[#allocation54_spill] sm:$0xff] }
 0x405   : > { %v7295_v48 = vpop.eup %7294  ;;  %4349 = vst [vmem:[%s9842_s19 + $0xf0] sm:$0xff] %v3440_v57  ;;  %7304 = vrcp.f32 %v2890_v40  ;;  %v3295_v52 = vpop.f32.mrb[79].mxu0 }
 0x406   : > { %4333 = vst [vmem:[%s9842_s19 + $0x70] sm:$0xff] %v3295_v52  ;;  %6213 = vmatprep.mubr.f32.mxu1 %v3147_v14  ;;  %4563 = vst [vmem:[%s9071_s27 + $0x3a0] sm:$0xff] %v3147_v14  ;;  %v3131_v39 = vmul.f32 %v7295_v48, %v11018_v32  ;;  %v2858_v62 = vpop.xlane.xlu0 %2857  ;;  %v11024_v48 = vld [vmem:[#allocation125_spill] sm:$0xff] }
 0x407   : > { %v7297_v29 = vpop.eup %7296  ;;  %6214 = vmatmul.mubr.f32.gmra.mrb[116].mxu1 %v3148_v15  ;;  %7306 = vrcp.f32 %v2858_v62 }
 0x408   : > { %6157 = vmatprep.mubr.f32.mxu0 %v3131_v39  ;;  %4547 = vst [vmem:[%s9071_s27 + $0x320] sm:$0xff] %v3131_v39  ;;  %v2888_v54 = vpop.xlane.xlu1 %2887  ;;  %v3150_v1 = vmul.f32 %v7297_v29, %v11019_v33 }
 0x409   : > { %v7299_v4 = vpop.eup %7298  ;;  %7308 = vrcp.f32 %v2888_v54  ;;  %6158 = vmatmul.mubr.f32.gmra.mrb[116].mxu0 %v3132_v50 }
 0x40a   : > { %4566 = vst [vmem:[%s9071_s27 + $0x3b8] sm:$0xff] %v3150_v1  ;;  %v3134_v35 = vmul.f32 %v7299_v4, %v11020_v36  ;;  %v2856_v24 = vpop.xlane.xlu0 %2855 }
 0x40b   : > { %v7301_v61 = vpop.eup %7300  ;;  %7310 = vrcp.f32 %v2856_v24 }
 0x40c   : > { %v2894_v7 = vpop.xlane.xlu1 %2893  ;;  %v3149_v12 = vmul.f32 %v7301_v61, %v11021_v63  ;;  %4550 = vst [vmem:[%s9071_s27 + $0x338] sm:$0xff] %v3134_v35 }
 0x40d   : > { %v7303_v9 = vpop.eup %7302  ;;  %7312 = vrcp.f32 %v2894_v7 }
 0x40e   : > { %6216 = vmatprep.mubr.f32.mxu1 %v3149_v12  ;;  %4565 = vst [vmem:[%s9071_s27 + $0x3b0] sm:$0xff] %v3149_v12  ;;  %v3133_v28 = vmul.f32 %v7303_v9, %v11022_v8  ;;  %v2862_v19 = vpop.xlane.xlu0 %2861 }
 0x40f   : > { %v7305_v37 = vpop.eup %7304  ;;  %6217 = vmatmul.mubr.f32.gmra.mrb[118].mxu1 %v3150_v1  ;;  %7314 = vrcp.f32 %v2862_v19 }
 0x410   : > { %6160 = vmatprep.mubr.f32.mxu0 %v3133_v28  ;;  %4549 = vst [vmem:[%s9071_s27 + $0x330] sm:$0xff] %v3133_v28  ;;  %v2892_v26 = vpop.xlane.xlu1 %2891  ;;  %v3152_v45 = vmul.f32 %v7305_v37, %v9615_v41 }
 0x411   : > { %7316 = vrcp.f32 %v2892_v26  ;;  %6161 = vmatmul.mubr.f32.gmra.mrb[118].mxu0 %v3134_v35  ;;  %v7307_v60 = vpop.eup %7306 }
 0x412   : > { %4568 = vst [vmem:[%s9071_s27 + $0x3c8] sm:$0xff] %v3152_v45  ;;  %v2860_v11 = vpop.xlane.xlu0 %2859  ;;  %v3136_v49 = vmul.f32 %v7307_v60, %v9633_v0 }
 0x413   : > { %v7309_v23 = vpop.eup %7308  ;;  %7318 = vrcp.f32 %v2860_v11 }
 0x414   : > { %v2898_v25 = vpop.xlane.xlu1 %2897  ;;  %v3151_v21 = vmul.f32 %v7309_v23, %v9637_v16  ;;  %4552 = vst [vmem:[%s9071_s27 + $0x348] sm:$0xff] %v3136_v49 }
 0x415   : > { %7320 = vrcp.f32 %v2898_v25  ;;  %v7311_v44 = vpop.eup %7310 }
 0x416   : > { %6219 = vmatprep.mubr.f32.mxu1 %v3151_v21  ;;  %4567 = vst [vmem:[%s9071_s27 + $0x3c0] sm:$0xff] %v3151_v21  ;;  %v2866_v27 = vpop.xlane.xlu0 %2865  ;;  %v3135_v6 = vmul.f32 %v7311_v44, %v9655_v59 }
 0x417   : > { %v7313_v41 = vpop.eup %7312  ;;  %6220 = vmatmul.mubr.f32.gmra.mrb[120].mxu1 %v3152_v45  ;;  %7322 = vrcp.f32 %v2866_v27 }
 0x418   : > { %v2896_v18 = vpop.xlane.xlu1 %2895  ;;  %v3154_v0 = vmul.f32 %v7313_v41, %v9658_v43  ;;  %6163 = vmatprep.mubr.f32.mxu0 %v3135_v6  ;;  %4551 = vst [vmem:[%s9071_s27 + $0x340] sm:$0xff] %v3135_v6 }
 0x419   : > { %7324 = vrcp.f32 %v2896_v18  ;;  %v7315_v16 = vpop.eup %7314  ;;  %6164 = vmatmul.mubr.f32.gmra.mrb[120].mxu0 %v3136_v49 }
 0x41a   : > { %4570 = vst [vmem:[%s9071_s27 + $0x3d8] sm:$0xff] %v3154_v0  ;;  %v2864_v38 = vpop.xlane.xlu0 %2863  ;;  %v3138_v55 = vmul.f32 %v7315_v16, %v9669_v53 }
 0x41b   : > { %v7317_v2 = vpop.eup %7316  ;;  %7326 = vrcp.f32 %v2864_v38 }
 0x41c   : > { %v2900_v59 = vpop.xlane.xlu1 %2899  ;;  %v3153_v31 = vmul.f32 %v7317_v2, %v9674_v17  ;;  %4554 = vst [vmem:[%s9071_s27 + $0x358] sm:$0xff] %v3138_v55 }
 0x41d   : > { %7328 = vrcp.f32 %v2900_v59  ;;  %v7319_v43 = vpop.eup %7318 }
 0x41e   : > { %6222 = vmatprep.mubr.f32.mxu1 %v3153_v31  ;;  %4569 = vst [vmem:[%s9071_s27 + $0x3d0] sm:$0xff] %v3153_v31  ;;  %v2868_v34 = vpop.xlane.xlu0 %2867  ;;  %v3137_v56 = vmul.f32 %v7319_v43, %v9687_v10 }
 0x41f   : > { %v7321_v15 = vpop.eup %7320  ;;  %6223 = vmatmul.mubr.f32.gmra.mrb[122].mxu1 %v3154_v0  ;;  %7330 = vrcp.f32 %v2868_v34 }
 0x420   : > { %v2902_v51 = vpop.xlane.xlu1 %2901  ;;  %v3156_v53 = vmul.f32 %v7321_v15, %v9693_v42  ;;  %6166 = vmatprep.mubr.f32.mxu0 %v3137_v56  ;;  %4553 = vst [vmem:[%s9071_s27 + $0x350] sm:$0xff] %v3137_v56 }
 0x421   : > { %7332 = vrcp.f32 %v2902_v51  ;;  %v7323_v17 = vpop.eup %7322  ;;  %6167 = vmatmul.mubr.f32.gmra.mrb[122].mxu0 %v3138_v55 }
 0x422   : > { %4572 = vst [vmem:[%s9071_s27 + $0x3e8] sm:$0xff] %v3156_v53  ;;  %v2870_v30 = vpop.xlane.xlu0 %2869  ;;  %v3140_v47 = vmul.f32 %v7323_v17, %v9700_v3 }
 0x423   : > { %v7325_v50 = vpop.eup %7324  ;;  %7334 = vrcp.f32 %v2870_v30 }
 0x424   : > { %v3155_v10 = vmul.f32 %v7325_v50, %v9703_v13  ;;  %4556 = vst [vmem:[%s9071_s27 + $0x368] sm:$0xff] %v3140_v47 }
 0x425   : > { %v7327_v58 = vpop.eup %7326 }
 0x426   : > { %6225 = vmatprep.mubr.f32.mxu1 %v3155_v10  ;;  %4571 = vst [vmem:[%s9071_s27 + $0x3e0] sm:$0xff] %v3155_v10  ;;  %v3139_v57 = vmul.f32 %v7327_v58, %v9714_v20 }
 0x427   : > { %v7329_v42 = vpop.eup %7328  ;;  %6226 = vmatmul.mubr.f32.gmra.mrb[124].mxu1 %v3156_v53 }
 0x428   : > { %v3157_v40 = vmul.f32 %v7329_v42, %v9717_v5  ;;  %6169 = vmatprep.mubr.f32.mxu0 %v3139_v57  ;;  %4555 = vst [vmem:[%s9071_s27 + $0x360] sm:$0xff] %v3139_v57 }
 0x429   : > { %v7331_v3 = vpop.eup %7330  ;;  %6170 = vmatmul.mubr.f32.gmra.mrb[124].mxu0 %v3140_v47 }
 0x42a   : > { %6228 = vmatprep.mubr.f32.mxu1 %v3157_v40  ;;  %4573 = vst [vmem:[%s9071_s27 + $0x3f0] sm:$0xff] %v3157_v40  ;;  %v3141_v14 = vmul.f32 %v7331_v3, %v11023_v22 }
 0x42b   : > { %v7333_v13 = vpop.eup %7332 }
 0x42c   : > { %v3158_v52 = vmul.f32 %v7333_v13, %v11024_v48  ;;  %6172 = vmatprep.mubr.f32.mxu0 %v3141_v14  ;;  %4557 = vst [vmem:[%s9071_s27 + $0x370] sm:$0xff] %v3141_v14 }
 0x42d   : > { %v7335_v20 = vpop.eup %7334 }
 0x42e   : > { %6229 = vmatmul.mubr.f32.gmra.mrb[126].mxu1 %v3158_v52  ;;  %4574 = vst [vmem:[%s9071_s27 + $0x3f8] sm:$0xff] %v3158_v52  ;;  %v3142_v5 = vmul.f32 %v7335_v20, %v9742_v46 }
 0x430   : > { %6173 = vmatmul.mubr.f32.gmra.mrb[126].mxu0 %v3142_v5  ;;  %4558 = vst [vmem:[%s9071_s27 + $0x378] sm:$0xff] %v3142_v5 }
 0x449   : > { %v5985_v32 = vpop.f32.mrb[80].mxu1 }
 0x44a   : > { %4368 = vst [vmem:[%s9842_s19 + $0x188] sm:$0xff] %v5985_v32  ;;  %v3660_v29 = vpop.f32.mrb[81].mxu1 }
 0x44b   : > { %v5929_v39 = vpop.f32.mrb[80].mxu0  ;;  %4367 = vst [vmem:[%s9842_s19 + $0x180] sm:$0xff] %v3660_v29 }
 0x44c   : > { %4352 = vst [vmem:[%s9842_s19 + $0x108] sm:$0xff] %v5929_v39  ;;  %v3515_v62 = vpop.f32.mrb[81].mxu0 }
 0x44d   : > { %4351 = vst [vmem:[%s9842_s19 + $0x100] sm:$0xff] %v3515_v62 }
 0x452   : > { %v5988_v54 = vpop.f32.mrb[82].mxu1  ;;  %v5932_v33 = vpop.f32.mrb[82].mxu0 }
 0x453   : > { %4370 = vst [vmem:[%s9842_s19 + $0x198] sm:$0xff] %v5988_v54  ;;  %4354 = vst [vmem:[%s9842_s19 + $0x118] sm:$0xff] %v5932_v33  ;;  %v3670_v46 = vpop.f32.mrb[83].mxu1  ;;  %v3525_v1 = vpop.f32.mrb[83].mxu0 }
 0x454   : > { %4369 = vst [vmem:[%s9842_s19 + $0x190] sm:$0xff] %v3670_v46  ;;  %4353 = vst [vmem:[%s9842_s19 + $0x110] sm:$0xff] %v3525_v1 }
 0x45a   : > { %v5991_v4 = vpop.f32.mrb[84].mxu1  ;;  %v5935_v36 = vpop.f32.mrb[84].mxu0 }
 0x45b   : > { %4372 = vst [vmem:[%s9842_s19 + $0x1a8] sm:$0xff] %v5991_v4  ;;  %4356 = vst [vmem:[%s9842_s19 + $0x128] sm:$0xff] %v5935_v36  ;;  %v3680_v35 = vpop.f32.mrb[85].mxu1  ;;  %v3535_v61 = vpop.f32.mrb[85].mxu0 }
 0x45c   : > { %4371 = vst [vmem:[%s9842_s19 + $0x1a0] sm:$0xff] %v3680_v35  ;;  %4355 = vst [vmem:[%s9842_s19 + $0x120] sm:$0xff] %v3535_v61 }
 0x462   : > { %v5994_v24 = vpop.f32.mrb[86].mxu1  ;;  %v5938_v7 = vpop.f32.mrb[86].mxu0 }
 0x463   : > { %4374 = vst [vmem:[%s9842_s19 + $0x1b8] sm:$0xff] %v5994_v24  ;;  %4358 = vst [vmem:[%s9842_s19 + $0x138] sm:$0xff] %v5938_v7  ;;  %v3690_v63 = vpop.f32.mrb[87].mxu1  ;;  %v3545_v12 = vpop.f32.mrb[87].mxu0 }
 0x464   : > { %4373 = vst [vmem:[%s9842_s19 + $0x1b0] sm:$0xff] %v3690_v63  ;;  %4357 = vst [vmem:[%s9842_s19 + $0x130] sm:$0xff] %v3545_v12 }
 0x469   : > { %v5997_v9 = vpop.f32.mrb[88].mxu1 }
 0x46a   : > { %4376 = vst [vmem:[%s9842_s19 + $0x1c8] sm:$0xff] %v5997_v9  ;;  %v5941_v8 = vpop.f32.mrb[88].mxu0  ;;  %v3700_v28 = vpop.f32.mrb[89].mxu1 }
 0x46b   : > { %4360 = vst [vmem:[%s9842_s19 + $0x148] sm:$0xff] %v5941_v8  ;;  %4375 = vst [vmem:[%s9842_s19 + $0x1c0] sm:$0xff] %v3700_v28  ;;  %v3555_v37 = vpop.f32.mrb[89].mxu0 }
 0x46c   : > { %4359 = vst [vmem:[%s9842_s19 + $0x140] sm:$0xff] %v3555_v37 }
 0x471   : > { %v6000_v19 = vpop.f32.mrb[90].mxu1 }
 0x472   : > { %4378 = vst [vmem:[%s9842_s19 + $0x1d8] sm:$0xff] %v6000_v19  ;;  %v3710_v26 = vpop.f32.mrb[91].mxu1 }
 0x473   : > { %v5944_v45 = vpop.f32.mrb[90].mxu0  ;;  %4377 = vst [vmem:[%s9842_s19 + $0x1d0] sm:$0xff] %v3710_v26 }
 0x474   : > { %4362 = vst [vmem:[%s9842_s19 + $0x158] sm:$0xff] %v5944_v45  ;;  %v3565_v60 = vpop.f32.mrb[91].mxu0 }
 0x475   : > { %4361 = vst [vmem:[%s9842_s19 + $0x150] sm:$0xff] %v3565_v60 }
 0x479   : > { %v6003_v23 = vpop.f32.mrb[92].mxu1 }
 0x47a   : > { %4380 = vst [vmem:[%s9842_s19 + $0x1e8] sm:$0xff] %v6003_v23  ;;  %v3720_v11 = vpop.f32.mrb[93].mxu1 }
 0x47b   : > { %v5947_v49 = vpop.f32.mrb[92].mxu0  ;;  %4379 = vst [vmem:[%s9842_s19 + $0x1e0] sm:$0xff] %v3720_v11 }
 0x47c   : > { %4364 = vst [vmem:[%s9842_s19 + $0x168] sm:$0xff] %v5947_v49  ;;  %v3575_v25 = vpop.f32.mrb[93].mxu0 }
 0x47d   : > { %4363 = vst [vmem:[%s9842_s19 + $0x160] sm:$0xff] %v3575_v25 }
 0x481   : > { %v6006_v21 = vpop.f32.mrb[94].mxu1 }
 0x482   : > { %4382 = vst [vmem:[%s9842_s19 + $0x1f8] sm:$0xff] %v6006_v21  ;;  %v3730_v44 = vpop.f32.mrb[95].mxu1 }
 0x483   : > { %v5950_v41 = vpop.f32.mrb[94].mxu0  ;;  %4381 = vst [vmem:[%s9842_s19 + $0x1f0] sm:$0xff] %v3730_v44 }
 0x484   : > { %4366 = vst [vmem:[%s9842_s19 + $0x178] sm:$0xff] %v5950_v41  ;;  %v3585_v27 = vpop.f32.mrb[95].mxu0 }
 0x485   : > { %4365 = vst [vmem:[%s9842_s19 + $0x170] sm:$0xff] %v3585_v27 }
 0x489   : > { %v6097_v6 = vpop.f32.mrb[96].mxu1 }
 0x48a   : > { %4400 = vst [vmem:[%s9842_s19 + $0x288] sm:$0xff] %v6097_v6  ;;  %v3950_v18 = vpop.f32.mrb[97].mxu1 }
 0x48b   : > { %7439 = shalt.err (!%p7436_p13)
}
 0x48c   : > { %s7440_s10 = scalar_lea.hbm %s10013_s7, 16384  ;;  %s7444_s26 = scalar_lea.hbm %s10173_s4, 32768 }
 0x48d   : > { %p7441_p11 = scmp.ne.s32.totalorder %s10013_s7, %s7440_s10  ;;  %p7445_p7 = scmp.lt.u32.totalorder %s10013_s7, %s10173_s4 }
 0x48e   : > { %p7446_p4 = scmp.lt.u32.totalorder %s7444_s26, %s7440_s10  ;;  %p7448_p0 = scmp.lt.u32.totalorder %s7440_s10, %s10013_s7 }
 0x48f   : > { %p7442_p2 = pnand %p7441_p11, %p11025_p10 }
 0x490   : > { %p7447_p3 = por %p7446_p4, %p7445_p7 }
 0x491   : > { %p7443_p5 = pneg %p7442_p2 }
 0x492   : > { %p7449_p8 = por %p7448_p0, %p7447_p3 }
 0x494   : > { %p7450_p9 = pnand %p7449_p8, %p7443_p5 }
 0x496   : > { %7453 = shalt.err (!%p7450_p9)
}
 0x497   : > { %s7552_s13 = smov 128   ;;  %s7553_s21 = smov 8   ;;  %v6041_v0 = vpop.f32.mrb[96].mxu0  ;;  %4399 = vst [vmem:[%s9842_s19 + $0x280] sm:$0xff] %v3950_v18  ;;  %v6100_v2 = vpop.f32.mrb[98].mxu1 }
 0x498   : > { %6750 = dma.vmem_to_hbm [thread:$0]  (%p11025_p10), %s10016_s11, 16384, %s10013_s7, %s4581_s12, %s7552_s13, %s7552_s13, %s7553_s21   ;;  %v3805_v16 = vpop.f32.mrb[97].mxu0  ;;  %v3960_v38 = vpop.f32.mrb[99].mxu1 }
 0x499   : > { %4384 = vst [vmem:[%s9842_s19 + $0x208] sm:$0xff] %v6041_v0  ;;  %4383 = vst [vmem:[%s9842_s19 + $0x200] sm:$0xff] %v3805_v16  ;;  %v6044_v55 = vpop.f32.mrb[98].mxu0  ;;  %v6103_v31 = vpop.f32.mrb[100].mxu1  ;;  %s4597_s27 = sshll.u32 %s9842_s19, 4  ;;  %s10113_s7 = scalar_lea.hbm %s10172_s3, %s4820_s29  ;;  %s10115_s27 = int_to_ptr.vmem [resolvable:$true] %s4597_s27 }
 0x49a   : > { %4402 = vst [vmem:[%s9842_s19 + $0x298] sm:$0xff] %v6100_v2  ;;  %4401 = vst [vmem:[%s9842_s19 + $0x290] sm:$0xff] %v3960_v38  ;;  %v3815_v59 = vpop.f32.mrb[99].mxu0  ;;  %v3970_v43 = vpop.f32.mrb[101].mxu1  ;;  %s4576_s11 = scalar_lea.sflag [#allocation4], %s7790_s25  ;;  %s7454_s12 = scalar_lea.vmem %s10115_s27, 16384 }
 0x49b   : > { %4386 = vst [vmem:[%s9842_s19 + $0x218] sm:$0xff] %v6044_v55  ;;  %4385 = vst [vmem:[%s9842_s19 + $0x210] sm:$0xff] %v3815_v59  ;;  %v6047_v15 = vpop.f32.mrb[100].mxu0  ;;  %p7455_p12 = scmp.ne.s32.totalorder %s10115_s27, %s7454_s12  ;;  %s7554_s18 = smov [#allocation8]  }
 0x49c   : > { %4404 = vst [vmem:[%s9842_s19 + $0x2a8] sm:$0xff] %v6103_v31  ;;  %4403 = vst [vmem:[%s9842_s19 + $0x2a0] sm:$0xff] %v3970_v43  ;;  %v3825_v34 = vpop.f32.mrb[101].mxu0  ;;  %s7458_s20 = sshll.u32 %s7554_s18, 4  ;;  %s7459_s20 = int_to_ptr.vmem [resolvable:$false] %s7458_s20 }
 0x49d   : > { %4388 = vst [vmem:[%s9842_s19 + $0x228] sm:$0xff] %v6047_v15  ;;  %4387 = vst [vmem:[%s9842_s19 + $0x220] sm:$0xff] %v3825_v34  ;;  %p7456_p1 = pnand %p7455_p12, %p11025_p10  ;;  %s7460_s1 = scalar_lea.vmem %s7459_s20, 32768 }
 0x49e   : > { %p7461_p13 = scmp.lt.s32.totalorder %s10115_s27, %s7459_s20  ;;  %p7462_p11 = scmp.lt.s32.totalorder %s7460_s1, %s7454_s12 }
 0x49f   : > { %p7457_p6 = pneg %p7456_p1 }
 0x4a0   : > { %p7463_p2 = por %p7462_p11, %p7461_p13 }
 0x4a1   : > { %v6106_v56 = vpop.f32.mrb[102].mxu1 }
 0x4a2   : > { %4406 = vst [vmem:[%s9842_s19 + $0x2b8] sm:$0xff] %v6106_v56  ;;  %v3980_v51 = vpop.f32.mrb[103].mxu1  ;;  %p7464_p5 = pnand %p7463_p2, %p7457_p6 }
 0x4a3   : > { %v6050_v53 = vpop.f32.mrb[102].mxu0  ;;  %4405 = vst [vmem:[%s9842_s19 + $0x2b0] sm:$0xff] %v3980_v51 }
 0x4a4   : > { %4390 = vst [vmem:[%s9842_s19 + $0x238] sm:$0xff] %v6050_v53  ;;  %v3835_v17 = vpop.f32.mrb[103].mxu0 }
 0x4a5   : > { %4389 = vst [vmem:[%s9842_s19 + $0x230] sm:$0xff] %v3835_v17 }
 0x4a9   : > { %v6109_v50 = vpop.f32.mrb[104].mxu1 }
 0x4aa   : > { %4408 = vst [vmem:[%s9842_s19 + $0x2c8] sm:$0xff] %v6109_v50  ;;  %v3990_v30 = vpop.f32.mrb[105].mxu1 }
 0x4ab   : > { %4407 = vst [vmem:[%s9842_s19 + $0x2c0] sm:$0xff] %v3990_v30 }
 0x4ac   : > { %v6053_v47 = vpop.f32.mrb[104].mxu0 }
 0x4ad   : > { %4392 = vst [vmem:[%s9842_s19 + $0x248] sm:$0xff] %v6053_v47  ;;  %v3845_v10 = vpop.f32.mrb[105].mxu0 }
 0x4ae   : > { %4391 = vst [vmem:[%s9842_s19 + $0x240] sm:$0xff] %v3845_v10 }
 0x4b1   : > { %v6112_v58 = vpop.f32.mrb[106].mxu1 }
 0x4b2   : > { %4410 = vst [vmem:[%s9842_s19 + $0x2d8] sm:$0xff] %v6112_v58  ;;  %v4000_v42 = vpop.f32.mrb[107].mxu1 }
 0x4b3   : > { %4409 = vst [vmem:[%s9842_s19 + $0x2d0] sm:$0xff] %v4000_v42 }
 0x4b4   : > { %v6056_v57 = vpop.f32.mrb[106].mxu0 }
 0x4b5   : > { %4394 = vst [vmem:[%s9842_s19 + $0x258] sm:$0xff] %v6056_v57  ;;  %v3855_v40 = vpop.f32.mrb[107].mxu0 }
 0x4b6   : > { %4393 = vst [vmem:[%s9842_s19 + $0x250] sm:$0xff] %v3855_v40 }
 0x4ba   : > { %v6115_v3 = vpop.f32.mrb[108].mxu1 }
 0x4bb   : > { %4412 = vst [vmem:[%s9842_s19 + $0x2e8] sm:$0xff] %v6115_v3  ;;  %v4010_v13 = vpop.f32.mrb[109].mxu1 }
 0x4bc   : > { %v6059_v22 = vpop.f32.mrb[108].mxu0  ;;  %4411 = vst [vmem:[%s9842_s19 + $0x2e0] sm:$0xff] %v4010_v13 }
 0x4bd   : > { %4396 = vst [vmem:[%s9842_s19 + $0x268] sm:$0xff] %v6059_v22  ;;  %v3865_v14 = vpop.f32.mrb[109].mxu0 }
 0x4be   : > { %4395 = vst [vmem:[%s9842_s19 + $0x260] sm:$0xff] %v3865_v14 }
 0x4c2   : > { %v6118_v48 = vpop.f32.mrb[110].mxu1 }
 0x4c3   : > { %4414 = vst [vmem:[%s9842_s19 + $0x2f8] sm:$0xff] %v6118_v48  ;;  %v4020_v52 = vpop.f32.mrb[111].mxu1 }
 0x4c4   : > { %v6062_v20 = vpop.f32.mrb[110].mxu0  ;;  %4413 = vst [vmem:[%s9842_s19 + $0x2f0] sm:$0xff] %v4020_v52 }
 0x4c5   : > { %4398 = vst [vmem:[%s9842_s19 + $0x278] sm:$0xff] %v6062_v20  ;;  %v3875_v5 = vpop.f32.mrb[111].mxu0 }
 0x4c6   : > { %4397 = vst [vmem:[%s9842_s19 + $0x270] sm:$0xff] %v3875_v5 }
 0x4ca   : > { %v6209_v32 = vpop.f32.mrb[112].mxu1 }
 0x4cb   : > { %4432 = vst [vmem:[%s9842_s19 + $0x388] sm:$0xff] %v6209_v32  ;;  %v4240_v39 = vpop.f32.mrb[113].mxu1 }
 0x4cc   : > { %v6153_v29 = vpop.f32.mrb[112].mxu0  ;;  %4431 = vst [vmem:[%s9842_s19 + $0x380] sm:$0xff] %v4240_v39 }
 0x4cd   : > { %4416 = vst [vmem:[%s9842_s19 + $0x308] sm:$0xff] %v6153_v29  ;;  %v4095_v62 = vpop.f32.mrb[113].mxu0 }
 0x4ce   : > { %4415 = vst [vmem:[%s9842_s19 + $0x300] sm:$0xff] %v4095_v62 }
 0x4d2   : > { %v6212_v54 = vpop.f32.mrb[114].mxu1 }
 0x4d3   : > { %4434 = vst [vmem:[%s9842_s19 + $0x398] sm:$0xff] %v6212_v54  ;;  %v4250_v33 = vpop.f32.mrb[115].mxu1 }
 0x4d4   : > { %v6156_v46 = vpop.f32.mrb[114].mxu0  ;;  %4433 = vst [vmem:[%s9842_s19 + $0x390] sm:$0xff] %v4250_v33 }
 0x4d5   : > { %4418 = vst [vmem:[%s9842_s19 + $0x318] sm:$0xff] %v6156_v46  ;;  %v4105_v1 = vpop.f32.mrb[115].mxu0 }
 0x4d6   : > { %4417 = vst [vmem:[%s9842_s19 + $0x310] sm:$0xff] %v4105_v1 }
 0x4da   : > { %v6215_v4 = vpop.f32.mrb[116].mxu1 }
 0x4db   : > { %4436 = vst [vmem:[%s9842_s19 + $0x3a8] sm:$0xff] %v6215_v4  ;;  %v4260_v36 = vpop.f32.mrb[117].mxu1 }
 0x4dc   : > { %v6159_v35 = vpop.f32.mrb[116].mxu0  ;;  %4435 = vst [vmem:[%s9842_s19 + $0x3a0] sm:$0xff] %v4260_v36 }
 0x4dd   : > { %4420 = vst [vmem:[%s9842_s19 + $0x328] sm:$0xff] %v6159_v35  ;;  %v4115_v61 = vpop.f32.mrb[117].mxu0 }
 0x4de   : > { %4419 = vst [vmem:[%s9842_s19 + $0x320] sm:$0xff] %v4115_v61 }
 0x4e2   : > { %v6218_v24 = vpop.f32.mrb[118].mxu1 }
 0x4e3   : > { %4438 = vst [vmem:[%s9842_s19 + $0x3b8] sm:$0xff] %v6218_v24  ;;  %v4270_v7 = vpop.f32.mrb[119].mxu1 }
 0x4e4   : > { %v6162_v63 = vpop.f32.mrb[118].mxu0  ;;  %4437 = vst [vmem:[%s9842_s19 + $0x3b0] sm:$0xff] %v4270_v7 }
 0x4e5   : > { %4422 = vst [vmem:[%s9842_s19 + $0x338] sm:$0xff] %v6162_v63  ;;  %v4125_v12 = vpop.f32.mrb[119].mxu0 }
 0x4e6   : > { %4421 = vst [vmem:[%s9842_s19 + $0x330] sm:$0xff] %v4125_v12 }
 0x4ea   : > { %v6221_v9 = vpop.f32.mrb[120].mxu1 }
 0x4eb   : > { %4440 = vst [vmem:[%s9842_s19 + $0x3c8] sm:$0xff] %v6221_v9  ;;  %v4280_v8 = vpop.f32.mrb[121].mxu1 }
 0x4ec   : > { %4439 = vst [vmem:[%s9842_s19 + $0x3c0] sm:$0xff] %v4280_v8  ;;  %v6165_v28 = vpop.f32.mrb[120].mxu0 }
 0x4ed   : > { %4424 = vst [vmem:[%s9842_s19 + $0x348] sm:$0xff] %v6165_v28  ;;  %v4135_v37 = vpop.f32.mrb[121].mxu0 }
 0x4ee   : > { %4423 = vst [vmem:[%s9842_s19 + $0x340] sm:$0xff] %v4135_v37 }
 0x4f2   : > { %v6224_v19 = vpop.f32.mrb[122].mxu1 }
 0x4f3   : > { %4442 = vst [vmem:[%s9842_s19 + $0x3d8] sm:$0xff] %v6224_v19  ;;  %v4290_v26 = vpop.f32.mrb[123].mxu1 }
 0x4f4   : > { %4441 = vst [vmem:[%s9842_s19 + $0x3d0] sm:$0xff] %v4290_v26  ;;  %v6168_v45 = vpop.f32.mrb[122].mxu0 }
 0x4f5   : > { %4426 = vst [vmem:[%s9842_s19 + $0x358] sm:$0xff] %v6168_v45  ;;  %v4145_v60 = vpop.f32.mrb[123].mxu0 }
 0x4f6   : > { %4425 = vst [vmem:[%s9842_s19 + $0x350] sm:$0xff] %v4145_v60 }
 0x4fa   : > { %v6227_v23 = vpop.f32.mrb[124].mxu1 }
 0x4fb   : > { %4444 = vst [vmem:[%s9842_s19 + $0x3e8] sm:$0xff] %v6227_v23  ;;  %v4300_v11 = vpop.f32.mrb[125].mxu1 }
 0x4fc   : > { %4443 = vst [vmem:[%s9842_s19 + $0x3e0] sm:$0xff] %v4300_v11  ;;  %v6171_v49 = vpop.f32.mrb[124].mxu0 }
 0x4fd   : > { %4428 = vst [vmem:[%s9842_s19 + $0x368] sm:$0xff] %v6171_v49  ;;  %v4155_v25 = vpop.f32.mrb[125].mxu0 }
 0x4fe   : > { %4427 = vst [vmem:[%s9842_s19 + $0x360] sm:$0xff] %v4155_v25 }
 0x501   : > { %v6230_v21 = vpop.f32.mrb[126].mxu1 }
 0x502   : > { %4446 = vst [vmem:[%s9842_s19 + $0x3f8] sm:$0xff] %v6230_v21  ;;  %v4310_v44 = vpop.f32.mrb[127].mxu1 }
 0x503   : > { %4445 = vst [vmem:[%s9842_s19 + $0x3f0] sm:$0xff] %v4310_v44  ;;  %v6174_v41 = vpop.f32.mrb[126].mxu0 }
 0x504   : > { %4430 = vst [vmem:[%s9842_s19 + $0x378] sm:$0xff] %v6174_v41  ;;  %v4165_v27 = vpop.f32.mrb[127].mxu0 }
 0x505   : > { %4429 = vst [vmem:[%s9842_s19 + $0x370] sm:$0xff] %v4165_v27 }
 0x506   : > { %7467 = shalt.err (!%p7464_p5)
}
 0x507   : > { %s7468_s19 = scalar_lea.hbm %s10113_s7, 16384  ;;  %s7472_s6 = scalar_lea.hbm %s10172_s3, 32768 }
 0x508   : > { %p7469_p7 = scmp.ne.s32.totalorder %s10113_s7, %s7468_s19  ;;  %p7473_p0 = scmp.lt.u32.totalorder %s10113_s7, %s10172_s3 }
 0x509   : > { %p7474_p8 = scmp.lt.u32.totalorder %s7472_s6, %s7468_s19  ;;  %p7476_p12 = scmp.lt.u32.totalorder %s7468_s19, %s10113_s7 }
 0x50a   : > { %p7470_p4 = pnand %p7469_p7, %p11025_p10 }
 0x50b   : > { %p7475_p9 = por %p7474_p8, %p7473_p0 }
 0x50c   : > { %p7471_p3 = pneg %p7470_p4 }
 0x50d   : > { %p7477_p1 = por %p7476_p12, %p7475_p9 }
 0x50f   : > { %p7478_p6 = pnand %p7477_p1, %p7471_p3 }
 0x511   : > { %7481 = shalt.err (!%p7478_p6)
}
 0x512   : > { %6749 = dma.vmem_to_hbm [thread:$0]  (%p11025_p10), %s10115_s27, 16384, %s10113_s7, %s4576_s11, %s7552_s13, %s7552_s13, %s7553_s21  }
 0x513 PF: > { %s11026_s8 = sld [smem:[#allocation16_spill]]  ;;  %s4631_s26 = sand.u32 1, %s7524_s15  }
 0x514   : > { %p11027_p13 = scmp.ne.s32.totalorder %s10475_s30, 0  ;;  %s4632_s22 = scalar_lea.sflag [#allocation4], %s4631_s26 }
 0x519   : > { %p11028_p11 = scmp.ge.s32.totalorder %s11026_s8, 2 }
 0x51b   : > { %p6764_p2 = pnand %p11028_p11, %p11027_p13 }
 0x51d   : > { %7515 = dma.done.wait (!%p6764_p2), %s4632_s22, 16384  }
 0x51e   : > { %7517 = vsyncadd (!%p6764_p2), %s4632_s22, 4294950912  ;;  %s4641_s28 = scalar_lea.sflag [#allocation10], %s4631_s26 }
 0x51f   : > { %7519 = dma.done.wait (!%p6764_p2), %s4641_s28, 16384  }
 0x520   : > { %7521 = vsyncadd (!%p6764_p2), %s4641_s28, 4294950912  ;;  %s27_s20 = sadd.s32 1, %s11026_s8   ;;  %s11029_s25 = sld [smem:[#allocation18_spill]] }
 0x521   : > { %p24_p5 = scmp.ge.s32.totalorder %s27_s20, 4   ;;  %s11030_s18 = sld [smem:[#allocation15_spill]] }
 0x522   : > { %s11031_s19 = sld [smem:[#allocation17_spill]]  ;;  %s11032_s15 = smov %s7528_s16 }
 0x523   : > { %s11033_s16 = smov %s7532_s17  ;;  %26 = sbr.rel (!%p24_p5) target bundleno = 12 (0xc), region = 118 }
 0x526   : > { %s11034_s17 = smov %s11029_s25 }
 0x52a   :  { %4646 = vsyncpa [#allocation3], 1 }
 0x52b   :  { %4648 = vsyncpa [#allocation3 + $0x1], 1 }
 0x52c   :  { %4649 = vsyncpa [#allocation6], 1 }
 0x52d   :  { %4651 = vsyncpa [#allocation6 + $0x1], 1 }
 0x52e   :  { %4652 = vsyncpa [#allocation4], 1 }
 0x52f   :  { %4654 = vsyncpa [#allocation4 + $0x1], 1 }
 0x530   :  { %4655 = vsyncpa [#allocation10], 1 }
 0x531   :  { %4657 = vsyncpa [#allocation10 + $0x1], 1 }

</bundles_post_ra>
